<compile_context>
chip_gen: v6e
topology: v6e:2x2x1
jax: 0.10.0
libtpu: 0.0.40
codegen_flags: <defaults>
</compile_context>

<pallas_src>
import functools

import jax
import jax.numpy as jnp
from jax.experimental import pallas as pl
from jax.experimental.pallas import tpu as pltpu

BN_EPS = 1e-5
LANE = 128
KSIZE = 3      # ConvBlock defaults
PAD = 1


def _accumulate_taps(x_ref, w_ref, row0, tm_ext, slab_rows, ksize, wp):
    """Shared 3x3 conv body: 9 accumulated (tm_ext, Cin) @ (Cin, Cp) matmuls.

    One aligned dynamic load of the row slab covering all 9 taps of this tile.
    The slab is widened to f32 so the statically-offset tap windows are simple
    sublane shifts (avoids packed-bf16 odd-row relayouts); each window is cast
    back to bf16 (exact round trip) so the MXU runs the fast bf16 path.
    """
    slab = x_ref[pl.ds(row0, slab_rows), :].astype(jnp.float32)
    cp = w_ref.shape[-1]
    acc = jnp.zeros((tm_ext, cp), jnp.float32)
    for kh in range(ksize):
        for kw in range(ksize):
            off = kh * wp + kw                                    # static offset
            win = slab[off:off + tm_ext, :].astype(jnp.bfloat16)  # (tm_ext, Cin)
            acc = acc + jnp.dot(win, w_ref[kh, kw],
                                preferred_element_type=jnp.float32)
    return acc


def _stats_kernel(x_ref, w_ref, mask_ref, sum_ref, sq_ref,
                  *, ksize, wp, slab_rows):
    """Pass 1: conv recompute -> per-image per-channel sum / sum-of-squares."""
    tm_ext = mask_ref.shape[0]
    hb = pl.program_id(1)
    row0 = hb * tm_ext
    if tm_ext % 8 == 0:
        row0 = pl.multiple_of(row0, 8)

    acc = _accumulate_taps(x_ref, w_ref, row0, tm_ext, slab_rows, ksize, wp)
    # Mask excludes the 2 wrap-around "garbage" columns appended to each row by
    # the flattened-spatial formulation.
    accv = acc * mask_ref[...]

    @pl.when(hb == 0)
    def _init():
        sum_ref[...] = jnp.zeros_like(sum_ref)
        sq_ref[...] = jnp.zeros_like(sq_ref)

    sum_ref[...] += jnp.sum(accv, axis=0, keepdims=True)
    sq_ref[...] += jnp.sum(accv * accv, axis=0, keepdims=True)


def _conv_bn_relu_kernel(x_ref, w_ref, scale_ref, shift_ref, o_ref,
                         *, ksize, wp, slab_rows):
    """Pass 2: conv recompute + folded BatchNorm affine + ReLU, fused store."""
    tm_ext = o_ref.shape[0]
    hb = pl.program_id(1)
    row0 = hb * tm_ext
    if tm_ext % 8 == 0:
        row0 = pl.multiple_of(row0, 8)

    acc = _accumulate_taps(x_ref, w_ref, row0, tm_ext, slab_rows, ksize, wp)
    o_ref[...] = jnp.maximum(acc * scale_ref[...] + shift_ref[...],
                             0.0).astype(o_ref.dtype)


def _pick_tile_h(h, wp, cp, budget_bytes=2 * 1024 * 1024):
    """Largest divisor of H whose f32 accumulator tile fits the budget,
    preferring tiles whose flattened row count is sublane (8) aligned."""
    cands = [t for t in range(1, h + 1)
             if h % t == 0 and t * wp * cp * 4 <= budget_bytes
             and ((t * wp) % 8 == 0 or t == h)]
    if not cands:
        cands = [t for t in range(1, h + 1)
                 if h % t == 0 and t * wp * cp * 4 <= budget_bytes]
    if not cands:
        cands = [1]
    return max(cands)


@jax.jit
def conv_block_forward(x_nchw, w_oihw, bias, gamma, beta):
    """ConvBlock forward. x: (N, Cin, H, W) -> (N, Cout, H, W).

    `bias` is accepted for interface parity but not used: training-mode
    BatchNorm subtracts the per-channel batch mean, cancelling it exactly.
    """
    del bias
    N, Cin, H, W = x_nchw.shape
    Cout = w_oihw.shape[0]
    Hp, Wp = H + 2 * PAD, W + 2 * PAD
    Cp = ((Cout + LANE - 1) // LANE) * LANE

    tile_h = _pick_tile_h(H, Wp, Cp)
    n_hb = H // tile_h
    tm_ext = tile_h * Wp                              # tile rows incl. pad cols
    slab_rows = tm_ext + (KSIZE - 1) * Wp             # rows covering all 9 taps
    slab_rows = ((slab_rows + 7) // 8) * 8            # sublane-aligned load
    tail = max(0, (n_hb - 1) * tm_ext + slab_rows - Hp * Wp)
    r_rows = Hp * Wp + tail                           # flattened rows + zero tail

    # NCHW -> padded NHWC -> per-image flattened rows (h,w major; c minor), bf16.
    x_nhwc = jnp.transpose(x_nchw, (0, 2, 3, 1)).astype(jnp.float32)
    xp = jnp.pad(x_nhwc, ((0, 0), (PAD, PAD), (PAD, PAD), (0, 0)))
    xflat = jnp.pad(xp.reshape(N, Hp * Wp, Cin), ((0, 0), (0, tail), (0, 0)))
    xflat = xflat.astype(jnp.bfloat16)

    # (Cout, Cin, kh, kw) -> (kh, kw, Cin, Cout_pad), bf16, zero-padded lanes.
    w_taps = jnp.transpose(w_oihw, (2, 3, 1, 0)).astype(jnp.float32)
    w_taps = jnp.pad(w_taps, ((0, 0), (0, 0), (0, 0), (0, Cp - Cout)))
    w_taps = w_taps.astype(jnp.bfloat16)

    # Validity mask for statistics (1.0 for the W real columns of each row).
    col_valid = (jnp.arange(Wp) < W).astype(jnp.float32)
    mask = jnp.tile(col_valid, tile_h).reshape(tm_ext, 1)

    # ---------------- Pass 1: per-image batch statistics (tiny HBM output) ----
    stats_kernel = functools.partial(_stats_kernel, ksize=KSIZE, wp=Wp,
                                     slab_rows=slab_rows)
    img_sum, img_sq = pl.pallas_call(
        stats_kernel,
        out_shape=(
            jax.ShapeDtypeStruct((N, 1, Cp), jnp.float32),   # per-image sum
            jax.ShapeDtypeStruct((N, 1, Cp), jnp.float32),   # per-image sumsq
        ),
        grid=(N, n_hb),
        in_specs=[
            pl.BlockSpec((None, r_rows, Cin), lambda n, hb: (n, 0, 0)),
            pl.BlockSpec((KSIZE, KSIZE, Cin, Cp), lambda n, hb: (0, 0, 0, 0)),
            pl.BlockSpec((tm_ext, 1), lambda n, hb: (0, 0)),
        ],
        out_specs=(
            pl.BlockSpec((None, 1, Cp), lambda n, hb: (n, 0, 0)),
            pl.BlockSpec((None, 1, Cp), lambda n, hb: (n, 0, 0)),
        ),
        compiler_params=pltpu.CompilerParams(
            dimension_semantics=("parallel", "arbitrary"),   # hb is a reduction
            vmem_limit_bytes=32 * 1024 * 1024),
    )(xflat, w_taps, mask)

    # Fold BN into per-channel scale / shift (tiny (1, Cp) f32 math).
    m = jnp.float32(N * H * W)
    ch_sum = jnp.sum(img_sum, axis=0)                 # (1, Cp)
    ch_sq = jnp.sum(img_sq, axis=0)                   # (1, Cp)
    mean = ch_sum / m
    var = jnp.maximum(ch_sq / m - mean * mean, 0.0)   # clamp E[y^2]-E[y]^2 >= 0
    gamma_p = jnp.pad(gamma.astype(jnp.float32), (0, Cp - Cout)).reshape(1, Cp)
    beta_p = jnp.pad(beta.astype(jnp.float32), (0, Cp - Cout)).reshape(1, Cp)
    scale = gamma_p * jax.lax.rsqrt(var + BN_EPS)
    shift = beta_p - mean * scale

    # ---------------- Pass 2: conv recompute + BN affine + ReLU, fused --------
    fused_kernel = functools.partial(_conv_bn_relu_kernel, ksize=KSIZE, wp=Wp,
                                     slab_rows=slab_rows)
    out_ext = pl.pallas_call(
        fused_kernel,
        out_shape=jax.ShapeDtypeStruct((N, H * Wp, Cp), jnp.float32),
        grid=(N, n_hb),
        in_specs=[
            pl.BlockSpec((None, r_rows, Cin), lambda n, hb: (n, 0, 0)),
            pl.BlockSpec((KSIZE, KSIZE, Cin, Cp), lambda n, hb: (0, 0, 0, 0)),
            pl.BlockSpec((1, Cp), lambda n, hb: (0, 0)),
            pl.BlockSpec((1, Cp), lambda n, hb: (0, 0)),
        ],
        out_specs=pl.BlockSpec((None, tm_ext, Cp), lambda n, hb: (n, hb, 0)),
        compiler_params=pltpu.CompilerParams(
            dimension_semantics=("parallel", "parallel"),
            vmem_limit_bytes=32 * 1024 * 1024),
    )(xflat, w_taps, scale, shift)

    # Drop the 2 garbage columns / padded channels, back to NCHW.
    out = out_ext.reshape(N, H, Wp, Cp)[:, :, :W, :Cout]
    return jnp.transpose(out, (0, 3, 1, 2))


def reference_forward(x_nchw, w_oihw, bias, gamma, beta):
    y = jax.lax.conv_general_dilated(
        x_nchw.astype(jnp.float32), w_oihw.astype(jnp.float32),
        window_strides=(1, 1), padding=((PAD, PAD), (PAD, PAD)),
        dimension_numbers=("NCHW", "OIHW", "NCHW"))
    y = y + bias.reshape(1, -1, 1, 1)
    mean = jnp.mean(y, axis=(0, 2, 3), keepdims=True)
    var = jnp.mean((y - mean) ** 2, axis=(0, 2, 3), keepdims=True)   # biased
    yhat = (y - mean) / jnp.sqrt(var + BN_EPS)
    out = yhat * gamma.reshape(1, -1, 1, 1) + beta.reshape(1, -1, 1, 1)
    return jnp.maximum(out, 0.0)


if __name__ == "__main__":
    # Small deterministic setup: N=2, Cin=4, H=W=16, Cout=8, kernel 3x3 pad 1.
    N, Cin, H, W, Cout, K = 2, 4, 16, 16, 8, 3

    key = jax.random.PRNGKey(0)
    kx, kw, kb = jax.random.split(key, 3)

    x = jax.random.normal(kx, (N, Cin, H, W), dtype=jnp.float32)
    fan_in = Cin * K * K
    bound = 1.0 / (fan_in ** 0.5)
    w = jax.random.uniform(kw, (Cout, Cin, K, K), jnp.float32, -bound, bound)
    b = jax.random.uniform(kb, (Cout,), jnp.float32, -bound, bound)
    gamma = jnp.ones((Cout,), jnp.float32)    # BatchNorm2d default init
    beta = jnp.zeros((Cout,), jnp.float32)

    out = conv_block_forward(x, w, b, gamma, beta)
    out = jax.block_until_ready(out)
    assert out.shape == (N, Cout, H, W)

    # Tight check: reference whose conv inputs are rounded to bf16 (isolates the
    # intended bf16-MXU-operand quantization; everything else must match).
    x_bf = x.astype(jnp.bfloat16).astype(jnp.float32)
    w_bf = w.astype(jnp.bfloat16).astype(jnp.float32)
    ref_bf = reference_forward(x_bf, w_bf, b, gamma, beta)
    assert jnp.allclose(out, ref_bf, atol=1e-3, rtol=1e-3)

    # Loose check against the pure-f32 PyTorch-equivalent reference.
    ref_f32 = reference_forward(x, w, b, gamma, beta)
    assert jnp.allclose(out, ref_f32, atol=5e-2, rtol=5e-2)

    print("KERNEL_OK")
</pallas_src>

<mosaic_0001>
module attributes {stable_mosaic.version = 11 : i64} {
  func.func @_stats_kernel(%arg0: i32, %arg1: i32, %arg2: memref<1x328x4xbf16, #tpu.memory_space<vmem>>, %arg3: memref<3x3x4x128xbf16, #tpu.memory_space<vmem>>, %arg4: memref<288x1xf32, #tpu.memory_space<vmem>>, %arg5: memref<1x1x128xf32, #tpu.memory_space<vmem>>, %arg6: memref<1x1x128xf32, #tpu.memory_space<vmem>>) attributes {dimension_semantics = [#tpu.dimension_semantics<parallel>, #tpu.dimension_semantics<arbitrary>], iteration_bounds = array<i64: 2, 1>, scalar_prefetch = 0 : i64, scratch_operands = 0 : i64, tpu.core_type = #tpu.core_type<tc>, window_params = [{transform_indices = @transform_0, window_bounds = array<i64: 1, 328, 4>}, {pipeline_mode = #tpu.pipeline_mode<synchronous>, transform_indices = @transform_1, window_bounds = array<i64: 3, 3, 4, 128>}, {pipeline_mode = #tpu.pipeline_mode<synchronous>, transform_indices = @transform_2, window_bounds = array<i64: 288, 1>}, {transform_indices = @transform_3, window_bounds = array<i64: 1, 1, 128>}, {transform_indices = @transform_4, window_bounds = array<i64: 1, 1, 128>}]} {
    %c288_i32 = arith.constant 288 : i32
    %0 = arith.muli %arg1, %c288_i32 : i32
    %1 = tpu.assume_multiple %0, 8 : i32
    %c0 = arith.constant 0 : index
    %2 = arith.index_cast %1 : i32 to index
    %c0_0 = arith.constant 0 : index
    %3 = vector.load %arg2[%c0, %2, %c0_0] : memref<1x328x4xbf16, #tpu.memory_space<vmem>>, vector<1x328x4xbf16>
    %4 = vector.shape_cast %3 : vector<1x328x4xbf16> to vector<328x4xbf16>
    %5 = arith.extf %4 : vector<328x4xbf16> to vector<328x4xf32>
    %cst = arith.constant 0.000000e+00 : f32
    %6 = vector.broadcast %cst : f32 to vector<288x128xf32>
    %7 = vector.extract_strided_slice %5 {offsets = [0, 0], sizes = [288, 4], strides = [1, 1]} : vector<328x4xf32> to vector<288x4xf32>
    %8 = arith.truncf %7 : vector<288x4xf32> to vector<288x4xbf16>
    %c0_1 = arith.constant 0 : index
    %c0_2 = arith.constant 0 : index
    %c0_3 = arith.constant 0 : index
    %c0_4 = arith.constant 0 : index
    %9 = vector.load %arg3[%c0_1, %c0_2, %c0_3, %c0_4] : memref<3x3x4x128xbf16, #tpu.memory_space<vmem>>, vector<1x1x4x128xbf16>
    %10 = vector.shape_cast %9 : vector<1x1x4x128xbf16> to vector<4x128xbf16>
    %cst_5 = arith.constant dense<0.000000e+00> : vector<288x128xf32>
    %11 = tpu.matmul %8, %10, %cst_5 {dimension_numbers = #tpu.dot_dimension_numbers<[1], [0], [0], [1], [0, 0, 1, 1], [], []>} : vector<288x4xbf16>, vector<4x128xbf16>, vector<288x128xf32> -> vector<288x128xf32>
    %12 = arith.addf %6, %11 : vector<288x128xf32>
    %13 = vector.extract_strided_slice %5 {offsets = [1, 0], sizes = [288, 4], strides = [1, 1]} : vector<328x4xf32> to vector<288x4xf32>
    %14 = arith.truncf %13 : vector<288x4xf32> to vector<288x4xbf16>
    %c0_6 = arith.constant 0 : index
    %c1 = arith.constant 1 : index
    %c0_7 = arith.constant 0 : index
    %c0_8 = arith.constant 0 : index
    %15 = vector.load %arg3[%c0_6, %c1, %c0_7, %c0_8] : memref<3x3x4x128xbf16, #tpu.memory_space<vmem>>, vector<1x1x4x128xbf16>
    %16 = vector.shape_cast %15 : vector<1x1x4x128xbf16> to vector<4x128xbf16>
    %cst_9 = arith.constant dense<0.000000e+00> : vector<288x128xf32>
    %17 = tpu.matmul %14, %16, %cst_9 {dimension_numbers = #tpu.dot_dimension_numbers<[1], [0], [0], [1], [0, 0, 1, 1], [], []>} : vector<288x4xbf16>, vector<4x128xbf16>, vector<288x128xf32> -> vector<288x128xf32>
    %18 = arith.addf %12, %17 : vector<288x128xf32>
    %19 = vector.extract_strided_slice %5 {offsets = [2, 0], sizes = [288, 4], strides = [1, 1]} : vector<328x4xf32> to vector<288x4xf32>
    %20 = arith.truncf %19 : vector<288x4xf32> to vector<288x4xbf16>
    %c0_10 = arith.constant 0 : index
    %c2 = arith.constant 2 : index
    %c0_11 = arith.constant 0 : index
    %c0_12 = arith.constant 0 : index
    %21 = vector.load %arg3[%c0_10, %c2, %c0_11, %c0_12] : memref<3x3x4x128xbf16, #tpu.memory_space<vmem>>, vector<1x1x4x128xbf16>
    %22 = vector.shape_cast %21 : vector<1x1x4x128xbf16> to vector<4x128xbf16>
    %cst_13 = arith.constant dense<0.000000e+00> : vector<288x128xf32>
    %23 = tpu.matmul %20, %22, %cst_13 {dimension_numbers = #tpu.dot_dimension_numbers<[1], [0], [0], [1], [0, 0, 1, 1], [], []>} : vector<288x4xbf16>, vector<4x128xbf16>, vector<288x128xf32> -> vector<288x128xf32>
    %24 = arith.addf %18, %23 : vector<288x128xf32>
    %25 = vector.extract_strided_slice %5 {offsets = [18, 0], sizes = [288, 4], strides = [1, 1]} : vector<328x4xf32> to vector<288x4xf32>
    %26 = arith.truncf %25 : vector<288x4xf32> to vector<288x4xbf16>
    %c1_14 = arith.constant 1 : index
    %c0_15 = arith.constant 0 : index
    %c0_16 = arith.constant 0 : index
    %c0_17 = arith.constant 0 : index
    %27 = vector.load %arg3[%c1_14, %c0_15, %c0_16, %c0_17] : memref<3x3x4x128xbf16, #tpu.memory_space<vmem>>, vector<1x1x4x128xbf16>
    %28 = vector.shape_cast %27 : vector<1x1x4x128xbf16> to vector<4x128xbf16>
    %cst_18 = arith.constant dense<0.000000e+00> : vector<288x128xf32>
    %29 = tpu.matmul %26, %28, %cst_18 {dimension_numbers = #tpu.dot_dimension_numbers<[1], [0], [0], [1], [0, 0, 1, 1], [], []>} : vector<288x4xbf16>, vector<4x128xbf16>, vector<288x128xf32> -> vector<288x128xf32>
    %30 = arith.addf %24, %29 : vector<288x128xf32>
    %31 = vector.extract_strided_slice %5 {offsets = [19, 0], sizes = [288, 4], strides = [1, 1]} : vector<328x4xf32> to vector<288x4xf32>
    %32 = arith.truncf %31 : vector<288x4xf32> to vector<288x4xbf16>
    %c1_19 = arith.constant 1 : index
    %c1_20 = arith.constant 1 : index
    %c0_21 = arith.constant 0 : index
    %c0_22 = arith.constant 0 : index
    %33 = vector.load %arg3[%c1_19, %c1_20, %c0_21, %c0_22] : memref<3x3x4x128xbf16, #tpu.memory_space<vmem>>, vector<1x1x4x128xbf16>
    %34 = vector.shape_cast %33 : vector<1x1x4x128xbf16> to vector<4x128xbf16>
    %cst_23 = arith.constant dense<0.000000e+00> : vector<288x128xf32>
    %35 = tpu.matmul %32, %34, %cst_23 {dimension_numbers = #tpu.dot_dimension_numbers<[1], [0], [0], [1], [0, 0, 1, 1], [], []>} : vector<288x4xbf16>, vector<4x128xbf16>, vector<288x128xf32> -> vector<288x128xf32>
    %36 = arith.addf %30, %35 : vector<288x128xf32>
    %37 = vector.extract_strided_slice %5 {offsets = [20, 0], sizes = [288, 4], strides = [1, 1]} : vector<328x4xf32> to vector<288x4xf32>
    %38 = arith.truncf %37 : vector<288x4xf32> to vector<288x4xbf16>
    %c1_24 = arith.constant 1 : index
    %c2_25 = arith.constant 2 : index
    %c0_26 = arith.constant 0 : index
    %c0_27 = arith.constant 0 : index
    %39 = vector.load %arg3[%c1_24, %c2_25, %c0_26, %c0_27] : memref<3x3x4x128xbf16, #tpu.memory_space<vmem>>, vector<1x1x4x128xbf16>
    %40 = vector.shape_cast %39 : vector<1x1x4x128xbf16> to vector<4x128xbf16>
    %cst_28 = arith.constant dense<0.000000e+00> : vector<288x128xf32>
    %41 = tpu.matmul %38, %40, %cst_28 {dimension_numbers = #tpu.dot_dimension_numbers<[1], [0], [0], [1], [0, 0, 1, 1], [], []>} : vector<288x4xbf16>, vector<4x128xbf16>, vector<288x128xf32> -> vector<288x128xf32>
    %42 = arith.addf %36, %41 : vector<288x128xf32>
    %43 = vector.extract_strided_slice %5 {offsets = [36, 0], sizes = [288, 4], strides = [1, 1]} : vector<328x4xf32> to vector<288x4xf32>
    %44 = arith.truncf %43 : vector<288x4xf32> to vector<288x4xbf16>
    %c2_29 = arith.constant 2 : index
    %c0_30 = arith.constant 0 : index
    %c0_31 = arith.constant 0 : index
    %c0_32 = arith.constant 0 : index
    %45 = vector.load %arg3[%c2_29, %c0_30, %c0_31, %c0_32] : memref<3x3x4x128xbf16, #tpu.memory_space<vmem>>, vector<1x1x4x128xbf16>
    %46 = vector.shape_cast %45 : vector<1x1x4x128xbf16> to vector<4x128xbf16>
    %cst_33 = arith.constant dense<0.000000e+00> : vector<288x128xf32>
    %47 = tpu.matmul %44, %46, %cst_33 {dimension_numbers = #tpu.dot_dimension_numbers<[1], [0], [0], [1], [0, 0, 1, 1], [], []>} : vector<288x4xbf16>, vector<4x128xbf16>, vector<288x128xf32> -> vector<288x128xf32>
    %48 = arith.addf %42, %47 : vector<288x128xf32>
    %49 = vector.extract_strided_slice %5 {offsets = [37, 0], sizes = [288, 4], strides = [1, 1]} : vector<328x4xf32> to vector<288x4xf32>
    %50 = arith.truncf %49 : vector<288x4xf32> to vector<288x4xbf16>
    %c2_34 = arith.constant 2 : index
    %c1_35 = arith.constant 1 : index
    %c0_36 = arith.constant 0 : index
    %c0_37 = arith.constant 0 : index
    %51 = vector.load %arg3[%c2_34, %c1_35, %c0_36, %c0_37] : memref<3x3x4x128xbf16, #tpu.memory_space<vmem>>, vector<1x1x4x128xbf16>
    %52 = vector.shape_cast %51 : vector<1x1x4x128xbf16> to vector<4x128xbf16>
    %cst_38 = arith.constant dense<0.000000e+00> : vector<288x128xf32>
    %53 = tpu.matmul %50, %52, %cst_38 {dimension_numbers = #tpu.dot_dimension_numbers<[1], [0], [0], [1], [0, 0, 1, 1], [], []>} : vector<288x4xbf16>, vector<4x128xbf16>, vector<288x128xf32> -> vector<288x128xf32>
    %54 = arith.addf %48, %53 : vector<288x128xf32>
    %55 = vector.extract_strided_slice %5 {offsets = [38, 0], sizes = [288, 4], strides = [1, 1]} : vector<328x4xf32> to vector<288x4xf32>
    %56 = arith.truncf %55 : vector<288x4xf32> to vector<288x4xbf16>
    %c2_39 = arith.constant 2 : index
    %c2_40 = arith.constant 2 : index
    %c0_41 = arith.constant 0 : index
    %c0_42 = arith.constant 0 : index
    %57 = vector.load %arg3[%c2_39, %c2_40, %c0_41, %c0_42] : memref<3x3x4x128xbf16, #tpu.memory_space<vmem>>, vector<1x1x4x128xbf16>
    %58 = vector.shape_cast %57 : vector<1x1x4x128xbf16> to vector<4x128xbf16>
    %cst_43 = arith.constant dense<0.000000e+00> : vector<288x128xf32>
    %59 = tpu.matmul %56, %58, %cst_43 {dimension_numbers = #tpu.dot_dimension_numbers<[1], [0], [0], [1], [0, 0, 1, 1], [], []>} : vector<288x4xbf16>, vector<4x128xbf16>, vector<288x128xf32> -> vector<288x128xf32>
    %60 = arith.addf %54, %59 : vector<288x128xf32>
    %c0_44 = arith.constant 0 : index
    %c0_45 = arith.constant 0 : index
    %61 = vector.load %arg4[%c0_44, %c0_45] : memref<288x1xf32, #tpu.memory_space<vmem>>, vector<288x1xf32>
    %62 = vector.broadcast %61 : vector<288x1xf32> to vector<288x128xf32>
    %63 = arith.mulf %60, %62 : vector<288x128xf32>
    %c0_i32 = arith.constant 0 : i32
    %64 = arith.cmpi eq, %arg1, %c0_i32 : i32
    %65 = arith.extui %64 : i1 to i32
    %c0_i32_46 = arith.constant 0 : i32
    %66 = arith.cmpi ne, %65, %c0_i32_46 : i32
    scf.if %66 {
      %cst_61 = arith.constant 0.000000e+00 : f32
      %84 = vector.broadcast %cst_61 : f32 to vector<1x128xf32>
      %c0_62 = arith.constant 0 : index
      %c0_63 = arith.constant 0 : index
      %c0_64 = arith.constant 0 : index
      %85 = vector.load %arg5[%c0_62, %c0_63, %c0_64] : memref<1x1x128xf32, #tpu.memory_space<vmem>>, vector<1x1x128xf32>
      %86 = vector.shape_cast %85 : vector<1x1x128xf32> to vector<1x128xf32>
      %87 = vector.shape_cast %84 : vector<1x128xf32> to vector<1x1x128xf32>
      tpu.vector_store %arg5[%c0_62, %c0_63, %c0_64], %87 {strides = array<i32>} : memref<1x1x128xf32, #tpu.memory_space<vmem>>, vector<1x1x128xf32>,
      %cst_65 = arith.constant 0.000000e+00 : f32
      %88 = vector.broadcast %cst_65 : f32 to vector<1x128xf32>
      %c0_66 = arith.constant 0 : index
      %c0_67 = arith.constant 0 : index
      %c0_68 = arith.constant 0 : index
      %89 = vector.load %arg6[%c0_66, %c0_67, %c0_68] : memref<1x1x128xf32, #tpu.memory_space<vmem>>, vector<1x1x128xf32>
      %90 = vector.shape_cast %89 : vector<1x1x128xf32> to vector<1x128xf32>
      %91 = vector.shape_cast %88 : vector<1x128xf32> to vector<1x1x128xf32>
      tpu.vector_store %arg6[%c0_66, %c0_67, %c0_68], %91 {strides = array<i32>} : memref<1x1x128xf32, #tpu.memory_space<vmem>>, vector<1x1x128xf32>,
    } else {
    }
    %c0_47 = arith.constant 0 : index
    %c0_48 = arith.constant 0 : index
    %c0_49 = arith.constant 0 : index
    %67 = vector.load %arg5[%c0_47, %c0_48, %c0_49] : memref<1x1x128xf32, #tpu.memory_space<vmem>>, vector<1x1x128xf32>
    %68 = vector.shape_cast %67 : vector<1x1x128xf32> to vector<1x128xf32>
    %cst_50 = arith.constant dense<0.000000e+00> : vector<128xf32>
    %69 = vector.multi_reduction <add>, %63, %cst_50 [0] : vector<288x128xf32> to vector<128xf32>
    %70 = vector.shape_cast %69 : vector<128xf32> to vector<1x128xf32>
    %71 = arith.addf %68, %70 : vector<1x128xf32>
    %c0_51 = arith.constant 0 : index
    %c0_52 = arith.constant 0 : index
    %c0_53 = arith.constant 0 : index
    %72 = vector.load %arg5[%c0_51, %c0_52, %c0_53] : memref<1x1x128xf32, #tpu.memory_space<vmem>>, vector<1x1x128xf32>
    %73 = vector.shape_cast %72 : vector<1x1x128xf32> to vector<1x128xf32>
    %74 = vector.shape_cast %71 : vector<1x128xf32> to vector<1x1x128xf32>
    tpu.vector_store %arg5[%c0_51, %c0_52, %c0_53], %74 {strides = array<i32>} : memref<1x1x128xf32, #tpu.memory_space<vmem>>, vector<1x1x128xf32>,
    %c0_54 = arith.constant 0 : index
    %c0_55 = arith.constant 0 : index
    %c0_56 = arith.constant 0 : index
    %75 = vector.load %arg6[%c0_54, %c0_55, %c0_56] : memref<1x1x128xf32, #tpu.memory_space<vmem>>, vector<1x1x128xf32>
    %76 = vector.shape_cast %75 : vector<1x1x128xf32> to vector<1x128xf32>
    %77 = arith.mulf %63, %63 : vector<288x128xf32>
    %cst_57 = arith.constant dense<0.000000e+00> : vector<128xf32>
    %78 = vector.multi_reduction <add>, %77, %cst_57 [0] : vector<288x128xf32> to vector<128xf32>
    %79 = vector.shape_cast %78 : vector<128xf32> to vector<1x128xf32>
    %80 = arith.addf %76, %79 : vector<1x128xf32>
    %c0_58 = arith.constant 0 : index
    %c0_59 = arith.constant 0 : index
    %c0_60 = arith.constant 0 : index
    %81 = vector.load %arg6[%c0_58, %c0_59, %c0_60] : memref<1x1x128xf32, #tpu.memory_space<vmem>>, vector<1x1x128xf32>
    %82 = vector.shape_cast %81 : vector<1x1x128xf32> to vector<1x128xf32>
    %83 = vector.shape_cast %80 : vector<1x128xf32> to vector<1x1x128xf32>
    tpu.vector_store %arg6[%c0_58, %c0_59, %c0_60], %83 {strides = array<i32>} : memref<1x1x128xf32, #tpu.memory_space<vmem>>, vector<1x1x128xf32>,
    return
  }
  func.func @transform_0(%arg0: i32, %arg1: i32) -> (i32, i32, i32) {
    %c0_i32 = arith.constant 0 : i32
    %c0_i32_0 = arith.constant 0 : i32
    %c0_i32_1 = arith.constant 0 : i32
    return %arg0, %c0_i32, %c0_i32_0 : i32, i32, i32
  }
  func.func @transform_1(%arg0: i32, %arg1: i32) -> (i32, i32, i32, i32) {
    %c0_i32 = arith.constant 0 : i32
    %c0_i32_0 = arith.constant 0 : i32
    %c0_i32_1 = arith.constant 0 : i32
    %c0_i32_2 = arith.constant 0 : i32
    %c0_i32_3 = arith.constant 0 : i32
    return %c0_i32, %c0_i32_0, %c0_i32_1, %c0_i32_2 : i32, i32, i32, i32
  }
  func.func @transform_2(%arg0: i32, %arg1: i32) -> (i32, i32) {
    %c0_i32 = arith.constant 0 : i32
    %c0_i32_0 = arith.constant 0 : i32
    %c0_i32_1 = arith.constant 0 : i32
    return %c0_i32, %c0_i32_0 : i32, i32
  }
  func.func @transform_3(%arg0: i32, %arg1: i32) -> (i32, i32, i32) {
    %c0_i32 = arith.constant 0 : i32
    %c0_i32_0 = arith.constant 0 : i32
    %c0_i32_1 = arith.constant 0 : i32
    return %arg0, %c0_i32, %c0_i32_0 : i32, i32, i32
  }
  func.func @transform_4(%arg0: i32, %arg1: i32) -> (i32, i32, i32) {
    %c0_i32 = arith.constant 0 : i32
    %c0_i32_0 = arith.constant 0 : i32
    %c0_i32_1 = arith.constant 0 : i32
    return %arg0, %c0_i32, %c0_i32_0 : i32, i32, i32
  }
}

module attributes {stable_mosaic.version = 11 : i64} {
  func.func @_conv_bn_relu_kernel(%arg0: i32, %arg1: i32, %arg2: memref<1x328x4xbf16, #tpu.memory_space<vmem>>, %arg3: memref<3x3x4x128xbf16, #tpu.memory_space<vmem>>, %arg4: memref<1x128xf32, #tpu.memory_space<vmem>>, %arg5: memref<1x128xf32, #tpu.memory_space<vmem>>, %arg6: memref<1x288x128xf32, #tpu.memory_space<vmem>>) attributes {dimension_semantics = [#tpu.dimension_semantics<parallel>, #tpu.dimension_semantics<parallel>], iteration_bounds = array<i64: 2, 1>, scalar_prefetch = 0 : i64, scratch_operands = 0 : i64, tpu.core_type = #tpu.core_type<tc>, window_params = [{transform_indices = @transform_0, window_bounds = array<i64: 1, 328, 4>}, {pipeline_mode = #tpu.pipeline_mode<synchronous>, transform_indices = @transform_1, window_bounds = array<i64: 3, 3, 4, 128>}, {pipeline_mode = #tpu.pipeline_mode<synchronous>, transform_indices = @transform_2, window_bounds = array<i64: 1, 128>}, {pipeline_mode = #tpu.pipeline_mode<synchronous>, transform_indices = @transform_3, window_bounds = array<i64: 1, 128>}, {transform_indices = @transform_4, window_bounds = array<i64: 1, 288, 128>}]} {
    %c288_i32 = arith.constant 288 : i32
    %0 = arith.muli %arg1, %c288_i32 : i32
    %1 = tpu.assume_multiple %0, 8 : i32
    %c0 = arith.constant 0 : index
    %2 = arith.index_cast %1 : i32 to index
    %c0_0 = arith.constant 0 : index
    %3 = vector.load %arg2[%c0, %2, %c0_0] : memref<1x328x4xbf16, #tpu.memory_space<vmem>>, vector<1x328x4xbf16>
    %4 = vector.shape_cast %3 : vector<1x328x4xbf16> to vector<328x4xbf16>
    %5 = arith.extf %4 : vector<328x4xbf16> to vector<328x4xf32>
    %cst = arith.constant 0.000000e+00 : f32
    %6 = vector.broadcast %cst : f32 to vector<288x128xf32>
    %7 = vector.extract_strided_slice %5 {offsets = [0, 0], sizes = [288, 4], strides = [1, 1]} : vector<328x4xf32> to vector<288x4xf32>
    %8 = arith.truncf %7 : vector<288x4xf32> to vector<288x4xbf16>
    %c0_1 = arith.constant 0 : index
    %c0_2 = arith.constant 0 : index
    %c0_3 = arith.constant 0 : index
    %c0_4 = arith.constant 0 : index
    %9 = vector.load %arg3[%c0_1, %c0_2, %c0_3, %c0_4] : memref<3x3x4x128xbf16, #tpu.memory_space<vmem>>, vector<1x1x4x128xbf16>
    %10 = vector.shape_cast %9 : vector<1x1x4x128xbf16> to vector<4x128xbf16>
    %cst_5 = arith.constant dense<0.000000e+00> : vector<288x128xf32>
    %11 = tpu.matmul %8, %10, %cst_5 {dimension_numbers = #tpu.dot_dimension_numbers<[1], [0], [0], [1], [0, 0, 1, 1], [], []>} : vector<288x4xbf16>, vector<4x128xbf16>, vector<288x128xf32> -> vector<288x128xf32>
    %12 = arith.addf %6, %11 : vector<288x128xf32>
    %13 = vector.extract_strided_slice %5 {offsets = [1, 0], sizes = [288, 4], strides = [1, 1]} : vector<328x4xf32> to vector<288x4xf32>
    %14 = arith.truncf %13 : vector<288x4xf32> to vector<288x4xbf16>
    %c0_6 = arith.constant 0 : index
    %c1 = arith.constant 1 : index
    %c0_7 = arith.constant 0 : index
    %c0_8 = arith.constant 0 : index
    %15 = vector.load %arg3[%c0_6, %c1, %c0_7, %c0_8] : memref<3x3x4x128xbf16, #tpu.memory_space<vmem>>, vector<1x1x4x128xbf16>
    %16 = vector.shape_cast %15 : vector<1x1x4x128xbf16> to vector<4x128xbf16>
    %cst_9 = arith.constant dense<0.000000e+00> : vector<288x128xf32>
    %17 = tpu.matmul %14, %16, %cst_9 {dimension_numbers = #tpu.dot_dimension_numbers<[1], [0], [0], [1], [0, 0, 1, 1], [], []>} : vector<288x4xbf16>, vector<4x128xbf16>, vector<288x128xf32> -> vector<288x128xf32>
    %18 = arith.addf %12, %17 : vector<288x128xf32>
    %19 = vector.extract_strided_slice %5 {offsets = [2, 0], sizes = [288, 4], strides = [1, 1]} : vector<328x4xf32> to vector<288x4xf32>
    %20 = arith.truncf %19 : vector<288x4xf32> to vector<288x4xbf16>
    %c0_10 = arith.constant 0 : index
    %c2 = arith.constant 2 : index
    %c0_11 = arith.constant 0 : index
    %c0_12 = arith.constant 0 : index
    %21 = vector.load %arg3[%c0_10, %c2, %c0_11, %c0_12] : memref<3x3x4x128xbf16, #tpu.memory_space<vmem>>, vector<1x1x4x128xbf16>
    %22 = vector.shape_cast %21 : vector<1x1x4x128xbf16> to vector<4x128xbf16>
    %cst_13 = arith.constant dense<0.000000e+00> : vector<288x128xf32>
    %23 = tpu.matmul %20, %22, %cst_13 {dimension_numbers = #tpu.dot_dimension_numbers<[1], [0], [0], [1], [0, 0, 1, 1], [], []>} : vector<288x4xbf16>, vector<4x128xbf16>, vector<288x128xf32> -> vector<288x128xf32>
    %24 = arith.addf %18, %23 : vector<288x128xf32>
    %25 = vector.extract_strided_slice %5 {offsets = [18, 0], sizes = [288, 4], strides = [1, 1]} : vector<328x4xf32> to vector<288x4xf32>
    %26 = arith.truncf %25 : vector<288x4xf32> to vector<288x4xbf16>
    %c1_14 = arith.constant 1 : index
    %c0_15 = arith.constant 0 : index
    %c0_16 = arith.constant 0 : index
    %c0_17 = arith.constant 0 : index
    %27 = vector.load %arg3[%c1_14, %c0_15, %c0_16, %c0_17] : memref<3x3x4x128xbf16, #tpu.memory_space<vmem>>, vector<1x1x4x128xbf16>
    %28 = vector.shape_cast %27 : vector<1x1x4x128xbf16> to vector<4x128xbf16>
    %cst_18 = arith.constant dense<0.000000e+00> : vector<288x128xf32>
    %29 = tpu.matmul %26, %28, %cst_18 {dimension_numbers = #tpu.dot_dimension_numbers<[1], [0], [0], [1], [0, 0, 1, 1], [], []>} : vector<288x4xbf16>, vector<4x128xbf16>, vector<288x128xf32> -> vector<288x128xf32>
    %30 = arith.addf %24, %29 : vector<288x128xf32>
    %31 = vector.extract_strided_slice %5 {offsets = [19, 0], sizes = [288, 4], strides = [1, 1]} : vector<328x4xf32> to vector<288x4xf32>
    %32 = arith.truncf %31 : vector<288x4xf32> to vector<288x4xbf16>
    %c1_19 = arith.constant 1 : index
    %c1_20 = arith.constant 1 : index
    %c0_21 = arith.constant 0 : index
    %c0_22 = arith.constant 0 : index
    %33 = vector.load %arg3[%c1_19, %c1_20, %c0_21, %c0_22] : memref<3x3x4x128xbf16, #tpu.memory_space<vmem>>, vector<1x1x4x128xbf16>
    %34 = vector.shape_cast %33 : vector<1x1x4x128xbf16> to vector<4x128xbf16>
    %cst_23 = arith.constant dense<0.000000e+00> : vector<288x128xf32>
    %35 = tpu.matmul %32, %34, %cst_23 {dimension_numbers = #tpu.dot_dimension_numbers<[1], [0], [0], [1], [0, 0, 1, 1], [], []>} : vector<288x4xbf16>, vector<4x128xbf16>, vector<288x128xf32> -> vector<288x128xf32>
    %36 = arith.addf %30, %35 : vector<288x128xf32>
    %37 = vector.extract_strided_slice %5 {offsets = [20, 0], sizes = [288, 4], strides = [1, 1]} : vector<328x4xf32> to vector<288x4xf32>
    %38 = arith.truncf %37 : vector<288x4xf32> to vector<288x4xbf16>
    %c1_24 = arith.constant 1 : index
    %c2_25 = arith.constant 2 : index
    %c0_26 = arith.constant 0 : index
    %c0_27 = arith.constant 0 : index
    %39 = vector.load %arg3[%c1_24, %c2_25, %c0_26, %c0_27] : memref<3x3x4x128xbf16, #tpu.memory_space<vmem>>, vector<1x1x4x128xbf16>
    %40 = vector.shape_cast %39 : vector<1x1x4x128xbf16> to vector<4x128xbf16>
    %cst_28 = arith.constant dense<0.000000e+00> : vector<288x128xf32>
    %41 = tpu.matmul %38, %40, %cst_28 {dimension_numbers = #tpu.dot_dimension_numbers<[1], [0], [0], [1], [0, 0, 1, 1], [], []>} : vector<288x4xbf16>, vector<4x128xbf16>, vector<288x128xf32> -> vector<288x128xf32>
    %42 = arith.addf %36, %41 : vector<288x128xf32>
    %43 = vector.extract_strided_slice %5 {offsets = [36, 0], sizes = [288, 4], strides = [1, 1]} : vector<328x4xf32> to vector<288x4xf32>
    %44 = arith.truncf %43 : vector<288x4xf32> to vector<288x4xbf16>
    %c2_29 = arith.constant 2 : index
    %c0_30 = arith.constant 0 : index
    %c0_31 = arith.constant 0 : index
    %c0_32 = arith.constant 0 : index
    %45 = vector.load %arg3[%c2_29, %c0_30, %c0_31, %c0_32] : memref<3x3x4x128xbf16, #tpu.memory_space<vmem>>, vector<1x1x4x128xbf16>
    %46 = vector.shape_cast %45 : vector<1x1x4x128xbf16> to vector<4x128xbf16>
    %cst_33 = arith.constant dense<0.000000e+00> : vector<288x128xf32>
    %47 = tpu.matmul %44, %46, %cst_33 {dimension_numbers = #tpu.dot_dimension_numbers<[1], [0], [0], [1], [0, 0, 1, 1], [], []>} : vector<288x4xbf16>, vector<4x128xbf16>, vector<288x128xf32> -> vector<288x128xf32>
    %48 = arith.addf %42, %47 : vector<288x128xf32>
    %49 = vector.extract_strided_slice %5 {offsets = [37, 0], sizes = [288, 4], strides = [1, 1]} : vector<328x4xf32> to vector<288x4xf32>
    %50 = arith.truncf %49 : vector<288x4xf32> to vector<288x4xbf16>
    %c2_34 = arith.constant 2 : index
    %c1_35 = arith.constant 1 : index
    %c0_36 = arith.constant 0 : index
    %c0_37 = arith.constant 0 : index
    %51 = vector.load %arg3[%c2_34, %c1_35, %c0_36, %c0_37] : memref<3x3x4x128xbf16, #tpu.memory_space<vmem>>, vector<1x1x4x128xbf16>
    %52 = vector.shape_cast %51 : vector<1x1x4x128xbf16> to vector<4x128xbf16>
    %cst_38 = arith.constant dense<0.000000e+00> : vector<288x128xf32>
    %53 = tpu.matmul %50, %52, %cst_38 {dimension_numbers = #tpu.dot_dimension_numbers<[1], [0], [0], [1], [0, 0, 1, 1], [], []>} : vector<288x4xbf16>, vector<4x128xbf16>, vector<288x128xf32> -> vector<288x128xf32>
    %54 = arith.addf %48, %53 : vector<288x128xf32>
    %55 = vector.extract_strided_slice %5 {offsets = [38, 0], sizes = [288, 4], strides = [1, 1]} : vector<328x4xf32> to vector<288x4xf32>
    %56 = arith.truncf %55 : vector<288x4xf32> to vector<288x4xbf16>
    %c2_39 = arith.constant 2 : index
    %c2_40 = arith.constant 2 : index
    %c0_41 = arith.constant 0 : index
    %c0_42 = arith.constant 0 : index
    %57 = vector.load %arg3[%c2_39, %c2_40, %c0_41, %c0_42] : memref<3x3x4x128xbf16, #tpu.memory_space<vmem>>, vector<1x1x4x128xbf16>
    %58 = vector.shape_cast %57 : vector<1x1x4x128xbf16> to vector<4x128xbf16>
    %cst_43 = arith.constant dense<0.000000e+00> : vector<288x128xf32>
    %59 = tpu.matmul %56, %58, %cst_43 {dimension_numbers = #tpu.dot_dimension_numbers<[1], [0], [0], [1], [0, 0, 1, 1], [], []>} : vector<288x4xbf16>, vector<4x128xbf16>, vector<288x128xf32> -> vector<288x128xf32>
    %60 = arith.addf %54, %59 : vector<288x128xf32>
    %c0_44 = arith.constant 0 : index
    %c0_45 = arith.constant 0 : index
    %61 = vector.load %arg4[%c0_44, %c0_45] : memref<1x128xf32, #tpu.memory_space<vmem>>, vector<1x128xf32>
    %62 = vector.broadcast %61 : vector<1x128xf32> to vector<288x128xf32>
    %63 = arith.mulf %60, %62 : vector<288x128xf32>
    %c0_46 = arith.constant 0 : index
    %c0_47 = arith.constant 0 : index
    %64 = vector.load %arg5[%c0_46, %c0_47] : memref<1x128xf32, #tpu.memory_space<vmem>>, vector<1x128xf32>
    %65 = vector.broadcast %64 : vector<1x128xf32> to vector<288x128xf32>
    %66 = arith.addf %63, %65 : vector<288x128xf32>
    %cst_48 = arith.constant 0.000000e+00 : f32
    %67 = vector.broadcast %cst_48 : f32 to vector<288x128xf32>
    %68 = arith.maximumf %66, %67 : vector<288x128xf32>
    %c0_49 = arith.constant 0 : index
    %c0_50 = arith.constant 0 : index
    %c0_51 = arith.constant 0 : index
    %69 = vector.load %arg6[%c0_49, %c0_50, %c0_51] : memref<1x288x128xf32, #tpu.memory_space<vmem>>, vector<1x288x128xf32>
    %70 = vector.shape_cast %69 : vector<1x288x128xf32> to vector<288x128xf32>
    %71 = vector.shape_cast %68 : vector<288x128xf32> to vector<1x288x128xf32>
    tpu.vector_store %arg6[%c0_49, %c0_50, %c0_51], %71 {strides = array<i32>} : memref<1x288x128xf32, #tpu.memory_space<vmem>>, vector<1x288x128xf32>,
    return
  }
  func.func @transform_0(%arg0: i32, %arg1: i32) -> (i32, i32, i32) {
    %c0_i32 = arith.constant 0 : i32
    %c0_i32_0 = arith.constant 0 : i32
    %c0_i32_1 = arith.constant 0 : i32
    return %arg0, %c0_i32, %c0_i32_0 : i32, i32, i32
  }
  func.func @transform_1(%arg0: i32, %arg1: i32) -> (i32, i32, i32, i32) {
    %c0_i32 = arith.constant 0 : i32
    %c0_i32_0 = arith.constant 0 : i32
    %c0_i32_1 = arith.constant 0 : i32
    %c0_i32_2 = arith.constant 0 : i32
    %c0_i32_3 = arith.constant 0 : i32
    return %c0_i32, %c0_i32_0, %c0_i32_1, %c0_i32_2 : i32, i32, i32, i32
  }
  func.func @transform_2(%arg0: i32, %arg1: i32) -> (i32, i32) {
    %c0_i32 = arith.constant 0 : i32
    %c0_i32_0 = arith.constant 0 : i32
    %c0_i32_1 = arith.constant 0 : i32
    return %c0_i32, %c0_i32_0 : i32, i32
  }
  func.func @transform_3(%arg0: i32, %arg1: i32) -> (i32, i32) {
    %c0_i32 = arith.constant 0 : i32
    %c0_i32_0 = arith.constant 0 : i32
    %c0_i32_1 = arith.constant 0 : i32
    return %c0_i32, %c0_i32_0 : i32, i32
  }
  func.func @transform_4(%arg0: i32, %arg1: i32) -> (i32, i32, i32) {
    %c0_i32 = arith.constant 0 : i32
    %c0_i32_0 = arith.constant 0 : i32
    return %arg0, %arg1, %c0_i32 : i32, i32, i32
  }
}

</mosaic_0001>

<bundles_post_ra>
// kernel: tile.8
= control target key start
LH: loop header
LB: loop body
LE: loop exit
PB: predicated region body
PF: predicated region fallthrough
CT: control target
= control target key end

     0   :  { %s28_s0 = inlined_call_operand.vmem [shape: f32[18], index: 0, kind: input, shape index: {}]   ;;  %s29_s1 = inlined_call_operand.vmem [shape: f32[16,18], index: 1, kind: output, shape index: {}]  }
   0x1   :  { %v4_v0 = vld [vmem:[%s28_s0] ss:$0 sm:$0xff] }
   0x2   :  { %5 = vst [vmem:[%s29_s1] sm:$0xff] %v4_v0  ;;  %8 = vst [vmem:[%s29_s1 + $0x8] sm:$0xff] %v4_v0 }

// kernel: tile.0
= control target key start
LH: loop header
LB: loop body
LE: loop exit
PB: predicated region body
PF: predicated region fallthrough
CT: control target
= control target key end

     0   :  { %s607_s10 = smov 126   ;;  %s608_s11 = smov 127   ;;  %vm3_vm0 = vcmask 7168   ;;  %s1250_s0 = inlined_call_operand.vmem [shape: f32[16,18], index: 0, kind: input, shape index: {}]   ;;  %s1251_s1 = inlined_call_operand.vmem [shape: f32[288,1], index: 1, kind: output, shape index: {}]  }
   0x1   :  { %v35_v0 = vld.sshfl [vmem:[%s1250_s0] sm:$0xff pattern:$0x6d4b2907]   ;;  %v450_v2 = vld.sshfl [vmem:[%s1250_s0 + $0x1] sm:$0xff pattern:$0xd4b2907e]  }
   0x2   :  { %v640_v1 = vld.sshfl [vmem:[%s1250_s0] sm:$0xff pattern:$0xf6d4b290]   ;;  %36 = vrot.lane.b32.xlu1 %v35_v0, %s607_s10  ;;  %v649_v3 = vld.sshfl [vmem:[%s1250_s0 + $0x1] sm:$0xff pattern:$0x6d4b2907]  }
   0x3   :  { %11 = vrot.lane.b32.xlu0 %v640_v1, %s608_s11  ;;  %s609_s16 = smov 125   ;;  %v468_v4 = vld.sshfl [vmem:[%s1250_s0 + $0x1] sm:$0xff pattern:$0x4b2907e5]   ;;  %s610_s21 = smov 124  }
   0x4   :  { %v85_v5 = vld.sshfl [vmem:[%s1250_s0] sm:$0xff pattern:$0xd4b2907e]   ;;  %s611_s22 = smov 123   ;;  %s612_s27 = smov 122  }
   0x5   :  { %v486_v6 = vld.sshfl [vmem:[%s1250_s0 + $0x1] sm:$0xff pattern:$0xb2907e5c]   ;;  %v135_v7 = vld.sshfl [vmem:[%s1250_s0] sm:$0xff pattern:$0x4b2907e5]  }
   0x6   :  { %49 = vrot.lane.b32.xlu1 %v450_v2, %s607_s10  ;;  %s613_s28 = smov 121   ;;  %v504_v8 = vld.sshfl [vmem:[%s1250_s0 + $0x1] sm:$0xff pattern:$0x2907e5c3]   ;;  %s614_s4 = smov 120  }
   0x7   :  { %24 = vrot.lane.b32.xlu0 %v649_v3, %s608_s11  ;;  %v185_v9 = vld.sshfl [vmem:[%s1250_s0] sm:$0xff pattern:$0xb2907e5c]   ;;  %s615_s5 = smov 119   ;;  %s616_s10 = smov 118  }
   0x8   :  { %v522_v10 = vld.sshfl [vmem:[%s1250_s0 + $0x1] sm:$0xff pattern:$0x907e5c3a]   ;;  %v235_v11 = vld.sshfl [vmem:[%s1250_s0] sm:$0xff pattern:$0x2907e5c3]  }
   0x9   :  { %s617_s11 = smov 117   ;;  %v540_v12 = vld.sshfl [vmem:[%s1250_s0 + $0x1] sm:$0xff pattern:$0x7e5c3a1]   ;;  %s619_s17 = smov 115  }
   0xa   :  { %74 = vrot.lane.b32.xlu1 %v450_v2, %s609_s16  ;;  %v285_v13 = vld.sshfl [vmem:[%s1250_s0] sm:$0xff pattern:$0x907e5c3a]   ;;  %s620_s29 = smov 114   ;;  %s621_s30 = smov 113  }
   0xb   :  { %61 = vrot.lane.b32.xlu0 %v35_v0, %s609_s16  ;;  %s618_s16 = smov 116   ;;  %v558_v14 = vld.sshfl [vmem:[%s1250_s0 + $0x2] sm:$0xff pattern:$0x6d4b2907]   ;;  %s622_s2 = smov 112  }
   0xc   :  { %v335_v15 = vld.sshfl [vmem:[%s1250_s0] sm:$0xff pattern:$0x7e5c3a1]   ;;  %s623_s3 = smov 111  }
   0xd   :  { %v2_v16 = vld [vmem:[%s1250_s0] sm:$0xff]   ;;  %v435_v17 = vld [vmem:[%s1250_s0 + $0x8] sm:$0xff]  }
   0xe   :  { %99 = vrot.lane.b32.xlu1 %v468_v4, %s610_s21  ;;  %4 = vst.msk [vmem:[%s1251_s1] ss:$18 sm:$0xff] %vm3_vm0, %v2_v16   ;;  %436 = vst.msk [vmem:[%s1251_s1 + $0x90] ss:$18 sm:$0xff] %vm3_vm0, %v435_v17  }
   0xf   :  { %86 = vrot.lane.b32.xlu0 %v85_v5, %s610_s21 }
  0x12   :  { %124 = vrot.lane.b32.xlu1 %v468_v4, %s611_s22 }
  0x13   :  { %111 = vrot.lane.b32.xlu0 %v85_v5, %s611_s22 }
  0x16   :  { %149 = vrot.lane.b32.xlu1 %v486_v6, %s612_s27 }
  0x17   :  { %136 = vrot.lane.b32.xlu0 %v135_v7, %s612_s27 }
  0x1a   :  { %174 = vrot.lane.b32.xlu1 %v486_v6, %s613_s28 }
  0x1b   :  { %161 = vrot.lane.b32.xlu0 %v135_v7, %s613_s28 }
  0x1e   :  { %199 = vrot.lane.b32.xlu1 %v504_v8, %s614_s4 }
  0x1f   :  { %186 = vrot.lane.b32.xlu0 %v185_v9, %s614_s4 }
  0x22   :  { %224 = vrot.lane.b32.xlu1 %v504_v8, %s615_s5 }
  0x23   :  { %211 = vrot.lane.b32.xlu0 %v185_v9, %s615_s5 }
  0x26   :  { %249 = vrot.lane.b32.xlu1 %v522_v10, %s616_s10 }
  0x27   :  { %236 = vrot.lane.b32.xlu0 %v235_v11, %s616_s10 }
  0x2a   :  { %274 = vrot.lane.b32.xlu1 %v522_v10, %s617_s11 }
  0x2b   :  { %261 = vrot.lane.b32.xlu0 %v235_v11, %s617_s11 }
  0x2e   :  { %299 = vrot.lane.b32.xlu1 %v540_v12, %s618_s16 }
  0x2f   :  { %286 = vrot.lane.b32.xlu0 %v285_v13, %s618_s16 }
  0x32   :  { %324 = vrot.lane.b32.xlu1 %v540_v12, %s619_s17 }
  0x33   :  { %311 = vrot.lane.b32.xlu0 %v285_v13, %s619_s17 }
  0x36   :  { %349 = vrot.lane.b32.xlu1 %v558_v14, %s620_s29 }
  0x37   :  { %336 = vrot.lane.b32.xlu0 %v335_v15, %s620_s29 }
  0x3a   :  { %374 = vrot.lane.b32.xlu1 %v558_v14, %s621_s30 }
  0x3b   :  { %361 = vrot.lane.b32.xlu0 %v335_v15, %s621_s30 }
  0x3e   :  { %399 = vrot.lane.b32.xlu1 %v640_v1, %s622_s2 }
  0x3f   :  { %387 = vrot.lane.b32.xlu0 %v649_v3, %s622_s2 }
  0x42   :  { %424 = vrot.lane.b32.xlu1 %v640_v1, %s623_s3 }
  0x43   :  { %412 = vrot.lane.b32.xlu0 %v649_v3, %s623_s3 }
  0x74   :  { %v37_v18 = vpop.permute.xlu1 %36  }
  0x75   :  { %v12_v19 = vpop.permute.xlu0 %11   ;;  %446 = vst.msk [vmem:[%s1251_s1 + $0x80] ss:$-126 sm:$0x3] %vm3_vm0, %v37_v18   ;;  %447 = vst.msk [vmem:[%s1251_s1 + $0x1a0] ss:$-126 sm:$0xc] %vm3_vm0, %v37_v18  }
  0x76   :  { %448 = vst.msk [vmem:[%s1251_s1 + $0x2c0] ss:$-126 sm:$0x30] %vm3_vm0, %v37_v18   ;;  %449 = vst.msk [vmem:[%s1251_s1 + $0x3e0] ss:$-126 sm:$0xc0] %vm3_vm0, %v37_v18  }
  0x77   :  { %437 = vst.msk [vmem:[%s1251_s1 + $0x1] ss:$162 sm:$0x3] %vm3_vm0, %v12_v19   ;;  %438 = vst.msk [vmem:[%s1251_s1 - $0x11f] ss:$162 sm:$0xc] %vm3_vm0, %v12_v19  }
  0x78   :  { %439 = vst.msk [vmem:[%s1251_s1 - $0x23f] ss:$162 sm:$0x30] %vm3_vm0, %v12_v19   ;;  %440 = vst.msk [vmem:[%s1251_s1 - $0x35f] ss:$162 sm:$0xc0] %vm3_vm0, %v12_v19   ;;  %v50_v20 = vpop.permute.xlu1 %49  }
  0x79   :  { %v25_v21 = vpop.permute.xlu0 %24   ;;  %451 = vst.msk [vmem:[%s1251_s1 + $0x110] ss:$-126 sm:$0x7] %vm3_vm0, %v50_v20   ;;  %452 = vst.msk [vmem:[%s1251_s1 + $0x230] ss:$-126 sm:$0x18] %vm3_vm0, %v50_v20  }
  0x7a   :  { %453 = vst.msk [vmem:[%s1251_s1 + $0x350] ss:$-126 sm:$0x60] %vm3_vm0, %v50_v20   ;;  %454 = vst.msk [vmem:[%s1251_s1 + $0xf7] sm:$0x80] %vm3_vm0, %v50_v20  }
  0x7b   :  { %442 = vst.msk [vmem:[%s1251_s1 + $0x91] ss:$-126 sm:$0x3] %vm3_vm0, %v25_v21   ;;  %443 = vst.msk [vmem:[%s1251_s1 + $0x1b1] ss:$-126 sm:$0xc] %vm3_vm0, %v25_v21  }
  0x7c   :  { %444 = vst.msk [vmem:[%s1251_s1 + $0x2d1] ss:$-126 sm:$0x30] %vm3_vm0, %v25_v21   ;;  %445 = vst.msk [vmem:[%s1251_s1 + $0x3f1] ss:$-126 sm:$0xc0] %vm3_vm0, %v25_v21   ;;  %v75_v22 = vpop.permute.xlu1 %74  }
  0x7d   :  { %v62_v23 = vpop.permute.xlu0 %61   ;;  %460 = vst.msk [vmem:[%s1251_s1 + $0x111] ss:$-126 sm:$0x7] %vm3_vm0, %v75_v22   ;;  %461 = vst.msk [vmem:[%s1251_s1 + $0x231] ss:$-126 sm:$0x18] %vm3_vm0, %v75_v22  }
  0x7e   :  { %462 = vst.msk [vmem:[%s1251_s1 + $0x351] ss:$-126 sm:$0x60] %vm3_vm0, %v75_v22   ;;  %463 = vst.msk [vmem:[%s1251_s1 + $0xf8] sm:$0x80] %vm3_vm0, %v75_v22  }
  0x7f   :  { %455 = vst.msk [vmem:[%s1251_s1 + $0x81] ss:$-126 sm:$0x3] %vm3_vm0, %v62_v23   ;;  %456 = vst.msk [vmem:[%s1251_s1 + $0x1a1] ss:$-126 sm:$0xc] %vm3_vm0, %v62_v23  }
  0x80   :  { %457 = vst.msk [vmem:[%s1251_s1 + $0x2c1] ss:$-126 sm:$0x30] %vm3_vm0, %v62_v23   ;;  %458 = vst.msk [vmem:[%s1251_s1 + $0x3e1] ss:$-126 sm:$0xc0] %vm3_vm0, %v62_v23   ;;  %v100_v24 = vpop.permute.xlu1 %99  }
  0x81   :  { %v87_v25 = vpop.permute.xlu0 %86   ;;  %469 = vst.msk [vmem:[%s1251_s1 + $0x70] ss:$162 sm:$0x3] %vm3_vm0, %v100_v24   ;;  %470 = vst.msk [vmem:[%s1251_s1 + $0x190] ss:$-126 sm:$0xc] %vm3_vm0, %v100_v24  }
  0x82   :  { %471 = vst.msk [vmem:[%s1251_s1 + $0x2b0] ss:$-126 sm:$0x30] %vm3_vm0, %v100_v24   ;;  %472 = vst.msk [vmem:[%s1251_s1 + $0x3d0] ss:$-126 sm:$0xc0] %vm3_vm0, %v100_v24  }
  0x83   :  { %464 = vst.msk [vmem:[%s1251_s1 + $0x100] ss:$-126 sm:$0x7] %vm3_vm0, %v87_v25   ;;  %465 = vst.msk [vmem:[%s1251_s1 + $0x220] ss:$-126 sm:$0x18] %vm3_vm0, %v87_v25  }
  0x84   :  { %466 = vst.msk [vmem:[%s1251_s1 + $0x340] ss:$-126 sm:$0x60] %vm3_vm0, %v87_v25   ;;  %467 = vst.msk [vmem:[%s1251_s1 + $0xe7] sm:$0x80] %vm3_vm0, %v87_v25   ;;  %v125_v26 = vpop.permute.xlu1 %124  }
  0x85   :  { %v112_v27 = vpop.permute.xlu0 %111   ;;  %478 = vst.msk [vmem:[%s1251_s1 + $0x71] ss:$162 sm:$0x3] %vm3_vm0, %v125_v26   ;;  %479 = vst.msk [vmem:[%s1251_s1 + $0x191] ss:$-126 sm:$0xc] %vm3_vm0, %v125_v26  }
  0x86   :  { %480 = vst.msk [vmem:[%s1251_s1 + $0x2b1] ss:$-126 sm:$0x30] %vm3_vm0, %v125_v26   ;;  %481 = vst.msk [vmem:[%s1251_s1 + $0x3d1] ss:$-126 sm:$0xc0] %vm3_vm0, %v125_v26  }
  0x87   :  { %473 = vst.msk [vmem:[%s1251_s1 + $0x101] ss:$-126 sm:$0x7] %vm3_vm0, %v112_v27   ;;  %474 = vst.msk [vmem:[%s1251_s1 + $0x221] ss:$-126 sm:$0x18] %vm3_vm0, %v112_v27  }
  0x88   :  { %475 = vst.msk [vmem:[%s1251_s1 + $0x341] ss:$-126 sm:$0x60] %vm3_vm0, %v112_v27   ;;  %476 = vst.msk [vmem:[%s1251_s1 + $0xe8] sm:$0x80] %vm3_vm0, %v112_v27   ;;  %v150_v28 = vpop.permute.xlu1 %149  }
  0x89   :  { %v137_v29 = vpop.permute.xlu0 %136   ;;  %487 = vst.msk [vmem:[%s1251_s1 + $0xf0] ss:$-126 sm:$0x3] %vm3_vm0, %v150_v28   ;;  %488 = vst.msk [vmem:[%s1251_s1 + $0x210] ss:$-126 sm:$0x1c] %vm3_vm0, %v150_v28  }
  0x8a   :  { %489 = vst.msk [vmem:[%s1251_s1 + $0x330] ss:$-126 sm:$0x60] %vm3_vm0, %v150_v28   ;;  %490 = vst.msk [vmem:[%s1251_s1 + $0xd7] sm:$0x80] %vm3_vm0, %v150_v28  }
  0x8b   :  { %482 = vst.msk [vmem:[%s1251_s1 + $0x60] ss:$162 sm:$0x3] %vm3_vm0, %v137_v29   ;;  %483 = vst.msk [vmem:[%s1251_s1 + $0x180] ss:$-126 sm:$0xc] %vm3_vm0, %v137_v29  }
  0x8c   :  { %484 = vst.msk [vmem:[%s1251_s1 + $0x2a0] ss:$-126 sm:$0x30] %vm3_vm0, %v137_v29   ;;  %485 = vst.msk [vmem:[%s1251_s1 + $0x3c0] ss:$-126 sm:$0xc0] %vm3_vm0, %v137_v29   ;;  %v175_v30 = vpop.permute.xlu1 %174  }
  0x8d   :  { %v162_v31 = vpop.permute.xlu0 %161   ;;  %496 = vst.msk [vmem:[%s1251_s1 + $0xf1] ss:$-126 sm:$0x3] %vm3_vm0, %v175_v30   ;;  %497 = vst.msk [vmem:[%s1251_s1 + $0x211] ss:$-126 sm:$0x1c] %vm3_vm0, %v175_v30  }
  0x8e   :  { %498 = vst.msk [vmem:[%s1251_s1 + $0x331] ss:$-126 sm:$0x60] %vm3_vm0, %v175_v30   ;;  %499 = vst.msk [vmem:[%s1251_s1 + $0xd8] sm:$0x80] %vm3_vm0, %v175_v30  }
  0x8f   :  { %491 = vst.msk [vmem:[%s1251_s1 + $0x61] ss:$162 sm:$0x3] %vm3_vm0, %v162_v31   ;;  %492 = vst.msk [vmem:[%s1251_s1 + $0x181] ss:$-126 sm:$0xc] %vm3_vm0, %v162_v31  }
  0x90   :  { %493 = vst.msk [vmem:[%s1251_s1 + $0x2a1] ss:$-126 sm:$0x30] %vm3_vm0, %v162_v31   ;;  %494 = vst.msk [vmem:[%s1251_s1 + $0x3c1] ss:$-126 sm:$0xc0] %vm3_vm0, %v162_v31   ;;  %v200_v32 = vpop.permute.xlu1 %199  }
  0x91   :  { %v187_v33 = vpop.permute.xlu0 %186   ;;  %505 = vst.msk [vmem:[%s1251_s1 + $0x50] ss:$162 sm:$0x3] %vm3_vm0, %v200_v32   ;;  %506 = vst.msk [vmem:[%s1251_s1 - $0xd0] ss:$162 sm:$0xc] %vm3_vm0, %v200_v32  }
  0x92   :  { %507 = vst.msk [vmem:[%s1251_s1 + $0x290] ss:$-126 sm:$0x30] %vm3_vm0, %v200_v32   ;;  %508 = vst.msk [vmem:[%s1251_s1 + $0x3b0] ss:$-126 sm:$0xc0] %vm3_vm0, %v200_v32  }
  0x93   :  { %500 = vst.msk [vmem:[%s1251_s1 + $0xe0] ss:$-126 sm:$0x3] %vm3_vm0, %v187_v33   ;;  %501 = vst.msk [vmem:[%s1251_s1 + $0x200] ss:$-126 sm:$0x1c] %vm3_vm0, %v187_v33  }
  0x94   :  { %502 = vst.msk [vmem:[%s1251_s1 + $0x320] ss:$-126 sm:$0x60] %vm3_vm0, %v187_v33   ;;  %503 = vst.msk [vmem:[%s1251_s1 + $0xc7] sm:$0x80] %vm3_vm0, %v187_v33   ;;  %v225_v34 = vpop.permute.xlu1 %224  }
  0x95   :  { %v212_v35 = vpop.permute.xlu0 %211   ;;  %514 = vst.msk [vmem:[%s1251_s1 + $0x51] ss:$162 sm:$0x3] %vm3_vm0, %v225_v34   ;;  %515 = vst.msk [vmem:[%s1251_s1 - $0xcf] ss:$162 sm:$0xc] %vm3_vm0, %v225_v34  }
  0x96   :  { %516 = vst.msk [vmem:[%s1251_s1 + $0x291] ss:$-126 sm:$0x30] %vm3_vm0, %v225_v34   ;;  %517 = vst.msk [vmem:[%s1251_s1 + $0x3b1] ss:$-126 sm:$0xc0] %vm3_vm0, %v225_v34  }
  0x97   :  { %509 = vst.msk [vmem:[%s1251_s1 + $0xe1] ss:$-126 sm:$0x3] %vm3_vm0, %v212_v35   ;;  %510 = vst.msk [vmem:[%s1251_s1 + $0x201] ss:$-126 sm:$0x1c] %vm3_vm0, %v212_v35  }
  0x98   :  { %511 = vst.msk [vmem:[%s1251_s1 + $0x321] ss:$-126 sm:$0x60] %vm3_vm0, %v212_v35   ;;  %512 = vst.msk [vmem:[%s1251_s1 + $0xc8] sm:$0x80] %vm3_vm0, %v212_v35   ;;  %v250_v36 = vpop.permute.xlu1 %249  }
  0x99   :  { %v237_v37 = vpop.permute.xlu0 %236   ;;  %523 = vst.msk [vmem:[%s1251_s1 + $0xd0] ss:$-126 sm:$0x3] %vm3_vm0, %v250_v36   ;;  %524 = vst.msk [vmem:[%s1251_s1 + $0x1f0] ss:$-126 sm:$0xc] %vm3_vm0, %v250_v36  }
  0x9a   :  { %525 = vst.msk [vmem:[%s1251_s1 + $0x310] ss:$-126 sm:$0x70] %vm3_vm0, %v250_v36   ;;  %526 = vst.msk [vmem:[%s1251_s1 + $0xb7] sm:$0x80] %vm3_vm0, %v250_v36  }
  0x9b   :  { %518 = vst.msk [vmem:[%s1251_s1 + $0x40] ss:$162 sm:$0x3] %vm3_vm0, %v237_v37   ;;  %519 = vst.msk [vmem:[%s1251_s1 - $0xe0] ss:$162 sm:$0xc] %vm3_vm0, %v237_v37  }
  0x9c   :  { %520 = vst.msk [vmem:[%s1251_s1 + $0x280] ss:$-126 sm:$0x30] %vm3_vm0, %v237_v37   ;;  %521 = vst.msk [vmem:[%s1251_s1 + $0x3a0] ss:$-126 sm:$0xc0] %vm3_vm0, %v237_v37   ;;  %v275_v38 = vpop.permute.xlu1 %274  }
  0x9d   :  { %v262_v39 = vpop.permute.xlu0 %261   ;;  %532 = vst.msk [vmem:[%s1251_s1 + $0xd1] ss:$-126 sm:$0x3] %vm3_vm0, %v275_v38   ;;  %533 = vst.msk [vmem:[%s1251_s1 + $0x1f1] ss:$-126 sm:$0xc] %vm3_vm0, %v275_v38  }
  0x9e   :  { %534 = vst.msk [vmem:[%s1251_s1 + $0x311] ss:$-126 sm:$0x70] %vm3_vm0, %v275_v38   ;;  %535 = vst.msk [vmem:[%s1251_s1 + $0xb8] sm:$0x80] %vm3_vm0, %v275_v38  }
  0x9f   :  { %527 = vst.msk [vmem:[%s1251_s1 + $0x41] ss:$162 sm:$0x3] %vm3_vm0, %v262_v39   ;;  %528 = vst.msk [vmem:[%s1251_s1 - $0xdf] ss:$162 sm:$0xc] %vm3_vm0, %v262_v39  }
  0xa0   :  { %529 = vst.msk [vmem:[%s1251_s1 + $0x281] ss:$-126 sm:$0x30] %vm3_vm0, %v262_v39   ;;  %530 = vst.msk [vmem:[%s1251_s1 + $0x3a1] ss:$-126 sm:$0xc0] %vm3_vm0, %v262_v39   ;;  %v300_v40 = vpop.permute.xlu1 %299  }
  0xa1   :  { %v287_v41 = vpop.permute.xlu0 %286   ;;  %541 = vst.msk [vmem:[%s1251_s1 + $0x30] ss:$162 sm:$0x3] %vm3_vm0, %v300_v40   ;;  %542 = vst.msk [vmem:[%s1251_s1 - $0xf0] ss:$162 sm:$0xc] %vm3_vm0, %v300_v40  }
  0xa2   :  { %543 = vst.msk [vmem:[%s1251_s1 - $0x210] ss:$162 sm:$0x30] %vm3_vm0, %v300_v40   ;;  %544 = vst.msk [vmem:[%s1251_s1 + $0x390] ss:$-126 sm:$0xc0] %vm3_vm0, %v300_v40  }
  0xa3   :  { %536 = vst.msk [vmem:[%s1251_s1 + $0xc0] ss:$-126 sm:$0x3] %vm3_vm0, %v287_v41   ;;  %537 = vst.msk [vmem:[%s1251_s1 + $0x1e0] ss:$-126 sm:$0xc] %vm3_vm0, %v287_v41  }
  0xa4   :  { %538 = vst.msk [vmem:[%s1251_s1 + $0x300] ss:$-126 sm:$0x70] %vm3_vm0, %v287_v41   ;;  %539 = vst.msk [vmem:[%s1251_s1 + $0xa7] sm:$0x80] %vm3_vm0, %v287_v41   ;;  %v325_v42 = vpop.permute.xlu1 %324  }
  0xa5   :  { %v312_v43 = vpop.permute.xlu0 %311   ;;  %550 = vst.msk [vmem:[%s1251_s1 + $0x31] ss:$162 sm:$0x3] %vm3_vm0, %v325_v42   ;;  %551 = vst.msk [vmem:[%s1251_s1 - $0xef] ss:$162 sm:$0xc] %vm3_vm0, %v325_v42  }
  0xa6   :  { %552 = vst.msk [vmem:[%s1251_s1 - $0x20f] ss:$162 sm:$0x30] %vm3_vm0, %v325_v42   ;;  %553 = vst.msk [vmem:[%s1251_s1 + $0x391] ss:$-126 sm:$0xc0] %vm3_vm0, %v325_v42  }
  0xa7   :  { %545 = vst.msk [vmem:[%s1251_s1 + $0xc1] ss:$-126 sm:$0x3] %vm3_vm0, %v312_v43   ;;  %546 = vst.msk [vmem:[%s1251_s1 + $0x1e1] ss:$-126 sm:$0xc] %vm3_vm0, %v312_v43  }
  0xa8   :  { %547 = vst.msk [vmem:[%s1251_s1 + $0x301] ss:$-126 sm:$0x70] %vm3_vm0, %v312_v43   ;;  %548 = vst.msk [vmem:[%s1251_s1 + $0xa8] sm:$0x80] %vm3_vm0, %v312_v43   ;;  %v350_v44 = vpop.permute.xlu1 %349  }
  0xa9   :  { %v337_v45 = vpop.permute.xlu0 %336   ;;  %559 = vst.msk [vmem:[%s1251_s1 + $0xb0] ss:$-126 sm:$0x3] %vm3_vm0, %v350_v44   ;;  %560 = vst.msk [vmem:[%s1251_s1 + $0x1d0] ss:$-126 sm:$0xc] %vm3_vm0, %v350_v44  }
  0xaa   :  { %561 = vst.msk [vmem:[%s1251_s1 + $0x2f0] ss:$-126 sm:$0x30] %vm3_vm0, %v350_v44   ;;  %562 = vst.msk [vmem:[%s1251_s1 + $0x410] ss:$-126 sm:$0xc0] %vm3_vm0, %v350_v44  }
  0xab   :  { %554 = vst.msk [vmem:[%s1251_s1 + $0x20] ss:$162 sm:$0x3] %vm3_vm0, %v337_v45   ;;  %555 = vst.msk [vmem:[%s1251_s1 - $0x100] ss:$162 sm:$0xc] %vm3_vm0, %v337_v45  }
  0xac   :  { %556 = vst.msk [vmem:[%s1251_s1 - $0x220] ss:$162 sm:$0x30] %vm3_vm0, %v337_v45   ;;  %557 = vst.msk [vmem:[%s1251_s1 + $0x380] ss:$-126 sm:$0xc0] %vm3_vm0, %v337_v45   ;;  %v375_v46 = vpop.permute.xlu1 %374  }
  0xad   :  { %v362_v47 = vpop.permute.xlu0 %361   ;;  %568 = vst.msk [vmem:[%s1251_s1 + $0xb1] ss:$-126 sm:$0x3] %vm3_vm0, %v375_v46   ;;  %569 = vst.msk [vmem:[%s1251_s1 + $0x1d1] ss:$-126 sm:$0xc] %vm3_vm0, %v375_v46  }
  0xae   :  { %570 = vst.msk [vmem:[%s1251_s1 + $0x2f1] ss:$-126 sm:$0x30] %vm3_vm0, %v375_v46   ;;  %571 = vst.msk [vmem:[%s1251_s1 + $0x411] ss:$-126 sm:$0xc0] %vm3_vm0, %v375_v46  }
  0xaf   :  { %563 = vst.msk [vmem:[%s1251_s1 + $0x21] ss:$162 sm:$0x3] %vm3_vm0, %v362_v47   ;;  %564 = vst.msk [vmem:[%s1251_s1 - $0xff] ss:$162 sm:$0xc] %vm3_vm0, %v362_v47  }
  0xb0   :  { %565 = vst.msk [vmem:[%s1251_s1 - $0x21f] ss:$162 sm:$0x30] %vm3_vm0, %v362_v47   ;;  %566 = vst.msk [vmem:[%s1251_s1 + $0x381] ss:$-126 sm:$0xc0] %vm3_vm0, %v362_v47   ;;  %v400_v48 = vpop.permute.xlu1 %399  }
  0xb1   :  { %v388_v49 = vpop.permute.xlu0 %387   ;;  %577 = vst.msk [vmem:[%s1251_s1 + $0x10] ss:$162 sm:$0x3] %vm3_vm0, %v400_v48   ;;  %578 = vst.msk [vmem:[%s1251_s1 - $0x110] ss:$162 sm:$0xc] %vm3_vm0, %v400_v48  }
  0xb2   :  { %579 = vst.msk [vmem:[%s1251_s1 - $0x230] ss:$162 sm:$0x30] %vm3_vm0, %v400_v48   ;;  %580 = vst.msk [vmem:[%s1251_s1 - $0x350] ss:$162 sm:$0xc0] %vm3_vm0, %v400_v48  }
  0xb3   :  { %573 = vst.msk [vmem:[%s1251_s1 + $0xa0] ss:$-126 sm:$0x3] %vm3_vm0, %v388_v49   ;;  %574 = vst.msk [vmem:[%s1251_s1 + $0x1c0] ss:$-126 sm:$0xc] %vm3_vm0, %v388_v49  }
  0xb4   :  { %575 = vst.msk [vmem:[%s1251_s1 + $0x2e0] ss:$-126 sm:$0x30] %vm3_vm0, %v388_v49   ;;  %576 = vst.msk [vmem:[%s1251_s1 + $0x400] ss:$-126 sm:$0xc0] %vm3_vm0, %v388_v49   ;;  %v425_v50 = vpop.permute.xlu1 %424  }
  0xb5   :  { %v413_v51 = vpop.permute.xlu0 %412   ;;  %586 = vst.msk [vmem:[%s1251_s1 + $0x11] ss:$162 sm:$0x3] %vm3_vm0, %v425_v50   ;;  %587 = vst.msk [vmem:[%s1251_s1 - $0x10f] ss:$162 sm:$0xc] %vm3_vm0, %v425_v50  }
  0xb6   :  { %588 = vst.msk [vmem:[%s1251_s1 - $0x22f] ss:$162 sm:$0x30] %vm3_vm0, %v425_v50   ;;  %589 = vst.msk [vmem:[%s1251_s1 - $0x34f] ss:$162 sm:$0xc0] %vm3_vm0, %v425_v50  }
  0xb7   :  { %582 = vst.msk [vmem:[%s1251_s1 + $0xa1] ss:$-126 sm:$0x3] %vm3_vm0, %v413_v51   ;;  %583 = vst.msk [vmem:[%s1251_s1 + $0x1c1] ss:$-126 sm:$0xc] %vm3_vm0, %v413_v51  }
  0xb8   :  { %584 = vst.msk [vmem:[%s1251_s1 + $0x2e1] ss:$-126 sm:$0x30] %vm3_vm0, %v413_v51   ;;  %585 = vst.msk [vmem:[%s1251_s1 + $0x401] ss:$-126 sm:$0xc0] %vm3_vm0, %v413_v51  }

// kernel: conv_block_forward.2
= control target key start
LH: loop header
LB: loop body
LE: loop exit
PB: predicated region body
PF: predicated region fallthrough
CT: control target
= control target key end

     0   :  { %s4364_s15 = smov 0   ;;  %s4366_s16 = smov 0   ;;  %s5837_s0 = inlined_call_operand.vmem [shape: bf16[2,328,4], index: 0, kind: input, shape index: {}]   ;;  %s5838_s1 = inlined_call_operand.vmem [shape: bf16[3,3,4,128], index: 1, kind: input, shape index: {}]   ;;  %s5839_s2 = inlined_call_operand.vmem [shape: f32[288,1], index: 2, kind: input, shape index: {}]   ;;  %s5840_s3 = inlined_call_operand.vmem [shape: f32[2,1,128], index: 3, kind: output, shape index: {0}]   ;;  %s5841_s4 = inlined_call_operand.vmem [shape: f32[2,1,128], index: 4, kind: output, shape index: {1}]  }
   0x1   :  { %s4368_s17 = smov 0  }
   0x2 LB: > { %s27_s18 = sadd.s32 1, %s4331_s16  ;;  %p3523_p0 = scmp.ge.s32.totalorder %s4335_s17, 1  ;;  %s4335_s17 = sphi %s4368_s17, %s15_s17   ;;  %s4331_s16 = sphi %s4366_s16, %s5970_s16   ;;  %s4327_s15 = sphi %s4364_s15, %s5969_s15  }
   0x3   : > { %p29_p1 = scmp.ge.s32.totalorder %s27_s18, 2  ;;  %p177_p2 = scmp.lt.s32.totalorder %s4335_s17, 3 }
   0x5   : > { %s5972_s18 = smov (%p29_p1, %s27_s18), 0  ;;  %p178_p3 = pnand %p3523_p0, %p177_p2 }
   0x7   : > { %181 = sbr.rel (%p178_p3) target bundleno = 573 (0x23d), region = 32 }
   0xc   : > { %v3544_v0 = vld [vmem:[%s5838_s1 + $0x2] sm:$0x3]  ;;  %vm529_vm0 = vcmask 1041408   ;;  %p204_p4 = scmp.lt.s32.totalorder %s4327_s15, 1  ;;  %v3581_v2 = vld [vmem:[%s5838_s1 + $0x4] sm:$0x3] }
   0xd   : > { %4235 = vmatprep.subr.msk.bf16.mxu0 %vm529_vm0, %v3544_v0  ;;  %4236 = vmatprep.subr.msk.bf16.mxu1 %vm529_vm0, %v3544_v0  ;;  %v531_v1 = vsel %vm529_vm0, %v3544_v0, 0  ;;  %v321_v3 = vld [vmem:[%s5838_s1] sm:$0x3]  ;;  %vm325_vm1 = vsmask.f32 7424  ;;  %vm474_vm2 = vcmask 31744  }
   0xe   : > { %3892 = vmatpush3.bf16.msra.mxu0 %v531_v1  ;;  %4234 = vmatpush3.bf16.msra.mxu1 %v531_v1  ;;  %s5974_s15 = smov (!%p204_p4, %s4327_s15), 1  ;;  %v1040_v12 = vsel %vm529_vm0, %v3581_v2, 0  ;;  %v747_v16 = vsel %vm529_vm0, %v321_v3, 0  ;;  %v4463_v32 = vld [vmem:[%s5838_s1 + $0x8] sm:$0x3]  ;;  %vm947_vm3 = vcmask 1046528  }
   0xf   : > { %4238 = vmatprep.subr.msk.bf16.mxu0 %vm529_vm0, %v3581_v2  ;;  %4237 = vmatprep.subr.msk.bf16.mxu1 %vm529_vm0, %v321_v3  ;;  %s4245_s25 = smul.u32 164, %s5974_s15  ;;  %v4491_v43 = vld [vmem:[%s5838_s1 + $0x6] sm:$0x3]  ;;  %vm1489_vm4 = vsmask.f32 6400  ;;  %vm1847_vm5 = vcmask 1045504   ;;  %s5637_s30 = scalar_lea.vmem %s5840_s3, %s5974_s15 }
  0x10   : > { %vm2389_vm6 = vsmask.f32 5376  ;;  %vm2747_vm7 = vcmask 1044480   ;;  %s5643_s7 = scalar_lea.vmem %s5841_s4, %s5974_s15 }
  0x11   : > { %s4402_s28 = scalar_lea.vmem %s5837_s0, %s4245_s25 }
  0x12   : > { %v4405_v4 = vld [vmem:[%s4402_s28] sm:$0xff]   ;;  %v4408_v5 = vld [vmem:[%s4402_s28 + $0x8] sm:$0xff]   ;;  %v4415_v10 = vld [vmem:[%s4402_s28 + $0x50] sm:$0xff]  }
  0x13   : > { %v327_v6 = vshrl.u32 %v4405_v4, 16  ;;  %v329_v7 = vshll.u32 %v4405_v4, 16  ;;  %v5844_v8 = vshll.u32 %v4408_v5, 16  ;;  %v5843_v9 = vshrl.u32 %v4408_v5, 16  ;;  %5875 = vst [vmem:[#allocation2_spill] sm:$0xff] %v4415_v10  ;;  %v4418_v11 = vld [vmem:[%s4402_s28 + $0x58] sm:$0xff]  }
  0x14   : > { %5876 = vst [vmem:[#allocation3_spill] sm:$0xff] %v4418_v11  ;;  %v4424_v15 = vld [vmem:[%s4402_s28 + $0x10] sm:$0xff]   ;;  %v4428_v17 = vshll.u32 %v4415_v10, 16  ;;  %v4431_v18 = vshrl.u32 %v4415_v10, 16  ;;  %v4434_v19 = vshll.u32 %v4418_v11, 16  ;;  %v4437_v20 = vshrl.u32 %v4418_v11, 16 }
  0x15   : > { %v331_v13 = vrot.slane %v329_v7, 1  ;;  %v336_v14 = vrot.slane %v5844_v8, 1  ;;  %v4442_v23 = vshll.u32 %v4424_v15, 16  ;;  %v4445_v24 = vld [vmem:[%s4402_s28 + $0x60] sm:$0xff]   ;;  %v4450_v27 = vld [vmem:[%s4402_s28 + $0x18] sm:$0xff]   ;;  %v4453_v28 = vshrl.u32 %v4424_v15, 16 }
  0x16   : > { %5878 = vst [vmem:[#allocation5_spill] sm:$0xff] %v4445_v24  ;;  %v5842_v25 = vrot.slane %v4428_v17, 1  ;;  %v416_v26 = vrot.slane %v4434_v19, 1  ;;  %v4458_v31 = vshll.u32 %v4445_v24, 16  ;;  %v4471_v35 = vshll.u32 %v4450_v27, 16  ;;  %v4474_v36 = vld [vmem:[%s4402_s28 + $0x68] sm:$0xff]  }
  0x17   : > { %v332_v21 = vor.u32 %v331_v13, %v327_v6  ;;  %v340_v22 = vor.u32 %v5843_v9, %v336_v14  ;;  %5877 = vst [vmem:[#allocation4_spill] sm:$0xff] %v4442_v23  ;;  %5879 = vst [vmem:[#allocation6_spill] sm:$0xff] %v4453_v28  ;;  %v344_v30 = vrot.slane %v4442_v23, 1  ;;  %v4477_v37 = vshrl.u32 %v4445_v24, 16  ;;  %v4480_v38 = vld [vmem:[%s4402_s28 + $0x20] sm:$0xff]   ;;  %v4503_v48 = vld [vmem:[%s4402_s28 + $0x70] sm:$0xff]  }
  0x18   : > { %v412_v33 = vor.u32 %v4431_v18, %v5842_v25  ;;  %v420_v34 = vor.u32 %v4437_v20, %v416_v26  ;;  %5880 = vst [vmem:[#allocation7_spill] sm:$0xff] %v4474_v36  ;;  %v424_v40 = vrot.slane %v4458_v31, 1  ;;  %v4486_v42 = vshrl.u32 %v4450_v27, 16  ;;  %5881 = vst [vmem:[#allocation8_spill] sm:$0xff] %v4503_v48  ;;  %v4512_v52 = vld [vmem:[%s4402_s28 + $0x28] sm:$0xff]   ;;  %v4532_v60 = vld [vmem:[%s4402_s28 + $0x78] sm:$0xff]  }
  0x19   : > { %v337_v29 = vsel %vm325_vm1, %v332_v21, %v336_v14  ;;  %v345_v39 = vsel %vm325_vm1, %v340_v22, %v344_v30  ;;  %v348_v41 = vor.u32 %v4453_v28, %v344_v30  ;;  %v352_v45 = vrot.slane %v4471_v35, 1  ;;  %v4535_v61 = vld [vmem:[%s4402_s28 + $0x30] sm:$0xff]   ;;  %v4543_v1 = vld [vmem:[%s4402_s28 + $0x80] sm:$0xff]  }
  0x1a   : > { %3893 = vmatprep.mubr.msk.bf16.mxu0 %vm474_vm2, %v337_v29  ;;  %v417_v44 = vsel %vm325_vm1, %v412_v33, %v416_v26  ;;  %v4497_v46 = vshll.u32 %v4474_v36, 16  ;;  %v4500_v47 = vshll.u32 %v4480_v38, 16  ;;  %v425_v49 = vsel %vm325_vm1, %v420_v34, %v424_v40  ;;  %5883 = vst [vmem:[#allocation10_spill] sm:$0xff] %v4535_v61  ;;  %5885 = vst [vmem:[#allocation12_spill] sm:$0xff] %v4543_v1  ;;  %v4574_v33 = vld [vmem:[%s4402_s28 + $0x88] sm:$0xff]  }
  0x1b   : > { %3894 = vmatmul.mubr.msk.bf16.vlgmr.msra.gmra.mxu0 %vm474_vm2, %v345_v39  ;;  %3913 = vmatprep.mubr.msk.bf16.mxu1 %vm474_vm2, %v417_v44  ;;  %v428_v50 = vor.u32 %v4477_v37, %v424_v40  ;;  %v4509_v51 = vshrl.u32 %v4474_v36, 16  ;;  %v353_v53 = vsel %vm325_vm1, %v348_v41, %v352_v45  ;;  %v356_v55 = vor.u32 %v4486_v42, %v352_v45  ;;  %v4584_v44 = vld [vmem:[%s4402_s28 + $0x40] sm:$0xff]  }
  0x1c   : > { %3968 = vmatpush3.bf16.msra.mxu0 %v1040_v12  ;;  %3914 = vmatmul.mubr.msk.bf16.vlgmr.msra.gmra.mxu1 %vm474_vm2, %v425_v49  ;;  %v432_v54 = vrot.slane %v4497_v46, 1  ;;  %v360_v56 = vrot.slane %v4500_v47, 1  ;;  %v4523_v57 = vshll.u32 %v4503_v48, 16  ;;  %v4526_v58 = vshrl.u32 %v4480_v38, 16  ;;  %v4553_v12 = vld [vmem:[%s4402_s28 + $0x38] sm:$0xff]   ;;  %5890 = vst [vmem:[#allocation17_spill] sm:$0xff] %v4584_v44 }
  0x1d   : > { %4240 = vmatprep.subr.msk.bf16.mxu0 %vm529_vm0, %v4463_v32  ;;  %3930 = vmatpush3.bf16.msra.mxu1 %v747_v16  ;;  %v4529_v59 = vshll.u32 %v4512_v52, 16  ;;  %v4540_v0 = vshrl.u32 %v4503_v48, 16  ;;  %5886 = vst [vmem:[#allocation13_spill] sm:$0xff] %v4553_v12  ;;  %v4556_v13 = vshll.u32 %v4532_v60, 16  ;;  %v4559_v14 = vshrl.u32 %v4512_v52, 16 }
  0x1e   : > { %3897 = vmatprep.mubr.msk.bf16.mxu0 %vm474_vm2, %v353_v53  ;;  %5882 = vst [vmem:[#allocation9_spill] sm:$0xff] %v4523_v57  ;;  %v433_v62 = vsel %vm325_vm1, %v428_v50, %v432_v54  ;;  %v436_v63 = vor.u32 %v4509_v51, %v432_v54  ;;  %4239 = vmatprep.subr.msk.bf16.mxu1 %vm529_vm0, %v4491_v43  ;;  %v440_v3 = vrot.slane %v4523_v57, 1  ;;  %v4562_v16 = vshll.u32 %v4535_v61, 16 }
  0x1f   : > { %5884 = vst [vmem:[#allocation11_spill] sm:$0xff] %v4540_v0  ;;  %3917 = vmatprep.mubr.msk.bf16.mxu1 %vm474_vm2, %v433_v62  ;;  %v361_v2 = vsel %vm325_vm1, %v356_v55, %v360_v56  ;;  %v364_v6 = vor.u32 %v4526_v58, %v360_v56  ;;  %v368_v7 = vrot.slane %v4529_v59, 1  ;;  %5887 = vst [vmem:[#allocation14_spill] sm:$0xff] %v4556_v13  ;;  %v4565_v21 = vshrl.u32 %v4532_v60, 16  ;;  %v257_v56 = vld [vmem:[%s4402_s28 + $0x90] sm:$0xf] }
  0x20   : > { %v441_v22 = vsel %vm325_vm1, %v436_v63, %v440_v3  ;;  %v444_v29 = vor.u32 %v4540_v0, %v440_v3  ;;  %v4571_v30 = vshll.u32 %v4543_v1, 16  ;;  %v448_v34 = vrot.slane %v4556_v13, 1 }
  0x21   : > { %5888 = vst [vmem:[#allocation15_spill] sm:$0xff] %v4565_v21  ;;  %v369_v26 = vsel %vm325_vm1, %v364_v6, %v368_v7  ;;  %v372_v39 = vor.u32 %v4559_v14, %v368_v7  ;;  %v376_v40 = vrot.slane %v4562_v16, 1  ;;  %v4581_v41 = vshrl.u32 %v4535_v61, 16 }
  0x22   : > { %5889 = vst [vmem:[#allocation16_spill] sm:$0xff] %v4571_v30  ;;  %v456_v45 = vrot.slane %v4571_v30, 1  ;;  %v4589_v49 = vshll.u32 %v4553_v12, 16  ;;  %v4592_v50 = vshrl.u32 %v4543_v1, 16  ;;  %v4595_v53 = vshll.u32 %v4574_v33, 16 }
  0x23   : > { %3898 = vmatmul.mubr.msk.bf16.gmra.mxu0 %vm474_vm2, %v361_v2  ;;  %v449_v54 = vsel %vm325_vm1, %v444_v29, %v448_v34  ;;  %v380_v55 = vor.u32 %v4581_v41, %v376_v40  ;;  %v452_v62 = vor.u32 %v4565_v21, %v448_v34  ;;  %v4605_v2 = vld [vmem:[%s4402_s28 + $0x48] sm:$0xff]   ;;  %v4610_v7 = vshll.u32 %v4584_v44, 16 }
  0x24   : > { %3901 = vmatprep.mubr.msk.bf16.mxu0 %vm474_vm2, %v369_v26  ;;  %5891 = vst [vmem:[#allocation18_spill] sm:$0xff] %v4592_v50  ;;  %5892 = vst [vmem:[#allocation19_spill] sm:$0xff] %v4595_v53  ;;  %3918 = vmatmul.mubr.msk.bf16.gmra.mxu1 %vm474_vm2, %v441_v22  ;;  %v384_v63 = vrot.slane %v4589_v49, 1  ;;  %v460_v3 = vor.u32 %v4592_v50, %v456_v45  ;;  %v464_v6 = vrot.slane %v4595_v53, 1  ;;  %v4614_v29 = vshrl.u32 %v4553_v12, 16 }
  0x25   : > { %3921 = vmatprep.mubr.msk.bf16.mxu1 %vm474_vm2, %v449_v54  ;;  %5893 = vst [vmem:[#allocation20_spill] sm:$0xff] %v4605_v2  ;;  %v3543_v22 = vcombine.low %v257_v56, %v257_v56  ;;  %v377_v26 = vsel %vm325_vm1, %v372_v39, %v376_v40  ;;  %v4618_v34 = vshrl.u32 %v4584_v44, 16  ;;  %v457_v25 = vsel %vm325_vm1, %v452_v62, %v456_v45 }
  0x26   : > { %v385_v54 = vsel %vm325_vm1, %v380_v55, %v384_v63  ;;  %v4622_v9 = vshrl.u32 %v4574_v33, 16  ;;  %v4625_v53 = vshll.u32 %v4605_v2, 16  ;;  %v465_v39 = vsel %vm325_vm1, %v460_v3, %v464_v6 }
  0x27   : > { %v470_v8 = vshll.u32 %v3543_v22, 16  ;;  %v392_v40 = vrot.slane %v4610_v7, 1  ;;  %v388_v55 = vor.u32 %v4614_v29, %v384_v63  ;;  %v4639_v3 = vshrl.u32 %v4605_v2, 16 }
  0x28   : > { %5894 = vst [vmem:[#allocation21_spill] sm:$0xff] %v4622_v9  ;;  %v400_v62 = vrot.slane %v4625_v53, 1  ;;  %v468_v30 = vor.u32 %v4622_v9, %v464_v6  ;;  %v5895_v63 = vshll.u32 %v4408_v5, 16  ;;  %v983_v6 = vrot.slane %v3543_v22, 1  ;;  %v4685_v9 = vld [vmem:[%s5838_s1 + $0xa] sm:$0x3] }
  0x29   : > { %v396_v45 = vor.u32 %v4618_v34, %v392_v40  ;;  %v472_v50 = vrot.slane %v470_v8, 1  ;;  %v951_v22 = vrot.slane %v4424_v15, 1 }
  0x2a   : > { %v4644_v13 = vrot.slane %v5895_v63, 2  ;;  %v404_v8 = vor.u32 %v4639_v3, %v400_v62 }
  0x2b   : > { %3902 = vmatmul.mubr.msk.bf16.gmra.mxu0 %vm474_vm2, %v377_v26  ;;  %v393_v26 = vsel %vm325_vm1, %v388_v55, %v392_v40  ;;  %v5896_v40 = vshrl.u32 %v4408_v5, 16 }
  0x2c   : > { %3905 = vmatprep.mubr.msk.bf16.mxu0 %vm474_vm2, %v385_v54  ;;  %3922 = vmatmul.mubr.msk.bf16.gmra.mxu1 %vm474_vm2, %v457_v25  ;;  %v401_v54 = vsel %vm325_vm1, %v396_v45, %v400_v62  ;;  %v473_v25 = vsel %vm325_vm1, %v468_v30, %v472_v50  ;;  %v948_v30 = vrot.slane %v4405_v4, 1  ;;  %v949_v50 = vrot.slane %v4408_v5, 1 }
  0x2d   : > { %3925 = vmatprep.mubr.msk.bf16.mxu1 %vm474_vm2, %v465_v39  ;;  %v4649_v39 = vrot.slane %v4574_v33, 1  ;;  %v4655_v55 = vrot.slane %v5896_v40, 1  ;;  %v1501_v62 = vrot.slane %v4526_v58, 1 }
  0x2e   : > { %v950_v40 = vsel %vm947_vm3, %v948_v30, %v949_v50 }
  0x2f   : > { %v4662_v45 = vsel %vm947_vm3, %v4649_v39, %v983_v6  ;;  %v258_v6 = vld [vmem:[%s4402_s28 + $0x94] sm:$0xf] }
  0x30   : > { %v4690_v30 = vcombine.low %v257_v56, %v258_v6  ;;  %v4707_v56 = vld [vmem:[%s5838_s1 + $0xc] sm:$0x3]  ;;  %v959_v6 = vrot.slane %v4535_v61, 1 }
  0x32   : > { %5898 = vst [vmem:[#allocation22_spill] sm:$0xff] %v4690_v30 }
  0x33   : > { %3906 = vmatmul.mubr.msk.bf16.gmra.mxu0 %vm474_vm2, %v393_v26  ;;  %v1502_v26 = vrot.slane %v4500_v47, 2 }
  0x34   : > { %3909 = vmatprep.mubr.msk.bf16.mxu0 %vm474_vm2, %v401_v54  ;;  %3926 = vmatmul.mubr.msk.bf16.gmra.mxu1 %vm474_vm2, %v473_v25  ;;  %v5897_v54 = vrot.slane %v4428_v17, 1 }
  0x35   : > { %3931 = vmatprep.mubr.msk.bf16.mxu1 %vm474_vm2, %v4405_v4  ;;  %v4673_v25 = vor.u32 %v1502_v26, %v1501_v62  ;;  %v1272_v4 = vsel %vm529_vm0, %v4491_v43, 0  ;;  %v4697_v43 = vsel %vm947_vm3, %v949_v50, %v951_v22  ;;  %v1630_v62 = vsel %vm529_vm0, %v4463_v32, 0 }
  0x36   : > { %v409_v63 = vsel %vm325_vm1, %v404_v8, %v5897_v54  ;;  %v953_v8 = vrot.slane %v4450_v27, 1  ;;  %v5855_v54 = vrot.slane %v4690_v30, 1  ;;  %v955_v50 = vrot.slane %v4480_v38, 1 }
  0x38   : > { %v4702_v26 = vsel %vm947_vm3, %v951_v22, %v953_v8  ;;  %v4719_v32 = vsel %vm947_vm3, %v4649_v39, %v5855_v54  ;;  %v957_v22 = vrot.slane %v4512_v52, 1  ;;  %v965_v54 = vrot.slane %v4605_v2, 1 }
  0x3b   : > { %3910 = vmatmul.mubr.msk.bf16.gmra.mxu0 %vm474_vm2, %v409_v63  ;;  %v4729_v63 = vsel %vm947_vm3, %v953_v8, %v955_v50  ;;  %v4745_v8 = vsel %vm947_vm3, %v957_v22, %v959_v6 }
  0x3c   : > { %3969 = vmatprep.mubr.msk.bf16.mxu0 %vm474_vm2, %v950_v40  ;;  %3932 = vmatmul.mubr.msk.bf16.vlgmr.msra.gmra.mxu1 %vm474_vm2, %v4408_v5  ;;  %v4732_v40 = vsel %vm947_vm3, %v955_v50, %v957_v22  ;;  %v963_v50 = vrot.slane %v4584_v44, 1 }
  0x3d   : > { %4006 = vmatpush3.bf16.msra.mxu1 %v1272_v4  ;;  %3935 = vmatprep.mubr.msk.bf16.mxu1 %vm474_vm2, %v4424_v15  ;;  %v961_v4 = vrot.slane %v4553_v12, 1 }
  0x3e   : > { %4241 = vmatprep.subr.msk.bf16.mxu1 %vm529_vm0, %v4685_v9 }
  0x3f   : > { %v4761_v22 = vsel %vm947_vm3, %v961_v4, %v963_v50 }
  0x43   : > { %3970 = vmatmul.mubr.msk.bf16.vlgmr.msra.gmra.mxu0 %vm474_vm2, %v4697_v43 }
  0x44   : > { %4044 = vmatpush3.bf16.msra.mxu0 %v1630_v62  ;;  %3973 = vmatprep.mubr.msk.bf16.mxu0 %vm474_vm2, %v4702_v26  ;;  %v4748_v62 = vsel %vm947_vm3, %v959_v6, %v961_v4  ;;  %v4764_v6 = vsel %vm947_vm3, %v963_v50, %v965_v54 }
  0x45   : > { %3936 = vmatmul.mubr.msk.bf16.gmra.mxu1 %vm474_vm2, %v4450_v27  ;;  %4242 = vmatprep.subr.msk.bf16.mxu0 %vm529_vm0, %v4707_v56 }
  0x46   : > { %3939 = vmatprep.mubr.msk.bf16.mxu1 %vm474_vm2, %v4480_v38 }
  0x4b   : > { %3974 = vmatmul.mubr.msk.bf16.gmra.mxu0 %vm474_vm2, %v4729_v63 }
  0x4c   : > { %3977 = vmatprep.mubr.msk.bf16.mxu0 %vm474_vm2, %v4732_v40 }
  0x4d   : > { %3940 = vmatmul.mubr.msk.bf16.gmra.mxu1 %vm474_vm2, %v4512_v52 }
  0x4e   : > { %3943 = vmatprep.mubr.msk.bf16.mxu1 %vm474_vm2, %v4535_v61  ;;  %v967_v61 = vrot.slane %v4415_v10, 1 }
  0x50   : > { %v4777_v4 = vsel %vm947_vm3, %v965_v54, %v967_v61 }
  0x53   : > { %3978 = vmatmul.mubr.msk.bf16.gmra.mxu0 %vm474_vm2, %v4745_v8 }
  0x54   : > { %3981 = vmatprep.mubr.msk.bf16.mxu0 %vm474_vm2, %v4748_v62 }
  0x55   : > { %3944 = vmatmul.mubr.msk.bf16.gmra.mxu1 %vm474_vm2, %v4553_v12  ;;  %v969_v12 = vrot.slane %v4418_v11, 1 }
  0x56   : > { %3947 = vmatprep.mubr.msk.bf16.mxu1 %vm474_vm2, %v4584_v44  ;;  %v971_v44 = vrot.slane %v4445_v24, 1 }
  0x57   : > { %v4780_v50 = vsel %vm947_vm3, %v967_v61, %v969_v12 }
  0x58   : > { %v4793_v54 = vsel %vm947_vm3, %v969_v12, %v971_v44 }
  0x5b   : > { %3982 = vmatmul.mubr.msk.bf16.gmra.mxu0 %vm474_vm2, %v4761_v22 }
  0x5c   : > { %3985 = vmatprep.mubr.msk.bf16.mxu0 %vm474_vm2, %v4764_v6 }
  0x5d   : > { %3948 = vmatmul.mubr.msk.bf16.gmra.mxu1 %vm474_vm2, %v4605_v2  ;;  %v973_v2 = vrot.slane %v4474_v36, 1 }
  0x5e   : > { %3951 = vmatprep.mubr.msk.bf16.mxu1 %vm474_vm2, %v4415_v10  ;;  %v975_v10 = vrot.slane %v4503_v48, 1 }
  0x5f   : > { %v4796_v61 = vsel %vm947_vm3, %v971_v44, %v973_v2 }
  0x60   : > { %v4809_v12 = vsel %vm947_vm3, %v973_v2, %v975_v10 }
  0x63   : > { %3986 = vmatmul.mubr.msk.bf16.gmra.mxu0 %vm474_vm2, %v4777_v4 }
  0x64   : > { %3989 = vmatprep.mubr.msk.bf16.mxu0 %vm474_vm2, %v4780_v50 }
  0x65   : > { %3952 = vmatmul.mubr.msk.bf16.gmra.mxu1 %vm474_vm2, %v4418_v11  ;;  %v977_v11 = vrot.slane %v4532_v60, 1 }
  0x66   : > { %3955 = vmatprep.mubr.msk.bf16.mxu1 %vm474_vm2, %v4445_v24  ;;  %v979_v24 = vrot.slane %v4543_v1, 1 }
  0x67   : > { %v4812_v44 = vsel %vm947_vm3, %v975_v10, %v977_v11 }
  0x68   : > { %v4824_v2 = vsel %vm947_vm3, %v977_v11, %v979_v24  ;;  %v4828_v10 = vsel %vm947_vm3, %v979_v24, %v4649_v39  ;;  %v1497_v11 = vrot.slane %v4486_v42, 1  ;;  %v1498_v24 = vrot.slane %v4471_v35, 2 }
  0x69   : > { %v5899_v39 = vor.u32 %v4644_v13, %v4655_v55  ;;  %v1506_v13 = vrot.slane %v4529_v59, 2  ;;  %v2172_v55 = vsel %vm529_vm0, %v4707_v56, 0 }
  0x6b   : > { %3990 = vmatmul.mubr.msk.bf16.gmra.mxu0 %vm474_vm2, %v4793_v54 }
  0x6c   : > { %3993 = vmatprep.mubr.msk.bf16.mxu0 %vm474_vm2, %v4796_v61 }
  0x6d   : > { %3956 = vmatmul.mubr.msk.bf16.gmra.mxu1 %vm474_vm2, %v4474_v36  ;;  %v1494_v36 = vrot.slane %v4442_v23, 2 }
  0x6e   : > { %3959 = vmatprep.mubr.msk.bf16.mxu1 %vm474_vm2, %v4503_v48  ;;  %v1493_v48 = vrot.slane %v4453_v28, 1  ;;  %v1940_v28 = vsel %vm529_vm0, %v4685_v9, 0 }
  0x73   : > { %3994 = vmatmul.mubr.msk.bf16.gmra.mxu0 %vm474_vm2, %v4809_v12 }
  0x74   : > { %3997 = vmatprep.mubr.msk.bf16.mxu0 %vm474_vm2, %v4812_v44 }
  0x75   : > { %3960 = vmatmul.mubr.msk.bf16.gmra.mxu1 %vm474_vm2, %v4532_v60 }
  0x76   : > { %3963 = vmatprep.mubr.msk.bf16.mxu1 %vm474_vm2, %v4543_v1  ;;  %v1495_v1 = vor.u32 %v1494_v36, %v1493_v48  ;;  %v1499_v36 = vor.u32 %v1498_v24, %v1497_v11  ;;  %v4854_v48 = vld [vmem:[%s5838_s1 + $0xe] sm:$0x3]  ;;  %v2397_v11 = vrot.slane %v4526_v58, 2 }
  0x78   : > { %v1496_v23 = vsel %vm1489_vm4, %v5899_v39, %v1495_v1  ;;  %v1500_v9 = vsel %vm1489_vm4, %v1495_v1, %v1499_v36  ;;  %v1513_v39 = vrot.slane %v4614_v29, 1 }
  0x7b   : > { %3998 = vmatmul.mubr.msk.bf16.gmra.mxu0 %vm474_vm2, %v4824_v2 }
  0x7c   : > { %4001 = vmatprep.mubr.msk.bf16.mxu0 %vm474_vm2, %v4828_v10 }
  0x7d   : > { %3964 = vmatmul.mubr.msk.bf16.gmra.mxu1 %vm474_vm2, %v4574_v33 }
  0x7e   : > { %4007 = vmatprep.mubr.msk.bf16.mxu1 %vm474_vm2, %v4697_v43  ;;  %v1510_v43 = vrot.slane %v4562_v16, 2 }
  0x83   : > { %4002 = vmatmul.mubr.msk.bf16.gmra.mxu0 %vm474_vm2, %v4662_v45  ;;  %v1504_v45 = vsel %vm1489_vm4, %v1499_v36, %v4673_v25  ;;  %v1514_v36 = vrot.slane %v4589_v49, 2 }
  0x84   : > { %4045 = vmatprep.mubr.msk.bf16.mxu0 %vm474_vm2, %v1496_v23  ;;  %v1505_v23 = vrot.slane %v4559_v14, 1 }
  0x85   : > { %4008 = vmatmul.mubr.msk.bf16.vlgmr.msra.gmra.mxu1 %vm474_vm2, %v4702_v26  ;;  %v4874_v26 = vld [vmem:[%s5838_s1 + $0x10] sm:$0x3] }
  0x86   : > { %4082 = vmatpush3.bf16.msra.mxu1 %v1940_v28  ;;  %4011 = vmatprep.mubr.msk.bf16.mxu1 %vm474_vm2, %v4729_v63  ;;  %v1509_v28 = vrot.slane %v4581_v41, 1  ;;  %v1507_v1 = vor.u32 %v1506_v13, %v1505_v23  ;;  %v2398_v63 = vrot.slane %v4500_v47, 3  ;;  %v1518_v23 = vrot.slane %v4610_v7, 2 }
  0x87   : > { %4243 = vmatprep.subr.msk.bf16.mxu1 %vm529_vm0, %v4854_v48  ;;  %v1515_v47 = vor.u32 %v1514_v36, %v1513_v39  ;;  %v1534_v39 = vrot.slane %v4458_v31, 2  ;;  %v4337_v36 = vmov 0  }
  0x88   : > { %v1511_v56 = vor.u32 %v1510_v43, %v1509_v28  ;;  %v1508_v24 = vsel %vm1489_vm4, %v4673_v25, %v1507_v1  ;;  %v4893_v13 = vor.u32 %v2398_v63, %v2397_v11  ;;  %v1525_v28 = vrot.slane %v4431_v18, 1  ;;  %4272 = vset.pattern.permute.xlu0 %v4337_v36  ;;  %4273 = vset.pattern.permute.xlu1 %v4337_v36  ;;  %v5902_v36 = vld [vmem:[#allocation16_spill] sm:$0xff] }
  0x89   : > { %v1526_v43 = vrot.slane %v4428_v17, 2  ;;  %v1530_v63 = vrot.slane %v4434_v19, 2 }
  0x8a   : > { %v1516_v25 = vsel %vm1489_vm4, %v1511_v56, %v1515_v47 }
  0x8b   : > { %4046 = vmatmul.mubr.msk.bf16.vlgmr.msra.gmra.mxu0 %vm474_vm2, %v1500_v9  ;;  %v1517_v9 = vrot.slane %v4618_v34, 1 }
  0x8c   : > { %4120 = vmatpush3.bf16.msra.mxu0 %v2172_v55  ;;  %4049 = vmatprep.mubr.msk.bf16.mxu0 %vm474_vm2, %v1504_v45  ;;  %v1522_v55 = vrot.slane %v4625_v53, 2 }
  0x8d   : > { %4012 = vmatmul.mubr.msk.bf16.gmra.mxu1 %vm474_vm2, %v4732_v40  ;;  %4244 = vmatprep.subr.msk.bf16.mxu0 %vm529_vm0, %v4874_v26  ;;  %v1512_v40 = vsel %vm1489_vm4, %v1507_v1, %v1511_v56  ;;  %v1519_v58 = vor.u32 %v1518_v23, %v1517_v9  ;;  %v1529_v56 = vrot.slane %v4437_v20, 1  ;;  %v3057_v9 = vld [vmem:[%s5839_s2 + $0x10] sm:$0xff]  ;;  %v3056_v23 = vld [vmem:[%s5839_s2 + $0x8] sm:$0xff] }
  0x8e   : > { %4015 = vmatprep.mubr.msk.bf16.mxu1 %vm474_vm2, %v4745_v8  ;;  %v1521_v8 = vrot.slane %v4639_v3, 1  ;;  %3103 = vperm.xlu1 %4273, %v3057_v9  }
  0x8f   : > { %v1520_v45 = vsel %vm1489_vm4, %v1515_v47, %v1519_v58 }
  0x93   : > { %4050 = vmatmul.mubr.msk.bf16.gmra.mxu0 %vm474_vm2, %v1508_v24  ;;  %v1533_v24 = vrot.slane %v4477_v37, 1 }
  0x94   : > { %4053 = vmatprep.mubr.msk.bf16.mxu0 %vm474_vm2, %v1512_v40 }
  0x95   : > { %4016 = vmatmul.mubr.msk.bf16.gmra.mxu1 %vm474_vm2, %v4748_v62  ;;  %v1523_v62 = vor.u32 %v1522_v55, %v1521_v8  ;;  %v1535_v40 = vor.u32 %v1534_v39, %v1533_v24  ;;  %v1541_v8 = vrot.slane %v4540_v0, 1  ;;  %v1542_v55 = vrot.slane %v4523_v57, 2  ;;  %v5901_v24 = vld [vmem:[#allocation18_spill] sm:$0xff]  ;;  %v5930_v0 = vld [vmem:[#allocation4_spill] sm:$0xff] }
  0x96   : > { %4019 = vmatprep.mubr.msk.bf16.mxu1 %vm474_vm2, %v4761_v22  ;;  %v1527_v22 = vor.u32 %v1526_v43, %v1525_v28  ;;  %v1549_v39 = vrot.slane %v5901_v24, 1 }
  0x97   : > { %v1524_v1 = vsel %vm1489_vm4, %v1519_v58, %v1523_v62  ;;  %v1537_v58 = vrot.slane %v4509_v51, 1  ;;  %v1543_v43 = vor.u32 %v1542_v55, %v1541_v8  ;;  %v5903_v8 = vld [vmem:[#allocation21_spill] sm:$0xff] }
  0x98   : > { %v1528_v11 = vsel %vm1489_vm4, %v1523_v62, %v1527_v22  ;;  %v3060_v62 = vld [vmem:[%s5839_s2 + $0x28] sm:$0xff]  ;;  %v1553_v55 = vrot.slane %v5903_v8, 1 }
  0x9b   : > { %4054 = vmatmul.mubr.msk.bf16.gmra.mxu0 %vm474_vm2, %v1516_v25 }
  0x9c   : > { %4057 = vmatprep.mubr.msk.bf16.mxu0 %vm474_vm2, %v1520_v45  ;;  %v3058_v45 = vld [vmem:[%s5839_s2 + $0x18] sm:$0xff] }
  0x9d   : > { %4020 = vmatmul.mubr.msk.bf16.gmra.mxu1 %vm474_vm2, %v4764_v6  ;;  %v3055_v6 = vld [vmem:[%s5839_s2] sm:$0xff]  ;;  %3108 = vperm.xlu1 %4273, %v3058_v45   ;;  %v5904_v45 = vld [vmem:[#allocation19_spill] sm:$0xff] }
  0x9e   : > { %4023 = vmatprep.mubr.msk.bf16.mxu1 %vm474_vm2, %v4777_v4  ;;  %3093 = vperm.xlu0 %4272, %v3055_v6   ;;  %v1531_v4 = vor.u32 %v1530_v63, %v1529_v56  ;;  %v1545_v56 = vrot.slane %v4565_v21, 1  ;;  %v5900_v63 = vld [vmem:[#allocation14_spill] sm:$0xff]  ;;  %v1550_v6 = vrot.slane %v5902_v36, 2  ;;  %v5926_v36 = vld [vmem:[#allocation12_spill] sm:$0xff] }
  0xa0   : > { %v1532_v47 = vsel %vm1489_vm4, %v1527_v22, %v1531_v4  ;;  %v1536_v25 = vsel %vm1489_vm4, %v1531_v4, %v1535_v40  ;;  %v3061_v22 = vld [vmem:[%s5839_s2 + $0x30] sm:$0xff]  ;;  %v3062_v4 = vld [vmem:[%s5839_s2 + $0x38] sm:$0xff]  ;;  %v1551_v9 = vor.u32 %v1550_v6, %v1549_v39  ;;  %v3068_v6 = vld [vmem:[%s5839_s2 + $0x68] sm:$0xff] }
  0xa1   : > { %3118 = vperm.xlu1 %4273, %v3060_v62  }
  0xa2   : > { %3098 = vperm.xlu0 %4272, %v3056_v23   ;;  %v5869_v23 = vshrl.u32 %v4690_v30, 16 }
  0xa3   : > { %4058 = vmatmul.mubr.msk.bf16.gmra.mxu0 %vm474_vm2, %v1524_v1 }
  0xa4   : > { %4061 = vmatprep.mubr.msk.bf16.mxu0 %vm474_vm2, %v1528_v11  ;;  %v1560_v62 = vrot.slane %v5869_v23, 1 }
  0xa5   : > { %4024 = vmatmul.mubr.msk.bf16.gmra.mxu1 %vm474_vm2, %v4780_v50  ;;  %v1538_v50 = vrot.slane %v4497_v46, 2  ;;  %3128 = vperm.xlu1 %4273, %v3062_v4   ;;  %v3069_v4 = vld [vmem:[%s5839_s2 + $0x70] sm:$0xff] }
  0xa6   : > { %4027 = vmatprep.mubr.msk.bf16.mxu1 %vm474_vm2, %v4793_v54  ;;  %v3059_v54 = vld [vmem:[%s5839_s2 + $0x20] sm:$0xff] }
  0xa7   : > { %3113 = vperm.xlu0 %4272, %v3059_v54   ;;  %v1539_v28 = vor.u32 %v1538_v50, %v1537_v58  ;;  %v3064_v58 = vld [vmem:[%s5839_s2 + $0x48] sm:$0xff]  ;;  %v3065_v50 = vld [vmem:[%s5839_s2 + $0x50] sm:$0xff]  ;;  %v1554_v54 = vrot.slane %v5904_v45, 2 }
  0xa9   : > { %v1540_v1 = vsel %vm1489_vm4, %v1535_v40, %v1539_v28  ;;  %v1544_v11 = vsel %vm1489_vm4, %v1539_v28, %v1543_v43  ;;  %3138 = vperm.xlu1 %4273, %v3064_v58   ;;  %v1849_v58 = vrot.slane %v4424_v15, 2 }
  0xab   : > { %4062 = vmatmul.mubr.msk.bf16.gmra.mxu0 %vm474_vm2, %v1532_v47  ;;  %3123 = vperm.xlu0 %4272, %v3061_v22   ;;  %v5868_v47 = vshll.u32 %v4690_v30, 16 }
  0xac   : > { %4065 = vmatprep.mubr.msk.bf16.mxu0 %vm474_vm2, %v1536_v25  ;;  %v4985_v25 = vld [vmem:[%s4402_s28 + $0x98] sm:$0xf] }
  0xad   : > { %4028 = vmatmul.mubr.msk.bf16.gmra.mxu1 %vm474_vm2, %v4796_v61  ;;  %v1546_v61 = vrot.slane %v5900_v63, 2  ;;  %v1563_v22 = vrot.slane %v5868_v47, 2 }
  0xae   : > { %4031 = vmatprep.mubr.msk.bf16.mxu1 %vm474_vm2, %v4809_v12  ;;  %v3063_v12 = vld [vmem:[%s5839_s2 + $0x40] sm:$0xff] }
  0xaf   : > { %3133 = vperm.xlu0 %4272, %v3063_v12   ;;  %v1547_v40 = vor.u32 %v1546_v61, %v1545_v56  ;;  %v1555_v56 = vor.u32 %v1554_v54, %v1553_v55  ;;  %v1564_v39 = vor.u32 %v1563_v22, %v1560_v62  ;;  %v3070_v54 = vld [vmem:[%s5839_s2 + $0x78] sm:$0xff]  ;;  %v3072_v62 = vld [vmem:[%s5839_s2 + $0x88] sm:$0xff]  ;;  %v3073_v22 = vld [vmem:[%s5839_s2 + $0x90] sm:$0xff] }
  0xb1   : > { %v1552_v28 = vsel %vm1489_vm4, %v1547_v40, %v1551_v9  ;;  %v1565_v55 = vsel %vm1489_vm4, %v1555_v56, %v1564_v39 }
  0xb3   : > { %4066 = vmatmul.mubr.msk.bf16.gmra.mxu0 %vm474_vm2, %v1540_v1  ;;  %3143 = vperm.xlu0 %4272, %v3065_v50   ;;  %v5003_v1 = vcombine.low %v4985_v25, %v4985_v25 }
  0xb4   : > { %4069 = vmatprep.mubr.msk.bf16.mxu0 %vm474_vm2, %v1544_v11 }
  0xb5   : > { %4032 = vmatmul.mubr.msk.bf16.gmra.mxu1 %vm474_vm2, %v4812_v44  ;;  %v1548_v44 = vsel %vm1489_vm4, %v1543_v43, %v1547_v40  ;;  %v3067_v43 = vld [vmem:[%s5839_s2 + $0x60] sm:$0xff]  ;;  %v1567_v61 = vshrl.u32 %v5003_v1, 16  ;;  %v1570_v11 = vshll.u32 %v5003_v1, 16  ;;  %v1263_v12 = vrot.slane %v5003_v1, 1 }
  0xb6   : > { %4035 = vmatprep.mubr.msk.bf16.mxu1 %vm474_vm2, %v4824_v2  ;;  %v3066_v2 = vld [vmem:[%s5839_s2 + $0x58] sm:$0xff]  ;;  %v1848_v40 = vrot.slane %v4408_v5, 2  ;;  %v5905_v5 = vrot.slane %v4690_v30, 1 }
  0xb7   : > { %3148 = vperm.xlu1 %4273, %v3066_v2   ;;  %3153 = vperm.xlu0 %4272, %v3067_v43   ;;  %v1569_v50 = vrot.slane %v1567_v61, 1  ;;  %v1851_v2 = vrot.slane %v4450_v27, 2  ;;  %v1853_v43 = vrot.slane %v4480_v38, 2  ;;  %v3074_v61 = vld [vmem:[%s5839_s2 + $0x98] sm:$0xff]  ;;  %v2530_v27 = vsel %vm529_vm0, %v4854_v48, 0 }
  0xb8   : > { %v1264_v15 = vsel %vm947_vm3, %v5905_v5, %v1263_v12  ;;  %v1855_v48 = vrot.slane %v4512_v52, 2  ;;  %v5906_v12 = vld [vmem:[#allocation10_spill] sm:$0xff]  ;;  %v5908_v5 = vld [vmem:[#allocation17_spill] sm:$0xff] }
  0xb9   : > { %v1854_v38 = vsel %vm1847_vm5, %v1851_v2, %v1853_v43 }
  0xbb   : > { %4070 = vmatmul.mubr.msk.bf16.gmra.mxu0 %vm474_vm2, %v1548_v44  ;;  %3158 = vperm.xlu1 %4273, %v3068_v6   ;;  %v1572_v44 = vrot.slane %v1570_v11, 2  ;;  %v3075_v11 = vld [vmem:[%s5839_s2 + $0xa0] sm:$0xff]  ;;  %v1852_v6 = vsel %vm1847_vm5, %v1849_v58, %v1851_v2 }
  0xbc   : > { %4073 = vmatprep.mubr.msk.bf16.mxu0 %vm474_vm2, %v1552_v28  ;;  %3163 = vperm.xlu0 %4272, %v3069_v4   ;;  %v3077_v4 = vld [vmem:[%s5839_s2 + $0xb0] sm:$0xff] }
  0xbd   : > { %4036 = vmatmul.mubr.msk.bf16.gmra.mxu1 %vm474_vm2, %v4828_v10  ;;  %v1556_v10 = vsel %vm1489_vm4, %v1551_v9, %v1555_v56  ;;  %v1850_v9 = vsel %vm1847_vm5, %v1848_v40, %v1849_v58  ;;  %v1573_v28 = vor.u32 %v1572_v44, %v1569_v50  ;;  %v1857_v40 = vrot.slane %v5906_v12, 2  ;;  %v3079_v44 = vld [vmem:[%s5839_s2 + $0xc0] sm:$0xff] }
  0xbe   : > { %4039 = vmatprep.mubr.msk.bf16.mxu1 %vm474_vm2, %v4719_v32  ;;  %v3071_v32 = vld [vmem:[%s5839_s2 + $0x80] sm:$0xff]  ;;  %v2840_v58 = vsel %vm529_vm0, %v4874_v26, 0  ;;  %v1856_v50 = vsel %vm1847_vm5, %v1853_v43, %v1855_v48  ;;  %v3080_v26 = vld [vmem:[%s5839_s2 + $0xc8] sm:$0xff] }
  0xbf   : > { %3168 = vperm.xlu1 %4273, %v3070_v54   ;;  %v1574_v56 = vsel %vm1489_vm4, %v1564_v39, %v1573_v28  ;;  %v3076_v39 = vld [vmem:[%s5839_s2 + $0xa8] sm:$0xff]  ;;  %v1858_v52 = vsel %vm1847_vm5, %v1855_v48, %v1857_v40 }
  0xc0   : > { %3173 = vperm.xlu0 %4272, %v3071_v32   ;;  %v3081_v32 = vld [vmem:[%s5839_s2 + $0xd0] sm:$0xff] }
  0xc3   : > { %4074 = vmatmul.mubr.msk.bf16.gmra.mxu0 %vm474_vm2, %v1556_v10  ;;  %3178 = vperm.xlu1 %4273, %v3072_v62   ;;  %v3078_v10 = vld [vmem:[%s5839_s2 + $0xb8] sm:$0xff]  ;;  %v3083_v62 = vld [vmem:[%s5839_s2 + $0xe0] sm:$0xff] }
  0xc4   : > { %4077 = vmatprep.mubr.msk.bf16.mxu0 %vm474_vm2, %v1565_v55  ;;  %3183 = vperm.xlu0 %4272, %v3073_v22   ;;  %v5907_v55 = vld [vmem:[#allocation13_spill] sm:$0xff] }
  0xc5   : > { %4040 = vmatmul.mubr.msk.bf16.gmra.mxu1 %vm474_vm2, %v1264_v15  ;;  %v1859_v54 = vrot.slane %v5907_v55, 2  ;;  %v1861_v15 = vrot.slane %v5908_v5, 2  ;;  %v5913_v5 = vld [vmem:[#allocation3_spill] sm:$0xff] }
  0xc6   : > { %4083 = vmatprep.mubr.msk.bf16.mxu1 %vm474_vm2, %v1850_v9  ;;  %v3082_v9 = vld [vmem:[%s5839_s2 + $0xd8] sm:$0xff] }
  0xc7   : > { %3188 = vperm.xlu1 %4273, %v3074_v61   ;;  %v1860_v28 = vsel %vm1847_vm5, %v1857_v40, %v1859_v54  ;;  %v1862_v2 = vsel %vm1847_vm5, %v1859_v54, %v1861_v15  ;;  %v3084_v61 = vld [vmem:[%s5839_s2 + $0xe8] sm:$0xff] }
  0xc8   : > { %3193 = vperm.xlu0 %4272, %v3075_v11   ;;  %v5909_v11 = vld [vmem:[#allocation20_spill] sm:$0xff] }
  0xcb   : > { %4078 = vmatmul.mubr.msk.bf16.gmra.mxu0 %vm474_vm2, %v1574_v56  ;;  %3198 = vperm.xlu1 %4273, %v3076_v39  }
  0xcc   : > { %4121 = vmatprep.mubr.msk.bf16.mxu0 %vm474_vm2, %v1852_v6  ;;  %3203 = vperm.xlu0 %4272, %v3077_v4   ;;  %v5910_v4 = vld [vmem:[#allocation2_spill] sm:$0xff] }
  0xcd   : > { %4084 = vmatmul.mubr.msk.bf16.vlgmr.msra.gmra.mxu1 %vm474_vm2, %v1852_v6  ;;  %v1863_v6 = vrot.slane %v5909_v11, 2  ;;  %v1865_v48 = vrot.slane %v5910_v4, 2 }
  0xce   : > { %4158 = vmatpush3.bf16.msra.mxu1 %v2530_v27  ;;  %4087 = vmatprep.mubr.msk.bf16.mxu1 %vm474_vm2, %v1854_v38  ;;  %v3085_v27 = vld [vmem:[%s5839_s2 + $0xf0] sm:$0xff] }
  0xcf   : > { %3208 = vperm.xlu1 %4273, %v3078_v10   ;;  %v1864_v10 = vsel %vm1847_vm5, %v1861_v15, %v1863_v6  ;;  %v1867_v15 = vrot.slane %v5913_v5, 2 }
  0xd0   : > { %3213 = vperm.xlu0 %4272, %v3079_v44  }
  0xd1   : > { %v1868_v4 = vsel %vm1847_vm5, %v1865_v48, %v1867_v15 }
  0xd3   : > { %4122 = vmatmul.mubr.msk.bf16.vlgmr.msra.gmra.mxu0 %vm474_vm2, %v1854_v38  ;;  %3218 = vperm.xlu1 %4273, %v3080_v26   ;;  %v1866_v26 = vsel %vm1847_vm5, %v1863_v6, %v1865_v48  ;;  %v5919_v48 = vld [vmem:[#allocation7_spill] sm:$0xff] }
  0xd4   : > { %4196 = vmatpush3.bf16.msra.mxu0 %v2840_v58  ;;  %4125 = vmatprep.mubr.msk.bf16.mxu0 %vm474_vm2, %v1856_v50  ;;  %v3086_v58 = vld [vmem:[%s5839_s2 + $0xf8] sm:$0xff] }
  0xd5   : > { %4088 = vmatmul.mubr.msk.bf16.gmra.mxu1 %vm474_vm2, %v1856_v50  ;;  %3223 = vperm.xlu0 %4272, %v3081_v32   ;;  %v3087_v50 = vld [vmem:[%s5839_s2 + $0x100] sm:$0xff]  ;;  %v3088_v32 = vld [vmem:[%s5839_s2 + $0x108] sm:$0xff] }
  0xd6   : > { %4091 = vmatprep.mubr.msk.bf16.mxu1 %vm474_vm2, %v1858_v52 }
  0xd7   : > { %3228 = vperm.xlu1 %4273, %v3082_v9   ;;  %v3089_v9 = vld [vmem:[%s5839_s2 + $0x110] sm:$0xff] }
  0xd9   : > { %3233 = vperm.xlu0 %4272, %v3083_v62  }
  0xdb   : > { %v5098_v22 = vpop.f32.mrf.mxu0  ;;  %4126 = vmatmul.mubr.msk.bf16.gmra.mxu0 %vm474_vm2, %v1858_v52  ;;  %3238 = vperm.xlu1 %4273, %v3084_v61  }
  0xdc   : > { %4129 = vmatprep.mubr.msk.bf16.mxu0 %vm474_vm2, %v1860_v28  ;;  %v5103_v43 = vpop.f32.mrf.mxu1 }
  0xdd   : > { %4092 = vmatmul.mubr.msk.bf16.gmra.mxu1 %vm474_vm2, %v1860_v28  ;;  %v5106_v56 = vpop.f32.mrf.mxu0  ;;  %3243 = vperm.xlu0 %4272, %v3085_v27   ;;  %v3090_v27 = vld [vmem:[%s5839_s2 + $0x118] sm:$0xff] }
  0xde   : > { %4095 = vmatprep.mubr.msk.bf16.mxu1 %vm474_vm2, %v1862_v2  ;;  %v5116_v38 = vpop.f32.mrf.mxu1 }
  0xdf   : > { %v5118_v39 = vpop.f32.mrf.mxu0  ;;  %3248 = vperm.xlu1 %4273, %v3086_v58  }
  0xe0   : > { %v5121_v12 = vpop.f32.mrf.mxu1 }
  0xe1   : > { %v5123_v40 = vpop.f32.mrf.mxu0  ;;  %3253 = vperm.xlu0 %4272, %v3087_v50  }
  0xe2   : > { %v5132_v44 = vpop.f32.mrf.mxu1 }
  0xe3   : > { %5911 = vst [vmem:[#allocation10_spill] sm:$0xff] %v5132_v44  ;;  %v5134_v52 = vpop.f32.mrf.mxu0  ;;  %4130 = vmatmul.mubr.msk.bf16.gmra.mxu0 %vm474_vm2, %v1862_v2  ;;  %v5915_v2 = vld [vmem:[#allocation5_spill] sm:$0xff]  ;;  %3258 = vperm.xlu1 %4273, %v3088_v32   ;;  %v2394_v44 = vrot.slane %v4471_v35, 3  ;;  %v1883_v35 = vrot.slane %v5003_v1, 2 }
  0xe4   : > { %4133 = vmatprep.mubr.msk.bf16.mxu0 %vm474_vm2, %v1864_v10  ;;  %v5139_v55 = vpop.f32.mrf.mxu1  ;;  %v1869_v61 = vrot.slane %v5915_v2, 2 }
  0xe5   : > { %5912 = vst [vmem:[#allocation13_spill] sm:$0xff] %v5139_v55  ;;  %4096 = vmatmul.mubr.msk.bf16.gmra.mxu1 %vm474_vm2, %v1864_v10  ;;  %v5142_v54 = vpop.f32.mrf.mxu0  ;;  %3263 = vperm.xlu0 %4272, %v3089_v9   ;;  %v1871_v9 = vrot.slane %v5919_v48, 2  ;;  %v5929_v55 = vld [vmem:[#allocation6_spill] sm:$0xff] }
  0xe6   : > { %4099 = vmatprep.mubr.msk.bf16.mxu1 %vm474_vm2, %v1866_v26  ;;  %v5152_v28 = vpop.f32.mrf.mxu1  ;;  %v1870_v50 = vsel %vm1847_vm5, %v1867_v15, %v1869_v61  ;;  %v2390_v57 = vrot.slane %v5929_v55, 2 }
  0xe7   : > { %5914 = vst [vmem:[#allocation17_spill] sm:$0xff] %v5152_v28  ;;  %v5154_v62 = vpop.f32.mrf.mxu0  ;;  %3268 = vperm.xlu1 %4273, %v3090_v27   ;;  %v1872_v45 = vsel %vm1847_vm5, %v1869_v61, %v1871_v9  ;;  %v1875_v61 = vrot.slane %v4532_v60, 2 }
  0xe8   : > { %v5157_v11 = vpop.f32.mrf.mxu1 }
  0xe9   : > { %5916 = vst [vmem:[#allocation20_spill] sm:$0xff] %v5157_v11  ;;  %v5159_v6 = vpop.f32.mrf.mxu0 }
  0xea   : > { %v5165_v58 = vpop.f32.mrf.mxu1 }
  0xeb   : > { %5917 = vst [vmem:[#allocation2_spill] sm:$0xff] %v5165_v58  ;;  %v5167_v10 = vpop.f32.mrf.mxu0  ;;  %4134 = vmatmul.mubr.msk.bf16.gmra.mxu0 %vm474_vm2, %v1866_v26  ;;  %v5921_v26 = vld [vmem:[#allocation8_spill] sm:$0xff]  ;;  %v260_v58 = vld [vmem:[%s4402_s28 + $0x9c] sm:$0xf] }
  0xec   : > { %4137 = vmatprep.mubr.msk.bf16.mxu0 %vm474_vm2, %v1868_v4  ;;  %v5172_v32 = vpop.f32.mrf.mxu1  ;;  %v1873_v23 = vrot.slane %v5921_v26, 2 }
  0xed   : > { %5918 = vst [vmem:[#allocation3_spill] sm:$0xff] %v5172_v32  ;;  %4100 = vmatmul.mubr.msk.bf16.gmra.mxu1 %vm474_vm2, %v1868_v4  ;;  %v5175_v5 = vpop.f32.mrf.mxu0 }
  0xee   : > { %4103 = vmatprep.mubr.msk.bf16.mxu1 %vm474_vm2, %v1870_v50  ;;  %v5179_v2 = vpop.f32.mrf.mxu1  ;;  %v1874_v48 = vsel %vm1847_vm5, %v1871_v9, %v1873_v23 }
  0xef   : > { %5920 = vst [vmem:[#allocation5_spill] sm:$0xff] %v5179_v2  ;;  %v5181_v47 = vpop.f32.mrf.mxu0 }
  0xf0   : > { %v5184_v15 = vpop.f32.mrf.mxu1 }
  0xf1   : > { %5922 = vst [vmem:[#allocation7_spill] sm:$0xff] %v5184_v15  ;;  %v5186_v27 = vpop.f32.mrf.mxu0 }
  0xf2   : > { %v5189_v8 = vpop.f32.mrf.mxu1 }
  0xf3   : > { %5923 = vst [vmem:[#allocation8_spill] sm:$0xff] %v5189_v8  ;;  %v5191_v4 = vpop.f32.mrf.mxu0  ;;  %4138 = vmatmul.mubr.msk.bf16.gmra.mxu0 %vm474_vm2, %v1870_v50  ;;  %v1877_v50 = vrot.slane %v5926_v36, 2 }
  0xf4   : > { %4141 = vmatprep.mubr.msk.bf16.mxu0 %vm474_vm2, %v1872_v45  ;;  %v5196_v2 = vpop.f32.mrf.mxu1 }
  0xf5   : > { %5924 = vst [vmem:[#allocation23_spill] sm:$0xff] %v5196_v2  ;;  %4104 = vmatmul.mubr.msk.bf16.gmra.mxu1 %vm474_vm2, %v1872_v45  ;;  %v5199_v26 = vpop.f32.mrf.mxu0  ;;  %v1876_v2 = vsel %vm1847_vm5, %v1873_v23, %v1875_v61  ;;  %v1878_v60 = vsel %vm1847_vm5, %v1875_v61, %v1877_v50  ;;  %v1879_v23 = vrot.slane %v4574_v33, 2 }
  0xf6   : > { %4107 = vmatprep.mubr.msk.bf16.mxu1 %vm474_vm2, %v1874_v48  ;;  %v5203_v15 = vpop.f32.mrf.mxu1 }
  0xf7   : > { %5925 = vst [vmem:[#allocation24_spill] sm:$0xff] %v5203_v15  ;;  %v5205_v8 = vpop.f32.mrf.mxu0 }
  0xf8   : > { %v5208_v9 = vpop.f32.mrf.mxu1 }
  0xf9   : > { %5927 = vst [vmem:[#allocation12_spill] sm:$0xff] %v5208_v9  ;;  %v5210_v24 = vpop.f32.mrf.mxu0 }
  0xfa   : > { %v5213_v45 = vpop.f32.mrf.mxu1 }
  0xfb   : > { %5928 = vst [vmem:[#allocation25_spill] sm:$0xff] %v5213_v45  ;;  %v5215_v32 = vpop.f32.mrf.mxu0  ;;  %4142 = vmatmul.mubr.msk.bf16.gmra.mxu0 %vm474_vm2, %v1874_v48  ;;  %v1881_v45 = vrot.slane %v4690_v30, 2 }
  0xfc   : > { %4145 = vmatprep.mubr.msk.bf16.mxu0 %vm474_vm2, %v1876_v2  ;;  %v3933_v15 = vpop.f32.mrf.mxu1 }
  0xfd   : > { %4108 = vmatmul.mubr.msk.bf16.gmra.mxu1 %vm474_vm2, %v1876_v2  ;;  %v5221_v36 = vpop.f32.mrf.mxu0  ;;  %v792_v9 = vadd.f32 %v3933_v15, %v5098_v22  ;;  %v5234_v2 = vcombine.low %v4985_v25, %v260_v58  ;;  %v1880_v15 = vsel %vm1847_vm5, %v1877_v50, %v1879_v23  ;;  %v1882_v33 = vsel %vm1847_vm5, %v1879_v23, %v1881_v45  ;;  %v5259_v23 = vld [vmem:[%s4402_s28 + $0xa0] ss:$0 sps:$4 sm:$0xff]  }
  0xfe   : > { %4111 = vmatprep.mubr.msk.bf16.mxu1 %vm474_vm2, %v1878_v60  ;;  %v783_v11 = vpop.f32.mrf.mxu1  ;;  %v1884_v1 = vsel %vm1847_vm5, %v1881_v45, %v1883_v35  ;;  %v4298_v35 = vld [vmem:[%s4402_s28 + $0x18] sm:$0xff]  }
  0xff   : > { %v5228_v48 = vpop.f32.mrf.mxu0  ;;  %v784_v61 = vadd.f32 %v783_v11, %v5106_v56  ;;  %v2391_v56 = vrot.slane %v5930_v0, 3  ;;  %v2393_v11 = vrot.slane %v4486_v42, 2  ;;  %v2161_v50 = vrot.slane %v5234_v2, 2 }
 0x100   : > { %v3934_v28 = vpop.f32.mrf.mxu1 }
 0x101   : > { %v5231_v63 = vpop.f32.mrf.mxu0  ;;  %v795_v22 = vadd.f32 %v3934_v28, %v5118_v39 }
 0x102   : > { %v786_v21 = vpop.f32.mrf.mxu1 }
 0x103   : > { %v3971_v30 = vpop.f32.mrf.mxu0  ;;  %4146 = vmatmul.mubr.msk.bf16.gmra.mxu0 %vm474_vm2, %v1878_v60  ;;  %v787_v25 = vadd.f32 %v786_v21, %v5123_v40  ;;  %v2395_v40 = vor.u32 %v2394_v44, %v2393_v11 }
 0x104   : > { %v5245_v58 = vadd.f32 %v3971_v30, %v792_v9  ;;  %4149 = vmatprep.mubr.msk.bf16.mxu0 %vm474_vm2, %v1880_v15  ;;  %v2392_v30 = vor.u32 %v2391_v56, %v2390_v57  ;;  %v2402_v56 = vrot.slane %v4529_v59, 3 }
 0x105   : > { %v3937_v39 = vpop.f32.mrf.mxu1  ;;  %4112 = vmatmul.mubr.msk.bf16.gmra.mxu1 %vm474_vm2, %v1880_v15  ;;  %v1076_v28 = vpop.f32.mrf.mxu0 }
 0x106   : > { %5931 = vst [vmem:[#allocation6_spill] sm:$0xff] %v5245_v58  ;;  %v808_v55 = vadd.f32 %v3937_v39, %v5134_v52  ;;  %v5251_v0 = vadd.f32 %v1076_v28, %v784_v61  ;;  %4115 = vmatprep.mubr.msk.bf16.mxu1 %vm474_vm2, %v1882_v33  ;;  %v2162_v52 = vsel %vm1847_vm5, %v1881_v45, %v2161_v50 }
 0x107   : > { %v799_v42 = vpop.f32.mrf.mxu1  ;;  %v3972_v21 = vpop.f32.mrf.mxu0 }
 0x108   : > { %v800_v9 = vadd.f32 %v799_v42, %v5142_v54  ;;  %v5256_v60 = vadd.f32 %v3972_v21, %v795_v22  ;;  %v2396_v54 = vsel %vm2389_vm6, %v2392_v30, %v2395_v40  ;;  %v2401_v22 = vrot.slane %v4559_v14, 2 }
 0x109   : > { %v3938_v15 = vpop.f32.mrf.mxu1  ;;  %v1079_v58 = vpop.f32.mrf.mxu0  ;;  %v2749_v42 = vrot.slane %v4298_v35, 3 }
 0x10a   : > { %v811_v61 = vadd.f32 %v3938_v15, %v5154_v62  ;;  %v5263_v39 = vadd.f32 %v1079_v58, %v787_v25  ;;  %v2163_v62 = vrot.slane %v5259_v23, 2  ;;  %v4297_v58 = vld [vmem:[%s4402_s28 + $0x10] sm:$0xff]  }
 0x10b   : > { %v802_v57 = vpop.f32.mrf.mxu1  ;;  %v3975_v44 = vpop.f32.mrf.mxu0  ;;  %4150 = vmatmul.mubr.msk.bf16.gmra.mxu0 %vm474_vm2, %v1882_v33  ;;  %v2748_v33 = vrot.slane %v4297_v58, 3 }
 0x10c   : > { %v803_v11 = vadd.f32 %v802_v57, %v5159_v6  ;;  %v5271_v28 = vadd.f32 %v3975_v44, %v808_v55  ;;  %4153 = vmatprep.mubr.msk.bf16.mxu0 %vm474_vm2, %v2162_v52  ;;  %v2403_v55 = vor.u32 %v2402_v56, %v2401_v22  ;;  %v2164_v52 = vsel %vm1847_vm5, %v2161_v50, %v2163_v62 }
 0x10d   : > { %v3941_v45 = vpop.f32.mrf.mxu1  ;;  %4116 = vmatmul.mubr.msk.bf16.gmra.mxu1 %vm474_vm2, %v1884_v1  ;;  %v1092_v25 = vpop.f32.mrf.mxu0  ;;  %v2750_v44 = vsel %vm2747_vm7, %v2748_v33, %v2749_v42  ;;  %v2409_v56 = vrot.slane %v4614_v29, 2  ;;  %v4300_v33 = vld [vmem:[%s4402_s28 + $0x28] sm:$0xff]  }
 0x10e   : > { %v824_v14 = vadd.f32 %v3941_v45, %v5167_v10  ;;  %v5279_v21 = vadd.f32 %v1092_v25, %v800_v9  ;;  %4159 = vmatprep.mubr.msk.bf16.mxu1 %vm474_vm2, %v2396_v54  ;;  %v2405_v10 = vrot.slane %v4581_v41, 2  ;;  %v2406_v9 = vrot.slane %v4562_v16, 3 }
 0x10f   : > { %v815_v59 = vpop.f32.mrf.mxu1  ;;  %v3976_v6 = vpop.f32.mrf.mxu0  ;;  %v2404_v50 = vsel %vm2389_vm6, %v4893_v13, %v2403_v55  ;;  %v2410_v41 = vrot.slane %v4589_v49, 3  ;;  %v2753_v35 = vrot.slane %v4300_v33, 3 }
 0x110   : > { %v816_v30 = vadd.f32 %v815_v59, %v5175_v5  ;;  %v5283_v15 = vadd.f32 %v3976_v6, %v811_v61  ;;  %v2400_v5 = vsel %vm2389_vm6, %v2395_v40, %v4893_v13  ;;  %v2407_v58 = vor.u32 %v2406_v9, %v2405_v10 }
 0x111   : > { %v3942_v1 = vpop.f32.mrf.mxu1  ;;  %v1095_v57 = vpop.f32.mrf.mxu0  ;;  %v2413_v9 = vrot.slane %v4618_v34, 2  ;;  %v4301_v34 = vld [vmem:[%s4402_s28 + $0x30] sm:$0xff]  }
 0x112   : > { %v827_v54 = vadd.f32 %v3942_v1, %v5181_v47  ;;  %v5290_v45 = vadd.f32 %v1095_v57, %v803_v11  ;;  %v4299_v11 = vld [vmem:[%s4402_s28 + $0x20] sm:$0xff]  }
 0x113   : > { %v818_v61 = vpop.f32.mrf.mxu1  ;;  %v3979_v22 = vpop.f32.mrf.mxu0  ;;  %4154 = vmatmul.mubr.msk.bf16.gmra.mxu0 %vm474_vm2, %v2164_v52  ;;  %v2751_v40 = vrot.slane %v4299_v11, 3 }
 0x114   : > { %v819_v16 = vadd.f32 %v818_v61, %v5186_v27  ;;  %v5300_v47 = vadd.f32 %v3979_v22, %v824_v14  ;;  %4197 = vmatprep.mubr.msk.bf16.mxu0 %vm474_vm2, %v2750_v44  ;;  %v2411_v14 = vor.u32 %v2410_v41, %v2409_v56  ;;  %v2408_v44 = vsel %vm2389_vm6, %v2403_v55, %v2407_v58  ;;  %v4302_v41 = vld [vmem:[%s4402_s28 + $0x38] sm:$0xff]  }
 0x115   : > { %v3945_v62 = vpop.f32.mrf.mxu1  ;;  %4160 = vmatmul.mubr.msk.bf16.vlgmr.msra.gmra.mxu1 %vm474_vm2, %v2400_v5  ;;  %v1108_v25 = vpop.f32.mrf.mxu0  ;;  %v2752_v52 = vsel %vm2747_vm7, %v2749_v42, %v2751_v40  ;;  %v2417_v61 = vrot.slane %v4639_v3, 2  ;;  %v2418_v55 = vrot.slane %v4625_v53, 3 }
 0x116   : > { %v840_v13 = vadd.f32 %v3945_v62, %v5191_v4  ;;  %v5307_v29 = vadd.f32 %v1108_v25, %v816_v30  ;;  %4163 = vmatprep.mubr.msk.bf16.mxu1 %vm474_vm2, %v2404_v50  ;;  %v2754_v4 = vsel %vm2747_vm7, %v2751_v40, %v2753_v35  ;;  %v2412_v42 = vsel %vm2389_vm6, %v2407_v58, %v2411_v14 }
 0x117   : > { %v831_v49 = vpop.f32.mrf.mxu1  ;;  %v3980_v27 = vpop.f32.mrf.mxu0  ;;  %v2755_v50 = vrot.slane %v4301_v34, 3  ;;  %v2419_v62 = vor.u32 %v2418_v55, %v2417_v61 }
 0x118   : > { %v832_v59 = vadd.f32 %v831_v49, %v5199_v26  ;;  %v5311_v6 = vadd.f32 %v3980_v27, %v827_v54  ;;  %v2414_v26 = vrot.slane %v4610_v7, 3 }
 0x119   : > { %v3946_v1 = vpop.f32.mrf.mxu1  ;;  %v1111_v57 = vpop.f32.mrf.mxu0  ;;  %v2756_v33 = vsel %vm2747_vm7, %v2753_v35, %v2755_v50 }
 0x11a   : > { %v843_v30 = vadd.f32 %v3946_v1, %v5205_v8  ;;  %v5317_v10 = vadd.f32 %v1111_v57, %v819_v16  ;;  %v2757_v16 = vrot.slane %v4302_v41, 3  ;;  %v2415_v53 = vor.u32 %v2414_v26, %v2413_v9 }
 0x11b   : > { %v834_v54 = vpop.f32.mrf.mxu1  ;;  %v3983_v5 = vpop.f32.mrf.mxu0  ;;  %4198 = vmatmul.mubr.msk.bf16.vlgmr.msra.gmra.mxu0 %vm474_vm2, %v2752_v52 }
 0x11c   : > { %v835_v22 = vadd.f32 %v834_v54, %v5210_v24  ;;  %v5326_v8 = vadd.f32 %v3983_v5, %v840_v13  ;;  %4201 = vmatprep.mubr.msk.bf16.mxu0 %vm474_vm2, %v2754_v4  ;;  %v2758_v27 = vsel %vm2747_vm7, %v2755_v50, %v2757_v16  ;;  %v2416_v57 = vsel %vm2389_vm6, %v2411_v14, %v2415_v53  ;;  %v4304_v5 = vld [vmem:[%s4402_s28 + $0x48] sm:$0xff]  }
 0x11d   : > { %v3949_v56 = vpop.f32.mrf.mxu1  ;;  %4164 = vmatmul.mubr.msk.bf16.gmra.mxu1 %vm474_vm2, %v2408_v44  ;;  %v1124_v7 = vpop.f32.mrf.mxu0  ;;  %v2420_v35 = vsel %vm2389_vm6, %v2415_v53, %v2419_v62  ;;  %v2425_v4 = vrot.slane %v4437_v20, 2  ;;  %v2429_v53 = vrot.slane %v4477_v37, 2  ;;  %v4305_v37 = vld [vmem:[%s4402_s28 + $0x50] sm:$0xff]  }
 0x11e   : > { %v856_v11 = vadd.f32 %v3949_v56, %v5215_v32  ;;  %v5333_v40 = vadd.f32 %v1124_v7, %v832_v59  ;;  %4167 = vmatprep.mubr.msk.bf16.mxu1 %vm474_vm2, %v2412_v42  ;;  %v2421_v32 = vrot.slane %v4431_v18, 2  ;;  %v2422_v59 = vrot.slane %v4428_v17, 3 }
 0x11f   : > { %v847_v3 = vpop.f32.mrf.mxu1  ;;  %v3984_v24 = vpop.f32.mrf.mxu0  ;;  %v2761_v42 = vrot.slane %v4304_v5, 3  ;;  %v5935_v5 = vld [vmem:[#allocation13_spill] sm:$0xff] }
 0x120   : > { %v848_v25 = vadd.f32 %v847_v3, %v5221_v36  ;;  %v5337_v58 = vadd.f32 %v3984_v24, %v843_v30  ;;  %v2426_v30 = vrot.slane %v4434_v19, 3  ;;  %v2423_v54 = vor.u32 %v2422_v59, %v2421_v32  ;;  %v4306_v32 = vld [vmem:[%s4402_s28 + $0x58] sm:$0xff]  }
 0x121   : > { %v3950_v13 = vpop.f32.mrf.mxu1  ;;  %v1127_v49 = vpop.f32.mrf.mxu0  ;;  %v2430_v3 = vrot.slane %v4458_v31, 3  ;;  %v2765_v59 = vrot.slane %v4306_v32, 3 }
 0x122   : > { %v859_v52 = vadd.f32 %v3950_v13, %v5228_v48  ;;  %v5344_v1 = vadd.f32 %v1127_v49, %v835_v22  ;;  %v4303_v48 = vld [vmem:[%s4402_s28 + $0x40] sm:$0xff]   ;;  %v2424_v56 = vsel %vm2389_vm6, %v2419_v62, %v2423_v54  ;;  %v2434_v62 = vrot.slane %v4497_v46, 3 }
 0x123   : > { %v850_v36 = vpop.f32.mrf.mxu1  ;;  %v3987_v44 = vpop.f32.mrf.mxu0  ;;  %4202 = vmatmul.mubr.msk.bf16.gmra.mxu0 %vm474_vm2, %v2756_v33  ;;  %v2759_v9 = vrot.slane %v4303_v48, 3  ;;  %v2433_v33 = vrot.slane %v4509_v51, 2  ;;  %v2763_v49 = vrot.slane %v4305_v37, 3  ;;  %v2431_v46 = vor.u32 %v2430_v3, %v2429_v53  ;;  %v5938_v3 = vld [vmem:[#allocation17_spill] sm:$0xff]  ;;  %v4308_v37 = vld [vmem:[%s4402_s28 + $0x68] sm:$0xff]  }
 0x124   : > { %v851_v18 = vadd.f32 %v850_v36, %v5231_v63  ;;  %v5352_v17 = vadd.f32 %v3987_v44, %v856_v11  ;;  %4205 = vmatprep.mubr.msk.bf16.mxu0 %vm474_vm2, %v2758_v27  ;;  %v2427_v63 = vor.u32 %v2426_v30, %v2425_v4  ;;  %v5932_v44 = vld [vmem:[#allocation10_spill] sm:$0xff] }
 0x125   : > { %v3953_v14 = vpop.f32.mrf.mxu1  ;;  %4168 = vmatmul.mubr.msk.bf16.gmra.mxu1 %vm474_vm2, %v2416_v57  ;;  %v1140_v26 = vpop.f32.mrf.mxu0  ;;  %v2760_v22 = vsel %vm2747_vm7, %v2757_v16, %v2759_v9  ;;  %v2762_v7 = vsel %vm2747_vm7, %v2759_v9, %v2761_v42  ;;  %v2435_v36 = vor.u32 %v2434_v62, %v2433_v33  ;;  %v2764_v30 = vsel %vm2747_vm7, %v2761_v42, %v2763_v49 }
 0x126   : > { %v5358_v61 = vadd.f32 %v1140_v26, %v848_v25  ;;  %4171 = vmatprep.mubr.msk.bf16.mxu1 %vm474_vm2, %v2420_v35  ;;  %v872_v41 = vadd.f32 %v3953_v14, %v5103_v43  ;;  %v2428_v16 = vsel %vm2389_vm6, %v2423_v54, %v2427_v63  ;;  %v2766_v9 = vsel %vm2747_vm7, %v2763_v49, %v2765_v59  ;;  %v5934_v26 = vld [vmem:[#allocation9_spill] sm:$0xff] }
 0x127   : > { %v863_v19 = vpop.f32.mrf.mxu1  ;;  %v3988_v20 = vpop.f32.mrf.mxu0  ;;  %v2438_v54 = vrot.slane %v5934_v26, 3  ;;  %v2436_v42 = vsel %vm2389_vm6, %v2431_v46, %v2435_v36  ;;  %v2769_v49 = vrot.slane %v4308_v37, 3  ;;  %v4310_v37 = vld [vmem:[%s4402_s28 + $0x78] sm:$0xff]  }
 0x128   : > { %v5361_v55 = vadd.f32 %v3988_v20, %v859_v52  ;;  %v864_v13 = vadd.f32 %v863_v19, %v5116_v38 }
 0x129   : > { %v3954_v34 = vpop.f32.mrf.mxu1  ;;  %v1143_v50 = vpop.f32.mrf.mxu0 }
 0x12a   : > { %v5367_v11 = vadd.f32 %v1143_v50, %v851_v18  ;;  %v875_v52 = vadd.f32 %v3954_v34, %v5121_v12  ;;  %v5933_v12 = vld [vmem:[#allocation11_spill] sm:$0xff] }
 0x12b   : > { %v866_v24 = vpop.f32.mrf.mxu1  ;;  %v3991_v25 = vpop.f32.mrf.mxu0  ;;  %4206 = vmatmul.mubr.msk.bf16.gmra.mxu0 %vm474_vm2, %v2760_v22  ;;  %v2437_v14 = vrot.slane %v5933_v12, 2  ;;  %v2432_v22 = vsel %vm2389_vm6, %v2427_v63, %v2431_v46 }
 0x12c   : > { %v5376_v43 = vadd.f32 %v3991_v25, %v872_v41  ;;  %4209 = vmatprep.mubr.msk.bf16.mxu0 %vm474_vm2, %v2762_v7  ;;  %v867_v35 = vadd.f32 %v866_v24, %v5932_v44  ;;  %v5937_v41 = vld [vmem:[#allocation14_spill] sm:$0xff] }
 0x12d   : > { %v3957_v27 = vpop.f32.mrf.mxu1  ;;  %4172 = vmatmul.mubr.msk.bf16.gmra.mxu1 %vm474_vm2, %v2424_v56  ;;  %v1156_v31 = vpop.f32.mrf.mxu0  ;;  %v5936_v56 = vld [vmem:[#allocation15_spill] sm:$0xff]  ;;  %v2442_v53 = vrot.slane %v5937_v41, 3 }
 0x12e   : > { %v5383_v57 = vadd.f32 %v1156_v31, %v864_v13  ;;  %4175 = vmatprep.mubr.msk.bf16.mxu1 %vm474_vm2, %v2428_v16  ;;  %v888_v19 = vadd.f32 %v3957_v27, %v5935_v5  ;;  %v2441_v7 = vrot.slane %v5936_v56, 2  ;;  %v4307_v16 = vld [vmem:[%s4402_s28 + $0x60] sm:$0xff]   ;;  %v2439_v13 = vor.u32 %v2438_v54, %v2437_v14  ;;  %v5939_v27 = vld [vmem:[#allocation20_spill] sm:$0xff]  ;;  %v5941_v14 = vld [vmem:[#allocation3_spill] sm:$0xff] }
 0x12f   : > { %v879_v51 = vpop.f32.mrf.mxu1  ;;  %v3992_v38 = vpop.f32.mrf.mxu0  ;;  %v2767_v33 = vrot.slane %v4307_v16, 3  ;;  %v5942_v5 = vld [vmem:[#allocation18_spill] sm:$0xff]  ;;  %v5944_v56 = vld [vmem:[#allocation21_spill] sm:$0xff]  ;;  %v4309_v16 = vld [vmem:[%s4402_s28 + $0x70] sm:$0xff]  }
 0x130   : > { %v5387_v4 = vadd.f32 %v3992_v38, %v875_v52  ;;  %v880_v24 = vadd.f32 %v879_v51, %v5938_v3  ;;  %v2443_v51 = vor.u32 %v2442_v53, %v2441_v7  ;;  %v5940_v38 = vld [vmem:[#allocation2_spill] sm:$0xff]  ;;  %v2440_v12 = vsel %vm2389_vm6, %v2435_v36, %v2439_v13  ;;  %v5945_v36 = vld [vmem:[#allocation19_spill] sm:$0xff]  ;;  %v5946_v53 = vld [vmem:[#allocation5_spill] sm:$0xff] }
 0x131   : > { %v3958_v18 = vpop.f32.mrf.mxu1  ;;  %v1159_v48 = vpop.f32.mrf.mxu0  ;;  %v2449_v7 = vrot.slane %v5944_v56, 2  ;;  %v2450_v41 = vrot.slane %v5945_v36, 3  ;;  %v5952_v36 = vld [vmem:[#allocation23_spill] sm:$0xff] }
 0x132   : > { %v5394_v20 = vadd.f32 %v1159_v48, %v867_v35  ;;  %v891_v31 = vadd.f32 %v3958_v18, %v5939_v27  ;;  %v2770_v18 = vsel %vm2747_vm7, %v2767_v33, %v2769_v49  ;;  %v2773_v27 = vrot.slane %v4310_v37, 3  ;;  %v5953_v37 = vld [vmem:[#allocation24_spill] sm:$0xff] }
 0x133   : > { %v882_v34 = vpop.f32.mrf.mxu1  ;;  %v3995_v50 = vpop.f32.mrf.mxu0  ;;  %4210 = vmatmul.mubr.msk.bf16.gmra.mxu0 %vm474_vm2, %v2764_v30  ;;  %v2768_v30 = vsel %vm2747_vm7, %v2765_v59, %v2767_v33  ;;  %v2444_v59 = vsel %vm2389_vm6, %v2439_v13, %v2443_v51  ;;  %v2771_v33 = vrot.slane %v4309_v16, 3 }
 0x134   : > { %v5402_v25 = vadd.f32 %v3995_v50, %v888_v19  ;;  %4213 = vmatprep.mubr.msk.bf16.mxu0 %vm474_vm2, %v2766_v9  ;;  %v883_v44 = vadd.f32 %v882_v34, %v5940_v38  ;;  %v2445_v19 = vrot.slane %v5942_v5, 2 }
 0x135   : > { %v3961_v63 = vpop.f32.mrf.mxu1  ;;  %4176 = vmatmul.mubr.msk.bf16.gmra.mxu1 %vm474_vm2, %v2432_v22  ;;  %v1172_v62 = vpop.f32.mrf.mxu0  ;;  %v5943_v22 = vld [vmem:[#allocation16_spill] sm:$0xff]  ;;  %v2772_v5 = vsel %vm2747_vm7, %v2769_v49, %v2771_v33 }
 0x136   : > { %v5409_v32 = vadd.f32 %v1172_v62, %v880_v24  ;;  %4179 = vmatprep.mubr.msk.bf16.mxu1 %vm474_vm2, %v2436_v42  ;;  %v904_v26 = vadd.f32 %v3961_v63, %v5941_v14  ;;  %v2446_v34 = vrot.slane %v5943_v22, 3  ;;  %v5948_v14 = vld [vmem:[#allocation8_spill] sm:$0xff] }
 0x137   : > { %v895_v52 = vpop.f32.mrf.mxu1  ;;  %v3996_v46 = vpop.f32.mrf.mxu0 }
 0x138   : > { %v5413_v35 = vadd.f32 %v3996_v46, %v891_v31  ;;  %v896_v3 = vadd.f32 %v895_v52, %v5946_v53  ;;  %v5947_v31 = vld [vmem:[#allocation7_spill] sm:$0xff]  ;;  %v2447_v38 = vor.u32 %v2446_v34, %v2445_v19 }
 0x139   : > { %v3962_v48 = vpop.f32.mrf.mxu1  ;;  %v1175_v9 = vpop.f32.mrf.mxu0 }
 0x13a   : > { %v5419_v54 = vadd.f32 %v1175_v9, %v883_v44  ;;  %v907_v13 = vadd.f32 %v3962_v48, %v5947_v31  ;;  %v2458_v9 = vshrl.u32 %v5234_v2, 16 }
 0x13b   : > { %v898_v50 = vpop.f32.mrf.mxu1  ;;  %v3999_v42 = vpop.f32.mrf.mxu0  ;;  %4214 = vmatmul.mubr.msk.bf16.gmra.mxu0 %vm474_vm2, %v2768_v30  ;;  %v2451_v30 = vor.u32 %v2450_v41, %v2449_v7 }
 0x13c   : > { %v5428_v24 = vadd.f32 %v3999_v42, %v904_v26  ;;  %4217 = vmatprep.mubr.msk.bf16.mxu0 %vm474_vm2, %v2770_v18  ;;  %v2461_v18 = vshll.u32 %v5234_v2, 16  ;;  %v899_v26 = vadd.f32 %v898_v50, %v5948_v14  ;;  %v2774_v42 = vsel %vm2747_vm7, %v2771_v33, %v2773_v27 }
 0x13d   : > { %v3965_v63 = vpop.f32.mrf.mxu1  ;;  %4180 = vmatmul.mubr.msk.bf16.gmra.mxu1 %vm474_vm2, %v2440_v12  ;;  %v1188_v62 = vpop.f32.mrf.mxu0  ;;  %v2448_v50 = vsel %vm2389_vm6, %v2443_v51, %v2447_v38  ;;  %v2452_v16 = vsel %vm2389_vm6, %v2447_v38, %v2451_v30  ;;  %v2460_v33 = vrot.slane %v2458_v9, 2  ;;  %v5954_v38 = vld [vmem:[#allocation12_spill] sm:$0xff] }
 0x13e   : > { %v5435_v46 = vadd.f32 %v1188_v62, %v896_v3  ;;  %4183 = vmatprep.mubr.msk.bf16.mxu1 %vm474_vm2, %v2444_v59  ;;  %v5949_v59 = vld [vmem:[#allocation22_spill] sm:$0xff]  ;;  %v920_v41 = vadd.f32 %v3965_v63, %v5952_v36  ;;  %v2463_v62 = vrot.slane %v2461_v18, 3 }
 0x13f   : > { %v911_v52 = vpop.f32.mrf.mxu1  ;;  %v4000_v44 = vpop.f32.mrf.mxu0  ;;  %v5950_v19 = vshrl.u32 %v5949_v59, 16  ;;  %v5951_v56 = vshll.u32 %v5949_v59, 16  ;;  %v4311_v63 = vld [vmem:[%s4402_s28 + $0x80] sm:$0xff]  }
 0x140   : > { %v5441_v12 = vadd.f32 %v4000_v44, %v907_v13  ;;  %v912_v31 = vadd.f32 %v911_v52, %v5953_v37  ;;  %v2775_v44 = vrot.slane %v4311_v63, 3  ;;  %v5955_v18 = vld [vmem:[#allocation6_spill] sm:$0xff] }
 0x141   : > { %v3966_v22 = vpop.f32.mrf.mxu1  ;;  %v1191_v48 = vpop.f32.mrf.mxu0  ;;  %v2453_v34 = vrot.slane %v5950_v19, 2  ;;  %v2454_v7 = vrot.slane %v5951_v56, 3 }
 0x142   : > { %v5450_v53 = vadd.f32 %v1191_v48, %v899_v26  ;;  %v4312_v48 = vld [vmem:[%s4402_s28 + $0x88] sm:$0xff]   ;;  %v923_v9 = vadd.f32 %v3966_v22, %v5954_v38  ;;  %v2776_v63 = vsel %vm2747_vm7, %v2773_v27, %v2775_v44 }
 0x143   : > { %v914_v3 = vpop.f32.mrf.mxu1  ;;  %v4003_v49 = vpop.f32.mrf.mxu0  ;;  %4218 = vmatmul.mubr.msk.bf16.gmra.mxu0 %vm474_vm2, %v2772_v5  ;;  %v2455_v26 = vor.u32 %v2454_v7, %v2453_v34  ;;  %v2777_v19 = vrot.slane %v4312_v48, 3  ;;  %v2467_v5 = vshrl.u32 %v5259_v23, 16 }
 0x144   : > { %v5456_v13 = vadd.f32 %v4003_v49, %v920_v41  ;;  %4221 = vmatprep.mubr.msk.bf16.mxu0 %vm474_vm2, %v2774_v42  ;;  %v2470_v42 = vshll.u32 %v5259_v23, 16  ;;  %v2464_v49 = vor.u32 %v2463_v62, %v2460_v33 }
 0x145   : > { %v4009_v14 = vpop.f32.mrf.mxu1  ;;  %4184 = vmatmul.mubr.msk.bf16.gmra.mxu1 %vm474_vm2, %v2448_v50  ;;  %v1204_v51 = vpop.f32.mrf.mxu0  ;;  %v5956_v50 = vld [vmem:[#allocation25_spill] sm:$0xff]  ;;  %v2469_v38 = vrot.slane %v2467_v5, 2  ;;  %v2781_v5 = vrot.slane %v5234_v2, 3 }
 0x146   : > { %v1453_v56 = vadd.f32 %v4009_v14, %v5955_v18  ;;  %v5465_v52 = vadd.f32 %v1204_v51, %v912_v31  ;;  %4187 = vmatprep.mubr.msk.bf16.mxu1 %vm474_vm2, %v2452_v16  ;;  %v915_v37 = vadd.f32 %v914_v3, %v5956_v50  ;;  %v2456_v31 = vsel %vm2389_vm6, %v2451_v30, %v2455_v26 }
 0x147   : > { %v1308_v36 = vpop.f32.mrf.mxu1  ;;  %v4004_v41 = vpop.f32.mrf.mxu0  ;;  %v2778_v14 = vsel %vm2747_vm7, %v2775_v44, %v2777_v19  ;;  %v2472_v33 = vrot.slane %v2470_v42, 3  ;;  %v2779_v30 = vrot.slane %v5949_v59, 3 }
 0x148   : > { %v1451_v34 = vadd.f32 %v1308_v36, %v5251_v0  ;;  %v5471_v7 = vadd.f32 %v4004_v41, %v923_v9  ;;  %v2465_v0 = vsel %vm2389_vm6, %v2455_v26, %v2464_v49 }
 0x149   : > { %v4010_v22 = vpop.f32.mrf.mxu1  ;;  %v1207_v48 = vpop.f32.mrf.mxu0  ;;  %v2473_v26 = vor.u32 %v2472_v33, %v2469_v38  ;;  %v2780_v59 = vsel %vm2747_vm7, %v2777_v19, %v2779_v30  ;;  %v2783_v19 = vrot.slane %v5259_v23, 3 }
 0x14a   : > { %v1454_v16 = vadd.f32 %v4010_v22, %v5256_v60  ;;  %v5477_v51 = vadd.f32 %v1207_v48, %v915_v37 }
 0x14b   : > { %v1311_v62 = vpop.f32.mrf.mxu1  ;;  %v4047_v3 = vpop.f32.mrf.mxu0  ;;  %4222 = vmatmul.mubr.msk.bf16.gmra.mxu0 %vm474_vm2, %v2776_v63  ;;  %v2782_v63 = vsel %vm2747_vm7, %v2779_v30, %v2781_v5 }
 0x14c   : > { %v1452_v27 = vadd.f32 %v1311_v62, %v5263_v39  ;;  %v5482_v9 = vadd.f32 %v4047_v3, %v1453_v56  ;;  %4225 = vmatprep.mubr.msk.bf16.mxu0 %vm474_vm2, %v2778_v14 }
 0x14d   : > { %v4013_v44 = vpop.f32.mrf.mxu1  ;;  %4188 = vmatmul.mubr.msk.bf16.gmra.mxu1 %vm474_vm2, %v2456_v31  ;;  %v1666_v60 = vpop.f32.mrf.mxu0 }
 0x14e   : > { %v1457_v18 = vadd.f32 %v4013_v44, %v5271_v28  ;;  %v5489_v42 = vadd.f32 %v1666_v60, %v1451_v34  ;;  %4191 = vmatprep.mubr.msk.bf16.mxu1 %vm474_vm2, %v2465_v0  ;;  %v2474_v34 = vsel %vm2389_vm6, %v2464_v49, %v2473_v26 }
 0x14f   : > { %v1324_v39 = vpop.f32.mrf.mxu1  ;;  %v4048_v56 = vpop.f32.mrf.mxu0 }
 0x150   : > { %v1455_v36 = vadd.f32 %v1324_v39, %v5279_v21  ;;  %v5493_v41 = vadd.f32 %v4048_v56, %v1454_v16 }
 0x151   : > { %v4014_v50 = vpop.f32.mrf.mxu1  ;;  %v1669_v37 = vpop.f32.mrf.mxu0 }
 0x152   : > { %v1458_v2 = vadd.f32 %v4014_v50, %v5283_v15  ;;  %v5498_v28 = vadd.f32 %v1669_v37, %v1452_v27 }
 0x153   : > { %v1327_v22 = vpop.f32.mrf.mxu1  ;;  %v4051_v48 = vpop.f32.mrf.mxu0  ;;  %4226 = vmatmul.mubr.msk.bf16.gmra.mxu0 %vm474_vm2, %v2780_v59 }
 0x154   : > { %v1456_v21 = vadd.f32 %v1327_v22, %v5290_v45  ;;  %v5503_v31 = vadd.f32 %v4051_v48, %v1457_v18  ;;  %4229 = vmatprep.mubr.msk.bf16.mxu0 %vm474_vm2, %v2782_v63  ;;  %v2784_v45 = vsel %vm2747_vm7, %v2781_v5, %v2783_v19 }
 0x155   : > { %v4017_v14 = vpop.f32.mrf.mxu1  ;;  %4192 = vmatmul.mubr.msk.bf16.gmra.mxu1 %vm474_vm2, %v2474_v34  ;;  %v1682_v15 = vpop.f32.mrf.mxu0 }
 0x156   : > { %v1461_v16 = vadd.f32 %v4017_v14, %v5300_v47  ;;  %v5509_v38 = vadd.f32 %v1682_v15, %v1455_v36 }
 0x157   : > { %v1340_v49 = vpop.f32.mrf.mxu1  ;;  %v4052_v33 = vpop.f32.mrf.mxu0 }
 0x158   : > { %v1459_v62 = vadd.f32 %v1340_v49, %v5307_v29  ;;  %v5512_v3 = vadd.f32 %v4052_v33, %v1458_v2 }
 0x159   : > { %v4018_v0 = vpop.f32.mrf.mxu1  ;;  %v1685_v27 = vpop.f32.mrf.mxu0 }
 0x15a   : > { %v1462_v23 = vadd.f32 %v4018_v0, %v5311_v6  ;;  %v5516_v30 = vadd.f32 %v1685_v27, %v1456_v21 }
 0x15b   : > { %v1343_v44 = vpop.f32.mrf.mxu1  ;;  %v4055_v60 = vpop.f32.mrf.mxu0  ;;  %4230 = vmatmul.mubr.msk.bf16.gmra.mxu0 %vm474_vm2, %v2784_v45 }
 0x15c   : > { %v1460_v47 = vadd.f32 %v1343_v44, %v5317_v10  ;;  %v5520_v18 = vadd.f32 %v4055_v60, %v1461_v16 }
 0x15d   : > { %v4021_v26 = vpop.f32.mrf.mxu1  ;;  %v1698_v29 = vpop.f32.mrf.mxu0 }
 0x15e   : > { %v1465_v39 = vadd.f32 %v4021_v26, %v5326_v8  ;;  %v5523_v56 = vadd.f32 %v1698_v29, %v1459_v62 }
 0x15f   : > { %v1356_v5 = vpop.f32.mrf.mxu1  ;;  %v4056_v36 = vpop.f32.mrf.mxu0 }
 0x160   : > { %v1463_v6 = vadd.f32 %v1356_v5, %v5333_v40  ;;  %v5526_v59 = vadd.f32 %v4056_v36, %v1462_v23 }
 0x161   : > { %v4022_v50 = vpop.f32.mrf.mxu1  ;;  %v1701_v37 = vpop.f32.mrf.mxu0 }
 0x162   : > { %v1466_v63 = vadd.f32 %v4022_v50, %v5337_v58  ;;  %v5529_v2 = vadd.f32 %v1701_v37, %v1460_v47 }
 0x163   : > { %v1359_v10 = vpop.f32.mrf.mxu1  ;;  %v4059_v34 = vpop.f32.mrf.mxu0 }
 0x164   : > { %v1464_v22 = vadd.f32 %v1359_v10, %v5344_v1  ;;  %v5532_v48 = vadd.f32 %v4059_v34, %v1465_v39 }
 0x165   : > { %v4025_v8 = vpop.f32.mrf.mxu1  ;;  %v1714_v21 = vpop.f32.mrf.mxu0 }
 0x166   : > { %v1469_v19 = vadd.f32 %v4025_v8, %v5352_v17  ;;  %v5535_v14 = vadd.f32 %v1714_v21, %v1463_v6 }
 0x167   : > { %v1372_v40 = vpop.f32.mrf.mxu1  ;;  %v4060_v15 = vpop.f32.mrf.mxu0 }
 0x168   : > { %v1467_v16 = vadd.f32 %v1372_v40, %v5358_v61  ;;  %v5538_v49 = vadd.f32 %v4060_v15, %v1466_v63 }
 0x169   : > { %v4026_v58 = vpop.f32.mrf.mxu1  ;;  %v1717_v33 = vpop.f32.mrf.mxu0 }
 0x16a   : > { %v1470_v62 = vadd.f32 %v4026_v58, %v5361_v55  ;;  %v5541_v45 = vadd.f32 %v1717_v33, %v1464_v22 }
 0x16b   : > { %v1375_v1 = vpop.f32.mrf.mxu1  ;;  %v4063_v0 = vpop.f32.mrf.mxu0 }
 0x16c   : > { %v1468_v27 = vadd.f32 %v1375_v1, %v5367_v11  ;;  %v5544_v23 = vadd.f32 %v4063_v0, %v1469_v19 }
 0x16d   : > { %v4029_v17 = vpop.f32.mrf.mxu1  ;;  %v1730_v44 = vpop.f32.mrf.mxu0 }
 0x16e   : > { %v1473_v60 = vadd.f32 %v4029_v17, %v5376_v43  ;;  %v5547_v47 = vadd.f32 %v1730_v44, %v1467_v16 }
 0x16f   : > { %v1388_v61 = vpop.f32.mrf.mxu1  ;;  %v4064_v26 = vpop.f32.mrf.mxu0 }
 0x170   : > { %v1471_v29 = vadd.f32 %v1388_v61, %v5383_v57  ;;  %v5550_v39 = vadd.f32 %v4064_v26, %v1470_v62 }
 0x171   : > { %v4030_v55 = vpop.f32.mrf.mxu1  ;;  %v1733_v5 = vpop.f32.mrf.mxu0 }
 0x172   : > { %v1474_v36 = vadd.f32 %v4030_v55, %v5387_v4  ;;  %v5553_v6 = vadd.f32 %v1733_v5, %v1468_v27 }
 0x173   : > { %v1391_v11 = vpop.f32.mrf.mxu1  ;;  %v4067_v50 = vpop.f32.mrf.mxu0 }
 0x174   : > { %v1472_v37 = vadd.f32 %v1391_v11, %v5394_v20  ;;  %v5556_v63 = vadd.f32 %v4067_v50, %v1473_v60 }
 0x175   : > { %v4033_v43 = vpop.f32.mrf.mxu1  ;;  %v1746_v10 = vpop.f32.mrf.mxu0 }
 0x176   : > { %v1477_v34 = vadd.f32 %v4033_v43, %v5402_v25  ;;  %v5559_v22 = vadd.f32 %v1746_v10, %v1471_v29 }
 0x177   : > { %v1404_v57 = vpop.f32.mrf.mxu1  ;;  %v4068_v8 = vpop.f32.mrf.mxu0 }
 0x178   : > { %v1475_v21 = vadd.f32 %v1404_v57, %v5409_v32  ;;  %v5562_v19 = vadd.f32 %v4068_v8, %v1474_v36 }
 0x179   : > { %v4034_v4 = vpop.f32.mrf.mxu1  ;;  %v1749_v40 = vpop.f32.mrf.mxu0 }
 0x17a   : > { %v1478_v15 = vadd.f32 %v4034_v4, %v5413_v35  ;;  %v5565_v16 = vadd.f32 %v1749_v40, %v1472_v37 }
 0x17b   : > { %v1407_v20 = vpop.f32.mrf.mxu1  ;;  %v4071_v58 = vpop.f32.mrf.mxu0 }
 0x17c   : > { %v1476_v33 = vadd.f32 %v1407_v20, %v5419_v54  ;;  %v5568_v62 = vadd.f32 %v4071_v58, %v1477_v34 }
 0x17d   : > { %v4037_v25 = vpop.f32.mrf.mxu1  ;;  %v1762_v1 = vpop.f32.mrf.mxu0 }
 0x17e   : > { %v1481_v0 = vadd.f32 %v4037_v25, %v5428_v24  ;;  %v5571_v27 = vadd.f32 %v1762_v1, %v1475_v21 }
 0x17f   : > { %v1420_v32 = vpop.f32.mrf.mxu1  ;;  %v4072_v17 = vpop.f32.mrf.mxu0 }
 0x180   : > { %v1479_v44 = vadd.f32 %v1420_v32, %v5435_v46  ;;  %v5574_v60 = vadd.f32 %v4072_v17, %v1478_v15 }
 0x181   : > { %v4038_v35 = vpop.f32.mrf.mxu1  ;;  %v1765_v61 = vpop.f32.mrf.mxu0 }
 0x182   : > { %v1482_v26 = vadd.f32 %v4038_v35, %v5441_v12  ;;  %v5577_v29 = vadd.f32 %v1765_v61, %v1476_v33 }
 0x183   : > { %v1423_v54 = vpop.f32.mrf.mxu1  ;;  %v4075_v55 = vpop.f32.mrf.mxu0 }
 0x184   : > { %v1480_v5 = vadd.f32 %v1423_v54, %v5450_v53  ;;  %v5580_v36 = vadd.f32 %v4075_v55, %v1481_v0 }
 0x185   : > { %v4041_v24 = vpop.f32.mrf.mxu1  ;;  %v1778_v11 = vpop.f32.mrf.mxu0 }
 0x186   : > { %v1485_v50 = vadd.f32 %v4041_v24, %v5456_v13  ;;  %v5583_v37 = vadd.f32 %v1778_v11, %v1479_v44 }
 0x187   : > { %v1436_v46 = vpop.f32.mrf.mxu1  ;;  %v4076_v43 = vpop.f32.mrf.mxu0 }
 0x188   : > { %v1483_v10 = vadd.f32 %v1436_v46, %v5465_v52  ;;  %v5586_v34 = vadd.f32 %v4076_v43, %v1482_v26 }
 0x189   : > { %v4042_v12 = vpop.f32.mrf.mxu1  ;;  %v1781_v57 = vpop.f32.mrf.mxu0 }
 0x18a   : > { %v1486_v8 = vadd.f32 %v4042_v12, %v5471_v7  ;;  %v5589_v21 = vadd.f32 %v1781_v57, %v1480_v5 }
 0x18b   : > { %v1439_v53 = vpop.f32.mrf.mxu1  ;;  %v4079_v4 = vpop.f32.mrf.mxu0 }
 0x18c   : > { %v1484_v40 = vadd.f32 %v1439_v53, %v5477_v51  ;;  %v5592_v15 = vadd.f32 %v4079_v4, %v1485_v50 }
 0x18d   : > { %v4085_v13 = vpop.f32.mrf.mxu1  ;;  %v1794_v20 = vpop.f32.mrf.mxu0 }
 0x18e   : > { %v2121_v58 = vadd.f32 %v4085_v13, %v5482_v9  ;;  %v5595_v33 = vadd.f32 %v1794_v20, %v1483_v10 }
 0x18f   : > { %v1976_v52 = vpop.f32.mrf.mxu1  ;;  %v4080_v25 = vpop.f32.mrf.mxu0 }
 0x190   : > { %v2119_v1 = vadd.f32 %v1976_v52, %v5489_v42  ;;  %v5598_v0 = vadd.f32 %v4080_v25, %v1486_v8 }
 0x191   : > { %v4086_v7 = vpop.f32.mrf.mxu1  ;;  %v1797_v32 = vpop.f32.mrf.mxu0 }
 0x192   : > { %v2122_v17 = vadd.f32 %v4086_v7, %v5493_v41  ;;  %v5601_v44 = vadd.f32 %v1797_v32, %v1484_v40 }
 0x193   : > { %v1979_v51 = vpop.f32.mrf.mxu1  ;;  %v4123_v35 = vpop.f32.mrf.mxu0 }
 0x194   : > { %v2120_v61 = vadd.f32 %v1979_v51, %v5498_v28  ;;  %v5604_v26 = vadd.f32 %v4123_v35, %v2121_v58 }
 0x195   : > { %v4089_v9 = vpop.f32.mrf.mxu1  ;;  %v2208_v54 = vpop.f32.mrf.mxu0 }
 0x196   : > { %v2125_v55 = vadd.f32 %v4089_v9, %v5503_v31  ;;  %v5607_v5 = vadd.f32 %v2208_v54, %v2119_v1 }
 0x197   : > { %v1992_v42 = vpop.f32.mrf.mxu1  ;;  %v4124_v24 = vpop.f32.mrf.mxu0 }
 0x198   : > { %v2123_v11 = vadd.f32 %v1992_v42, %v5509_v38  ;;  %v5610_v50 = vadd.f32 %v4124_v24, %v2122_v17 }
 0x199   : > { %v4090_v41 = vpop.f32.mrf.mxu1  ;;  %v2211_v46 = vpop.f32.mrf.mxu0 }
 0x19a   : > { %v2126_v43 = vadd.f32 %v4090_v41, %v5512_v3  ;;  %v5613_v10 = vadd.f32 %v2211_v46, %v2120_v61 }
 0x19b   : > { %v1995_v28 = vpop.f32.mrf.mxu1  ;;  %v4127_v12 = vpop.f32.mrf.mxu0 }
 0x19c   : > { %v2124_v57 = vadd.f32 %v1995_v28, %v5516_v30  ;;  %v5616_v8 = vadd.f32 %v4127_v12, %v2125_v55 }
 0x19d   : > { %v4093_v31 = vpop.f32.mrf.mxu1  ;;  %v2224_v53 = vpop.f32.mrf.mxu0 }
 0x19e   : > { %v2129_v4 = vadd.f32 %v4093_v31, %v5520_v18  ;;  %v5619_v40 = vadd.f32 %v2224_v53, %v2123_v11 }
 0x19f   : > { %v2008_v38 = vpop.f32.mrf.mxu1  ;;  %v4128_v13 = vpop.f32.mrf.mxu0 }
 0x1a0   : > { %v2127_v20 = vadd.f32 %v2008_v38, %v5523_v56  ;;  %v5622_v3 = vadd.f32 %v4128_v13, %v2126_v43 }
 0x1a1   : > { %v4094_v58 = vpop.f32.mrf.mxu1  ;;  %v2227_v52 = vpop.f32.mrf.mxu0 }
 0x1a2   : > { %v2130_v30 = vadd.f32 %v4094_v58, %v5526_v59  ;;  %v5625_v25 = vadd.f32 %v2227_v52, %v2124_v57 }
 0x1a3   : > { %v2011_v1 = vpop.f32.mrf.mxu1  ;;  %v4131_v7 = vpop.f32.mrf.mxu0 }
 0x1a4   : > { %v2128_v18 = vadd.f32 %v2011_v1, %v5529_v2  ;;  %v5628_v32 = vadd.f32 %v4131_v7, %v2129_v4 }
 0x1a5   : > { %v4097_v17 = vpop.f32.mrf.mxu1  ;;  %v2240_v51 = vpop.f32.mrf.mxu0 }
 0x1a6   : > { %v2133_v56 = vadd.f32 %v4097_v17, %v5532_v48  ;;  %v5631_v35 = vadd.f32 %v2240_v51, %v2127_v20  ;;  %v4338_v48 = vmov 0.0  }
 0x1a7   : > { %v2024_v61 = vpop.f32.mrf.mxu1  ;;  %v4132_v9 = vpop.f32.mrf.mxu0  ;;  %3311 = vst [vmem:[%s5637_s30] sm:$0x1] %v4338_v48  ;;  %3312 = vst [vmem:[%s5643_s7] sm:$0x1] %v4338_v48 }
 0x1a8   : > { %v2131_v59 = vadd.f32 %v2024_v61, %v5535_v14  ;;  %v5646_v2 = vadd.f32 %v4132_v9, %v2130_v30 }
 0x1a9   : > { %v4098_v54 = vpop.f32.mrf.mxu1  ;;  %v2243_v55 = vpop.f32.mrf.mxu0 }
 0x1aa   : > { %v2134_v42 = vadd.f32 %v4098_v54, %v5538_v49  ;;  %v5651_v24 = vadd.f32 %v2243_v55, %v2128_v18 }
 0x1ab   : > { %v2027_v11 = vpop.f32.mrf.mxu1  ;;  %v4135_v41 = vpop.f32.mrf.mxu0 }
 0x1ac   : > { %v2132_v46 = vadd.f32 %v2027_v11, %v5541_v45  ;;  %v5654_v43 = vadd.f32 %v4135_v41, %v2133_v56  ;;  %v5680_v41 = vpop.permute.xlu0 %3093 }
 0x1ad   : > { %v4101_v28 = vpop.f32.mrf.mxu1  ;;  %v2256_v12 = vpop.f32.mrf.mxu0 }
 0x1ae   : > { %v2137_v14 = vadd.f32 %v4101_v28, %v5544_v23  ;;  %v5657_v57 = vadd.f32 %v2256_v12, %v2131_v59 }
 0x1af   : > { %v2040_v31 = vpop.f32.mrf.mxu1  ;;  %v4136_v53 = vpop.f32.mrf.mxu0 }
 0x1b0   : > { %v2135_v4 = vadd.f32 %v2040_v31, %v5547_v47  ;;  %v5660_v38 = vadd.f32 %v4136_v53, %v2134_v42 }
 0x1b1   : > { %v4102_v49 = vpop.f32.mrf.mxu1  ;;  %v2259_v13 = vpop.f32.mrf.mxu0 }
 0x1b2   : > { %v2138_v20 = vadd.f32 %v4102_v49, %v5550_v39  ;;  %v5663_v58 = vadd.f32 %v2259_v13, %v2132_v46 }
 0x1b3   : > { %v2043_v45 = vpop.f32.mrf.mxu1  ;;  %v4139_v52 = vpop.f32.mrf.mxu0 }
 0x1b4   : > { %v2136_v30 = vadd.f32 %v2043_v45, %v5553_v6  ;;  %v5666_v1 = vadd.f32 %v4139_v52, %v2137_v14  ;;  %v5685_v14 = vpop.permute.xlu1 %3103  ;;  %v5693_v45 = vpop.permute.xlu0 %3098 }
 0x1b5   : > { %v4105_v23 = vpop.f32.mrf.mxu1  ;;  %v2272_v7 = vpop.f32.mrf.mxu0 }
 0x1b6   : > { %v2141_v18 = vadd.f32 %v4105_v23, %v5556_v63  ;;  %v5669_v17 = vadd.f32 %v2272_v7, %v2135_v4 }
 0x1b7   : > { %v2056_v47 = vpop.f32.mrf.mxu1  ;;  %v4140_v51 = vpop.f32.mrf.mxu0 }
 0x1b8   : > { %v2139_v56 = vadd.f32 %v2056_v47, %v5559_v22  ;;  %v5672_v61 = vadd.f32 %v4140_v51, %v2138_v20  ;;  %v5698_v7 = vpop.permute.xlu1 %3108 }
 0x1b9   : > { %v4106_v39 = vpop.f32.mrf.mxu1  ;;  %v2275_v9 = vpop.f32.mrf.mxu0 }
 0x1ba   : > { %v2142_v59 = vadd.f32 %v4106_v39, %v5562_v19  ;;  %v5675_v48 = vadd.f32 %v2275_v9, %v2136_v30 }
 0x1bb   : > { %v2059_v6 = vpop.f32.mrf.mxu1  ;;  %v4143_v54 = vpop.f32.mrf.mxu0 }
 0x1bc   : > { %v2140_v55 = vadd.f32 %v2059_v6, %v5565_v16  ;;  %v5678_v42 = vadd.f32 %v4143_v54, %v2141_v18 }
 0x1bd   : > { %v4109_v63 = vpop.f32.mrf.mxu1  ;;  %v2288_v11 = vpop.f32.mrf.mxu0 }
 0x1be   : > { %v2145_v22 = vadd.f32 %v4109_v63, %v5568_v62  ;;  %v5683_v46 = vadd.f32 %v2288_v11, %v2139_v56  ;;  %v5711_v63 = vpop.permute.xlu1 %3118 }
 0x1bf   : > { %v2072_v28 = vpop.f32.mrf.mxu1  ;;  %v4144_v12 = vpop.f32.mrf.mxu0 }
 0x1c0   : > { %v2143_v19 = vadd.f32 %v2072_v28, %v5571_v27  ;;  %v5688_v31 = vadd.f32 %v4144_v12, %v2142_v59  ;;  %v5706_v59 = vpop.permute.xlu0 %3113 }
 0x1c1   : > { %v4110_v53 = vpop.f32.mrf.mxu1  ;;  %v2291_v16 = vpop.f32.mrf.mxu0 }
 0x1c2   : > { %v2146_v4 = vadd.f32 %v4110_v53, %v5574_v60  ;;  %v5691_v49 = vadd.f32 %v2291_v16, %v2140_v55 }
 0x1c3   : > { %v2075_v13 = vpop.f32.mrf.mxu1  ;;  %v4147_v20 = vpop.f32.mrf.mxu0 }
 0x1c4   : > { %v2144_v62 = vadd.f32 %v2075_v13, %v5577_v29  ;;  %v5696_v52 = vadd.f32 %v4147_v20, %v2145_v22  ;;  %v5719_v16 = vpop.permute.xlu0 %3123 }
 0x1c5   : > { %v4113_v30 = vpop.f32.mrf.mxu1  ;;  %v2304_v23 = vpop.f32.mrf.mxu0 }
 0x1c6   : > { %v2149_v27 = vadd.f32 %v4113_v30, %v5580_v36  ;;  %v5701_v18 = vadd.f32 %v2304_v23, %v2143_v19 }
 0x1c7   : > { %v2088_v47 = vpop.f32.mrf.mxu1  ;;  %v4148_v60 = vpop.f32.mrf.mxu0 }
 0x1c8   : > { %v2147_v51 = vadd.f32 %v2088_v47, %v5583_v37  ;;  %v5704_v56 = vadd.f32 %v4148_v60, %v2146_v4 }
 0x1c9   : > { %v4114_v39 = vpop.f32.mrf.mxu1  ;;  %v2307_v9 = vpop.f32.mrf.mxu0 }
 0x1ca   : > { %v2150_v29 = vadd.f32 %v4114_v39, %v5586_v34  ;;  %v5709_v6 = vadd.f32 %v2307_v9, %v2144_v62  ;;  %v5724_v62 = vpop.permute.xlu1 %3128  ;;  %v5732_v39 = vpop.permute.xlu0 %3133 }
 0x1cb   : > { %v2091_v54 = vpop.f32.mrf.mxu1  ;;  %v4151_v55 = vpop.f32.mrf.mxu0 }
 0x1cc   : > { %v2148_v36 = vadd.f32 %v2091_v54, %v5589_v21  ;;  %v5714_v11 = vadd.f32 %v4151_v55, %v2149_v27 }
 0x1cd   : > { %v4117_v22 = vpop.f32.mrf.mxu1  ;;  %v2320_v37 = vpop.f32.mrf.mxu0 }
 0x1ce   : > { %v2153_v28 = vadd.f32 %v4117_v22, %v5592_v15  ;;  %v5717_v12 = vadd.f32 %v2320_v37, %v2147_v51  ;;  %v5736_v54 = vpop.permute.xlu1 %3138 }
 0x1cf   : > { %v2104_v19 = vpop.f32.mrf.mxu1  ;;  %v4152_v53 = vpop.f32.mrf.mxu0 }
 0x1d0   : > { %v2151_v34 = vadd.f32 %v2104_v19, %v5595_v33  ;;  %v5722_v4 = vadd.f32 %v4152_v53, %v2150_v29 }
 0x1d1   : > { %v4118_v13 = vpop.f32.mrf.mxu1  ;;  %v2323_v20 = vpop.f32.mrf.mxu0 }
 0x1d2   : > { %5957 = vst [vmem:[#allocation4_spill] sm:$0xff] %v5722_v4  ;;  %v2154_v21 = vadd.f32 %v4118_v13, %v5598_v0  ;;  %v5727_v30 = vadd.f32 %v2323_v20, %v2148_v36  ;;  %v5746_v20 = vpop.permute.xlu1 %3148 }
 0x1d3   : > { %v2107_v23 = vpop.f32.mrf.mxu1  ;;  %v4155_v15 = vpop.f32.mrf.mxu0 }
 0x1d4   : > { %5958 = vst [vmem:[#allocation10_spill] sm:$0xff] %v5727_v30  ;;  %v2152_v27 = vadd.f32 %v2107_v23, %v5601_v44  ;;  %v5730_v47 = vadd.f32 %v4155_v15, %v2153_v28  ;;  %v5742_v28 = vpop.permute.xlu0 %3143 }
 0x1d5   : > { %v4161_v60 = vpop.f32.mrf.mxu1  ;;  %v2336_v51 = vpop.f32.mrf.mxu0 }
 0x1d6   : > { %5959 = vst [vmem:[#allocation11_spill] sm:$0xff] %v5730_v47  ;;  %v5734_v33 = vadd.f32 %v2336_v51, %v2151_v34  ;;  %v2711_v53 = vadd.f32 %v4161_v60, %v5604_v26 }
 0x1d7   : > { %v2566_v9 = vpop.f32.mrf.mxu1  ;;  %v4156_v29 = vpop.f32.mrf.mxu0 }
 0x1d8   : > { %5960 = vst [vmem:[#allocation9_spill] sm:$0xff] %v5734_v33  ;;  %v5738_v55 = vadd.f32 %v4156_v29, %v2154_v21  ;;  %v2709_v19 = vadd.f32 %v2566_v9, %v5607_v5  ;;  %v5750_v47 = vpop.permute.xlu0 %3153 }
 0x1d9   : > { %v4162_v0 = vpop.f32.mrf.mxu1  ;;  %v2339_v36 = vpop.f32.mrf.mxu0 }
 0x1da   : > { %5961 = vst [vmem:[#allocation13_spill] sm:$0xff] %v5738_v55  ;;  %v5740_v22 = vadd.f32 %v2339_v36, %v2152_v27  ;;  %v2712_v21 = vadd.f32 %v4162_v0, %v5610_v50 }
 0x1db   : > { %v2569_v37 = vpop.f32.mrf.mxu1  ;;  %v4199_v44 = vpop.f32.mrf.mxu0 }
 0x1dc   : > { %5962 = vst [vmem:[#allocation15_spill] sm:$0xff] %v5740_v22  ;;  %v3021_v15 = vadd.f32 %v4199_v44, %v2711_v53  ;;  %v2710_v27 = vadd.f32 %v2569_v37, %v5613_v10 }
 0x1dd   : > { %v4165_v34 = vpop.f32.mrf.mxu1  ;;  %v2876_v13 = vpop.f32.mrf.mxu0 }
 0x1de   : > { %v3019_v23 = vadd.f32 %v2876_v13, %v2709_v19  ;;  %v3273_v60 = vmul.f32 %v5685_v14, %v3021_v15  ;;  %v5754_v19 = vpop.permute.xlu1 %3158  ;;  %v2715_v0 = vadd.f32 %v4165_v34, %v5616_v8 }
 0x1df   : > { %v2582_v51 = vpop.f32.mrf.mxu1  ;;  %v4200_v29 = vpop.f32.mrf.mxu0 }
 0x1e0   : > { %v3022_v22 = vadd.f32 %v4200_v29, %v2712_v21  ;;  %v3271_v5 = vmul.f32 %v5680_v41, %v3019_v23  ;;  %v2713_v10 = vadd.f32 %v2582_v51, %v5619_v40 }
 0x1e1   : > { %v4166_v36 = vpop.f32.mrf.mxu1  ;;  %v2879_v55 = vpop.f32.mrf.mxu0 }
 0x1e2   : > { %v3020_v26 = vadd.f32 %v2879_v55, %v2710_v27  ;;  %v3274_v37 = vmul.f32 %v5698_v7, %v3022_v22  ;;  %v3358_v13 = vmul.f32 %v3271_v5, %v3271_v5  ;;  %v3360_v55 = vmul.f32 %v3273_v60, %v3273_v60  ;;  %v5760_v27 = vpop.permute.xlu0 %3163 }
 0x1e3   : > { %v2585_v9 = vpop.f32.mrf.mxu1  ;;  %v4203_v33 = vpop.f32.mrf.mxu0 }
 0x1e4   : > { %v3272_v50 = vmul.f32 %v5693_v45, %v3020_v26  ;;  %v3025_v23 = vadd.f32 %v4203_v33, %v2715_v0  ;;  %v2716_v45 = vadd.f32 %v4166_v36, %v5622_v3  ;;  %v2714_v8 = vadd.f32 %v2585_v9, %v5625_v25 }
 0x1e5   : > { %v4169_v44 = vpop.f32.mrf.mxu1  ;;  %v2892_v53 = vpop.f32.mrf.mxu0  ;;  %v3361_v51 = vmul.f32 %v3274_v37, %v3274_v37 }
 0x1e6   : > { %v3314_v21 = vadd.f32 %v3272_v50, %v3271_v5  ;;  %v3359_v41 = vmul.f32 %v3272_v50, %v3272_v50  ;;  %v3023_v15 = vadd.f32 %v2892_v53, %v2713_v10  ;;  %v5765_v5 = vpop.permute.xlu1 %3168  ;;  %v3277_v53 = vmul.f32 %v5719_v16, %v3025_v23 }
 0x1e7   : > { %v2598_v14 = vpop.f32.mrf.mxu1  ;;  %v4204_v29 = vpop.f32.mrf.mxu0  ;;  %v2719_v9 = vadd.f32 %v4169_v44, %v5628_v32 }
 0x1e8   : > { %v3315_v34 = vadd.f32 %v3314_v21, %v3273_v60  ;;  %v3394_v40 = vadd.f32 %v3359_v41, %v3358_v13  ;;  %v3275_v7 = vmul.f32 %v5706_v59, %v3023_v15  ;;  %v3026_v0 = vadd.f32 %v4204_v29, %v2716_v45  ;;  %v5771_v41 = vpop.permute.xlu0 %3173 }
 0x1e9   : > { %v4170_v22 = vpop.f32.mrf.mxu1  ;;  %v2895_v26 = vpop.f32.mrf.mxu0  ;;  %v2717_v59 = vadd.f32 %v2598_v14, %v5631_v35 }
 0x1ea   : > { %v3395_v50 = vadd.f32 %v3394_v40, %v3360_v55  ;;  %v3316_v33 = vadd.f32 %v3315_v34, %v3274_v37  ;;  %v3024_v10 = vadd.f32 %v2895_v26, %v2714_v8  ;;  %v3362_v36 = vmul.f32 %v3275_v7, %v3275_v7  ;;  %v5774_v34 = vpop.permute.xlu1 %3178 }
 0x1eb   : > { %v2601_v4 = vpop.f32.mrf.mxu1  ;;  %v4207_v30 = vpop.f32.mrf.mxu0  ;;  %v3278_v55 = vmul.f32 %v5724_v62, %v3026_v0  ;;  %v2720_v35 = vadd.f32 %v4170_v22, %v5646_v2 }
 0x1ec   : > { %v3317_v3 = vadd.f32 %v3316_v33, %v3275_v7  ;;  %v3396_v25 = vadd.f32 %v3395_v50, %v3361_v51  ;;  %v3276_v60 = vmul.f32 %v5711_v63, %v3024_v10  ;;  %v3029_v23 = vadd.f32 %v4207_v30, %v2719_v9 }
 0x1ed   : > { %v4173_v13 = vpop.f32.mrf.mxu1  ;;  %v2908_v21 = vpop.f32.mrf.mxu0  ;;  %v3364_v63 = vmul.f32 %v3277_v53, %v3277_v53  ;;  %v2718_v44 = vadd.f32 %v2601_v4, %v5651_v24  ;;  %v3365_v62 = vmul.f32 %v3278_v55, %v3278_v55 }
 0x1ee   : > { %v3397_v37 = vadd.f32 %v3396_v25, %v3362_v36  ;;  %v3318_v15 = vadd.f32 %v3317_v3, %v3276_v60  ;;  %v3363_v16 = vmul.f32 %v3276_v60, %v3276_v60  ;;  %v3027_v45 = vadd.f32 %v2908_v21, %v2717_v59  ;;  %v5780_v36 = vpop.permute.xlu0 %3183  ;;  %v5784_v60 = vpop.permute.xlu1 %3188 }
 0x1ef   : > { %v2614_v29 = vpop.f32.mrf.mxu1  ;;  %v4208_v8 = vpop.f32.mrf.mxu0  ;;  %v3281_v30 = vmul.f32 %v5742_v28, %v3029_v23  ;;  %v2723_v9 = vadd.f32 %v4173_v13, %v5654_v43 }
 0x1f0   : > { %v3319_v40 = vadd.f32 %v3318_v15, %v3277_v53  ;;  %v3398_v32 = vadd.f32 %v3397_v37, %v3363_v16  ;;  %v3279_v14 = vmul.f32 %v5732_v39, %v3027_v45  ;;  %v3030_v33 = vadd.f32 %v4208_v8, %v2720_v35 }
 0x1f1   : > { %v4174_v51 = vpop.f32.mrf.mxu1  ;;  %v2911_v7 = vpop.f32.mrf.mxu0  ;;  %v2721_v53 = vadd.f32 %v2614_v29, %v5657_v57  ;;  %v3368_v57 = vmul.f32 %v3281_v30, %v3281_v30 }
 0x1f2   : > { %v3399_v26 = vadd.f32 %v3398_v32, %v3364_v63  ;;  %v3320_v50 = vadd.f32 %v3319_v40, %v3278_v55  ;;  %v3028_v10 = vadd.f32 %v2911_v7, %v2718_v44  ;;  %v3366_v22 = vmul.f32 %v3279_v14, %v3279_v14  ;;  %v5791_v13 = vpop.permute.xlu0 %3193 }
 0x1f3   : > { %v2617_v0 = vpop.f32.mrf.mxu1  ;;  %v4211_v3 = vpop.f32.mrf.mxu0  ;;  %v3282_v21 = vmul.f32 %v5746_v20, %v3030_v33 }
 0x1f4   : > { %v3321_v2 = vadd.f32 %v3320_v50, %v3279_v14  ;;  %v3400_v24 = vadd.f32 %v3399_v26, %v3365_v62  ;;  %v3280_v4 = vmul.f32 %v5736_v54, %v3028_v10  ;;  %v2722_v23 = vadd.f32 %v2617_v0, %v5663_v58  ;;  %v5793_v26 = vpop.permute.xlu1 %3198 }
 0x1f5   : > { %v4177_v39 = vpop.f32.mrf.mxu1  ;;  %v2924_v25 = vpop.f32.mrf.mxu0  ;;  %v3033_v29 = vadd.f32 %v4211_v3, %v2723_v9  ;;  %v2724_v54 = vadd.f32 %v4174_v51, %v5660_v38  ;;  %v3369_v20 = vmul.f32 %v3282_v21, %v3282_v21 }
 0x1f6   : > { %v3401_v28 = vadd.f32 %v3400_v24, %v3366_v22  ;;  %v3031_v59 = vadd.f32 %v2924_v25, %v2721_v53  ;;  %v3322_v37 = vadd.f32 %v3321_v2, %v3280_v4  ;;  %v3367_v55 = vmul.f32 %v3280_v4, %v3280_v4 }
 0x1f7   : > { %v2630_v15 = vpop.f32.mrf.mxu1  ;;  %v4212_v16 = vpop.f32.mrf.mxu0  ;;  %v3285_v58 = vmul.f32 %v5760_v27, %v3033_v29  ;;  %v2727_v10 = vadd.f32 %v4177_v39, %v5666_v1 }
 0x1f8   : > { %v3323_v45 = vadd.f32 %v3322_v37, %v3281_v30  ;;  %v3402_v8 = vadd.f32 %v3401_v28, %v3367_v55  ;;  %v3283_v63 = vmul.f32 %v5750_v47, %v3031_v59  ;;  %v3034_v14 = vadd.f32 %v4212_v16, %v2724_v54  ;;  %v3204_v27 = vpop.permute.xlu0 %3203  ;;  %v3209_v55 = vpop.permute.xlu1 %3208 }
 0x1f9   : > { %v4178_v40 = vpop.f32.mrf.mxu1  ;;  %v2927_v43 = vpop.f32.mrf.mxu0  ;;  %v2725_v38 = vadd.f32 %v2630_v15, %v5669_v17  ;;  %v3372_v9 = vmul.f32 %v3285_v58, %v3285_v58 }
 0x1fa   : > { %v3032_v32 = vadd.f32 %v2927_v43, %v2722_v23  ;;  %v3403_v35 = vadd.f32 %v3402_v8, %v3368_v57  ;;  %v3324_v44 = vadd.f32 %v3323_v45, %v3282_v21  ;;  %v3370_v50 = vmul.f32 %v3283_v63, %v3283_v63 }
 0x1fb   : > { %v2633_v7 = vpop.f32.mrf.mxu1  ;;  %v4215_v62 = vpop.f32.mrf.mxu0  ;;  %v3286_v22 = vmul.f32 %v5765_v5, %v3034_v14  ;;  %v2728_v28 = vadd.f32 %v4178_v40, %v5672_v61 }
 0x1fc   : > { %v3284_v51 = vmul.f32 %v5754_v19, %v3032_v32  ;;  %v3325_v47 = vadd.f32 %v3324_v44, %v3283_v63  ;;  %v3404_v30 = vadd.f32 %v3403_v35, %v3369_v20  ;;  %v2726_v17 = vadd.f32 %v2633_v7, %v5675_v48  ;;  %v3214_v32 = vpop.permute.xlu0 %3213 }
 0x1fd   : > { %v4181_v33 = vpop.f32.mrf.mxu1  ;;  %v2940_v0 = vpop.f32.mrf.mxu0  ;;  %v3037_v19 = vadd.f32 %v4215_v62, %v2727_v10  ;;  %v3373_v16 = vmul.f32 %v3286_v22, %v3286_v22 }
 0x1fe   : > { %v3371_v3 = vmul.f32 %v3284_v51, %v3284_v51  ;;  %v3035_v53 = vadd.f32 %v2940_v0, %v2725_v38  ;;  %v3405_v2 = vadd.f32 %v3404_v30, %v3370_v50  ;;  %v3326_v24 = vadd.f32 %v3325_v47, %v3284_v51  ;;  %v3219_v38 = vpop.permute.xlu1 %3218 }
 0x1ff   : > { %v2646_v4 = vpop.f32.mrf.mxu1  ;;  %v4216_v25 = vpop.f32.mrf.mxu0  ;;  %v3289_v45 = vmul.f32 %v5780_v36, %v3037_v19  ;;  %v2731_v20 = vadd.f32 %v4181_v33, %v5678_v42 }
 0x200   : > { %v3327_v59 = vadd.f32 %v3326_v24, %v3285_v58  ;;  %v3406_v21 = vadd.f32 %v3405_v2, %v3371_v3  ;;  %v3287_v37 = vmul.f32 %v5771_v41, %v3035_v53  ;;  %v3038_v23 = vadd.f32 %v4216_v25, %v2728_v28 }
 0x201   : > { %v4182_v1 = vpop.f32.mrf.mxu1  ;;  %v2943_v39 = vpop.f32.mrf.mxu0  ;;  %v2729_v48 = vadd.f32 %v2646_v4, %v5683_v46  ;;  %v3376_v46 = vmul.f32 %v3289_v45, %v3289_v45 }
 0x202   : > { %v3036_v15 = vadd.f32 %v2943_v39, %v2726_v17  ;;  %v3407_v5 = vadd.f32 %v3406_v21, %v3372_v9  ;;  %v3328_v57 = vadd.f32 %v3327_v59, %v3286_v22  ;;  %v3374_v63 = vmul.f32 %v3287_v37, %v3287_v37  ;;  %v3224_v4 = vpop.permute.xlu0 %3223  ;;  %v3229_v59 = vpop.permute.xlu1 %3228 }
 0x203   : > { %v2649_v29 = vpop.f32.mrf.mxu1  ;;  %v4219_v54 = vpop.f32.mrf.mxu0  ;;  %v3290_v7 = vmul.f32 %v5784_v60, %v3038_v23  ;;  %v2732_v47 = vadd.f32 %v4182_v1, %v5688_v31 }
 0x204   : > { %v3288_v61 = vmul.f32 %v5774_v34, %v3036_v15  ;;  %v3329_v8 = vadd.f32 %v3328_v57, %v3287_v37  ;;  %v3408_v40 = vadd.f32 %v3407_v5, %v3373_v16  ;;  %v2730_v34 = vadd.f32 %v2649_v29, %v5691_v49 }
 0x205   : > { %v4185_v41 = vpop.f32.mrf.mxu1  ;;  %v2956_v43 = vpop.f32.mrf.mxu0  ;;  %v3041_v51 = vadd.f32 %v4219_v54, %v2731_v20  ;;  %v3377_v3 = vmul.f32 %v3290_v7, %v3290_v7 }
 0x206   : > { %v3375_v35 = vmul.f32 %v3288_v61, %v3288_v61  ;;  %v3039_v44 = vadd.f32 %v2956_v43, %v2729_v48  ;;  %v3409_v14 = vadd.f32 %v3408_v40, %v3374_v63  ;;  %v3330_v62 = vadd.f32 %v3329_v8, %v3288_v61  ;;  %v3234_v8 = vpop.permute.xlu0 %3233 }
 0x207   : > { %v2662_v58 = vpop.f32.mrf.mxu1  ;;  %v4220_v36 = vpop.f32.mrf.mxu0  ;;  %v3293_v25 = vmul.f32 %v3204_v27, %v3041_v51  ;;  %v2735_v21 = vadd.f32 %v4185_v41, %v5696_v52 }
 0x208   : > { %v3331_v50 = vadd.f32 %v3330_v62, %v3289_v45  ;;  %v3410_v30 = vadd.f32 %v3409_v14, %v3375_v35  ;;  %v3291_v0 = vmul.f32 %v5791_v13, %v3039_v44  ;;  %v3042_v2 = vadd.f32 %v4220_v36, %v2732_v47  ;;  %v3239_v35 = vpop.permute.xlu1 %3238 }
 0x209   : > { %v4186_v42 = vpop.f32.mrf.mxu1  ;;  %v2959_v33 = vpop.f32.mrf.mxu0  ;;  %v2733_v49 = vadd.f32 %v2662_v58, %v5701_v18  ;;  %v3380_v27 = vmul.f32 %v3293_v25, %v3293_v25 }
 0x20a   : > { %v3040_v10 = vadd.f32 %v2959_v33, %v2730_v34  ;;  %v3411_v53 = vadd.f32 %v3410_v30, %v3376_v46  ;;  %v3332_v60 = vadd.f32 %v3331_v50, %v3290_v7  ;;  %v3378_v17 = vmul.f32 %v3291_v0, %v3291_v0 }
 0x20b   : > { %v2665_v22 = vpop.f32.mrf.mxu1  ;;  %v4223_v24 = vpop.f32.mrf.mxu0  ;;  %v3294_v15 = vmul.f32 %v3209_v55, %v3042_v2 }
 0x20c   : > { %v3292_v9 = vmul.f32 %v5793_v26, %v3040_v10  ;;  %v3333_v31 = vadd.f32 %v3332_v60, %v3291_v0  ;;  %v3412_v19 = vadd.f32 %v3411_v53, %v3377_v3  ;;  %v2734_v18 = vadd.f32 %v2665_v22, %v5709_v6  ;;  %v5963_v10 = vld [vmem:[#allocation10_spill] sm:$0xff] }
 0x20d   : > { %v4189_v28 = vpop.f32.mrf.mxu1  ;;  %v2972_v13 = vpop.f32.mrf.mxu0  ;;  %v3045_v23 = vadd.f32 %v4223_v24, %v2735_v21  ;;  %v2736_v26 = vadd.f32 %v4186_v42, %v5704_v56  ;;  %v3381_v63 = vmul.f32 %v3294_v15, %v3294_v15 }
 0x20e   : > { %v3379_v37 = vmul.f32 %v3292_v9, %v3292_v9  ;;  %v3043_v1 = vadd.f32 %v2972_v13, %v2733_v49  ;;  %v3413_v39 = vadd.f32 %v3412_v19, %v3378_v17  ;;  %v3334_v16 = vadd.f32 %v3333_v31, %v3292_v9  ;;  %v3244_v42 = vpop.permute.xlu0 %3243  ;;  %v5965_v13 = vld [vmem:[#allocation9_spill] sm:$0xff] }
 0x20f   : > { %v2678_v5 = vpop.f32.mrf.mxu1  ;;  %v4224_v57 = vpop.f32.mrf.mxu0  ;;  %v3297_v44 = vmul.f32 %v3224_v4, %v3045_v23  ;;  %v2739_v36 = vadd.f32 %v4189_v28, %v5714_v11 }
 0x210   : > { %v3335_v29 = vadd.f32 %v3334_v16, %v3293_v25  ;;  %v3414_v54 = vadd.f32 %v3413_v39, %v3379_v37  ;;  %v3295_v45 = vmul.f32 %v3214_v32, %v3043_v1  ;;  %v3046_v55 = vadd.f32 %v4224_v57, %v2736_v26  ;;  %v3249_v11 = vpop.permute.xlu1 %3248 }
 0x211   : > { %v4190_v48 = vpop.f32.mrf.mxu1  ;;  %v2975_v61 = vpop.f32.mrf.mxu0  ;;  %v2737_v6 = vadd.f32 %v2678_v5, %v5717_v12  ;;  %v3384_v33 = vmul.f32 %v3297_v44, %v3297_v44 }
 0x212   : > { %v3044_v52 = vadd.f32 %v2975_v61, %v2734_v18  ;;  %v3415_v40 = vadd.f32 %v3414_v54, %v3380_v27  ;;  %v3336_v41 = vadd.f32 %v3335_v29, %v3294_v15  ;;  %v3382_v56 = vmul.f32 %v3295_v45, %v3295_v45  ;;  %v3254_v5 = vpop.permute.xlu0 %3253  ;;  %v5966_v18 = vld [vmem:[#allocation11_spill] sm:$0xff] }
 0x213   : > { %v2681_v43 = vpop.f32.mrf.mxu1  ;;  %v4227_v20 = vpop.f32.mrf.mxu0  ;;  %v3298_v47 = vmul.f32 %v3229_v59, %v3046_v55 }
 0x214   : > { %v3296_v14 = vmul.f32 %v3219_v38, %v3044_v52  ;;  %v3337_v7 = vadd.f32 %v3336_v41, %v3295_v45  ;;  %v3416_v62 = vadd.f32 %v3415_v40, %v3381_v63  ;;  %v2738_v3 = vadd.f32 %v2681_v43, %v5963_v10  ;;  %v5964_v38 = vld [vmem:[#allocation4_spill] sm:$0xff]  ;;  %v5968_v63 = vld [vmem:[#allocation15_spill] sm:$0xff] }
 0x215   : > { %v4193_v58 = vpop.f32.mrf.mxu1  ;;  %v2988_v32 = vpop.f32.mrf.mxu0  ;;  %v3049_v12 = vadd.f32 %v4227_v20, %v2739_v36  ;;  %v2740_v53 = vadd.f32 %v4190_v48, %v5964_v38  ;;  %v3385_v49 = vmul.f32 %v3298_v47, %v3298_v47 }
 0x216   : > { %v3383_v46 = vmul.f32 %v3296_v14, %v3296_v14  ;;  %v3047_v34 = vadd.f32 %v2988_v32, %v2737_v6  ;;  %v3417_v51 = vadd.f32 %v3416_v62, %v3382_v56  ;;  %v3338_v50 = vadd.f32 %v3337_v7, %v3296_v14  ;;  %v3259_v48 = vpop.permute.xlu1 %3258  ;;  %v3264_v62 = vpop.permute.xlu0 %3263 }
 0x217   : > { %v2694_v30 = vpop.f32.mrf.mxu1  ;;  %v4228_v0 = vpop.f32.mrf.mxu0  ;;  %v3301_v28 = vmul.f32 %v3244_v42, %v3049_v12  ;;  %v2743_v23 = vadd.f32 %v4193_v58, %v5966_v18 }
 0x218   : > { %v3339_v60 = vadd.f32 %v3338_v50, %v3297_v44  ;;  %v3418_v2 = vadd.f32 %v3417_v51, %v3383_v46  ;;  %v3299_v22 = vmul.f32 %v3234_v8, %v3047_v34  ;;  %v3050_v17 = vadd.f32 %v4228_v0, %v2740_v53  ;;  %v5967_v8 = vld [vmem:[#allocation13_spill] sm:$0xff] }
 0x219   : > { %v4194_v24 = vpop.f32.mrf.mxu1  ;;  %v2991_v4 = vpop.f32.mrf.mxu0  ;;  %v2741_v59 = vadd.f32 %v2694_v30, %v5965_v13  ;;  %v3388_v61 = vmul.f32 %v3301_v28, %v3301_v28 }
 0x21a   : > { %v3048_v25 = vadd.f32 %v2991_v4, %v2738_v3  ;;  %v3419_v9 = vadd.f32 %v3418_v2, %v3384_v33  ;;  %v3340_v31 = vadd.f32 %v3339_v60, %v3298_v47  ;;  %v3386_v1 = vmul.f32 %v3299_v22, %v3299_v22  ;;  %v3269_v51 = vpop.permute.xlu1 %3268 }
 0x21b   : > { %v4231_v19 = vpop.f32.mrf.mxu0  ;;  %v2697_v15 = vpop.f32.mrf.mxu1  ;;  %v3302_v29 = vmul.f32 %v3249_v11, %v3050_v17  ;;  %v2744_v52 = vadd.f32 %v4194_v24, %v5967_v8 }
 0x21c   : > { %v3300_v21 = vmul.f32 %v3239_v35, %v3048_v25  ;;  %v3341_v37 = vadd.f32 %v3340_v31, %v3299_v22  ;;  %v3420_v39 = vadd.f32 %v3419_v9, %v3385_v49  ;;  %v2742_v40 = vadd.f32 %v2697_v15, %v5968_v63  ;;  %v3313_v31 = vld [vmem:[%s5637_s30] sm:$0x1] }
 0x21d   : > { %v3004_v16 = vpop.f32.mrf.mxu0  ;;  %v3053_v43 = vadd.f32 %v4231_v19, %v2743_v23  ;;  %v3389_v6 = vmul.f32 %v3302_v29, %v3302_v29 }
 0x21e   : > { %v3387_v57 = vmul.f32 %v3300_v21, %v3300_v21  ;;  %v3051_v27 = vadd.f32 %v3004_v16, %v2741_v59  ;;  %v3421_v26 = vadd.f32 %v3420_v39, %v3386_v1  ;;  %v3342_v54 = vadd.f32 %v3341_v37, %v3300_v21 }
 0x21f   : > { %v4232_v45 = vpop.f32.mrf.mxu0  ;;  %v3305_v32 = vmul.f32 %v3264_v62, %v3053_v43 }
 0x220   : > { %v3343_v41 = vadd.f32 %v3342_v54, %v3301_v28  ;;  %v3422_v55 = vadd.f32 %v3421_v26, %v3387_v57  ;;  %v3303_v20 = vmul.f32 %v3254_v5, %v3051_v27  ;;  %v3054_v56 = vadd.f32 %v4232_v45, %v2744_v52  ;;  %v3357_v28 = vld [vmem:[%s5643_s7] sm:$0x1] }
 0x221   : > { %v3007_v35 = vpop.f32.mrf.mxu0  ;;  %v3392_v42 = vmul.f32 %v3305_v32, %v3305_v32 }
 0x222   : > { %v3052_v44 = vadd.f32 %v3007_v35, %v2742_v40  ;;  %v3423_v14 = vadd.f32 %v3422_v55, %v3388_v61  ;;  %v3344_v7 = vadd.f32 %v3343_v41, %v3302_v29  ;;  %v3390_v46 = vmul.f32 %v3303_v20, %v3303_v20 }
 0x223   : > { %v3306_v30 = vmul.f32 %v3269_v51, %v3054_v56 }
 0x224   : > { %v3304_v58 = vmul.f32 %v3259_v48, %v3052_v44  ;;  %v3345_v36 = vadd.f32 %v3344_v7, %v3303_v20  ;;  %v3424_v34 = vadd.f32 %v3423_v14, %v3389_v6 }
 0x225   : > { %v3393_v3 = vmul.f32 %v3306_v30, %v3306_v30 }
 0x226   : > { %v3391_v47 = vmul.f32 %v3304_v58, %v3304_v58  ;;  %v3425_v50 = vadd.f32 %v3424_v34, %v3390_v46  ;;  %v3346_v0 = vadd.f32 %v3345_v36, %v3304_v58 }
 0x228   : > { %v3347_v33 = vadd.f32 %v3346_v0, %v3305_v32  ;;  %v3426_v10 = vadd.f32 %v3425_v50, %v3391_v47 }
 0x22a   : > { %v3348_v12 = vadd.f32 %v3347_v33, %v3306_v30  ;;  %v3427_v38 = vadd.f32 %v3426_v10, %v3392_v42 }
 0x22c   : > { %v3349_v53 = vrot.slane %v3348_v12, 4  ;;  %v3428_v60 = vadd.f32 %v3427_v38, %v3393_v3 }
 0x22e   : > { %v3350_v2 = vadd.f32 %v3349_v53, %v3348_v12  ;;  %v3429_v22 = vrot.slane %v3428_v60, 4 }
 0x230   : > { %v3351_v24 = vrot.slane %v3350_v2, 2  ;;  %v3430_v4 = vadd.f32 %v3429_v22, %v3428_v60 }
 0x232   : > { %v3352_v11 = vadd.f32 %v3351_v24, %v3350_v2  ;;  %v3431_v25 = vrot.slane %v3430_v4, 2 }
 0x234   : > { %v3353_v49 = vrot.slane %v3352_v11, 1  ;;  %v3432_v9 = vadd.f32 %v3431_v25, %v3430_v4 }
 0x236   : > { %v3354_v17 = vadd.f32 %v3353_v49, %v3352_v11  ;;  %v3433_v19 = vrot.slane %v3432_v9, 1 }
 0x238   : > { %v3355_v13 = vadd.f32 %v3354_v17, %v3313_v31  ;;  %v3434_v59 = vadd.f32 %v3433_v19, %v3432_v9 }
 0x23a   : > { %3356 = vst [vmem:[%s5637_s30] sm:$0x1] %v3355_v13  ;;  %v3435_v21 = vadd.f32 %v3434_v59, %v3357_v28 }
 0x23c   : > { %3436 = vst [vmem:[%s5643_s7] sm:$0x1] %v3435_v21 }
 0x23d PF: > { %s15_s17 = sadd.s32 1, %s4335_s17   ;;  %s5969_s15 = smov %s4331_s16 }
 0x23e   : > { %p12_p5 = scmp.ge.s32.totalorder %s15_s17, 4   ;;  %s5970_s16 = smov %s5972_s18 }
 0x240   :  { %14 = sbr.rel (!%p12_p5) target bundleno = 2 (0x2), region = 87 }

// kernel: conv_block_forward.3
= control target key start
LH: loop header
LB: loop body
LE: loop exit
PB: predicated region body
PF: predicated region fallthrough
CT: control target
= control target key end

     0   :  { %s4142_s15 = smov 0   ;;  %s4144_s16 = smov 0   ;;  %s5547_s0 = inlined_call_operand.vmem [shape: bf16[2,328,4], index: 0, kind: input, shape index: {}]   ;;  %s5548_s1 = inlined_call_operand.vmem [shape: bf16[3,3,4,128], index: 1, kind: input, shape index: {}]   ;;  %s5549_s2 = inlined_call_operand.vmem [shape: f32[1,128], index: 2, kind: input, shape index: {}]   ;;  %s5550_s3 = inlined_call_operand.vmem [shape: f32[1,128], index: 3, kind: input, shape index: {}]   ;;  %s5551_s4 = inlined_call_operand.vmem [shape: f32[2,288,128], index: 4, kind: output, shape index: {}]  }
   0x1   :  { %s4146_s17 = smov 0  }
   0x2 LB: > { %s26_s18 = sadd.s32 1, %s4111_s16  ;;  %p3306_p0 = scmp.ge.s32.totalorder %s4115_s17, 1  ;;  %s4115_s17 = sphi %s4146_s17, %s14_s17   ;;  %s4111_s16 = sphi %s4144_s16, %s5677_s16   ;;  %s4107_s15 = sphi %s4142_s15, %s5676_s15  }
   0x3   : > { %p28_p1 = scmp.ge.s32.totalorder %s26_s18, 2  ;;  %p176_p2 = scmp.lt.s32.totalorder %s4115_s17, 3 }
   0x5   : > { %s5679_s18 = smov (%p28_p1, %s26_s18), 0  ;;  %p177_p3 = pnand %p3306_p0, %p176_p2 }
   0x7   : > { %180 = sbr.rel (%p177_p3) target bundleno = 555 (0x22b), region = 36 }
   0xc   : > { %v3328_v0 = vld [vmem:[%s5548_s1 + $0x2] sm:$0x3]  ;;  %vm535_vm0 = vcmask 1041408   ;;  %p206_p4 = scmp.lt.s32.totalorder %s4107_s15, 1  ;;  %v3365_v2 = vld [vmem:[%s5548_s1 + $0x4] sm:$0x3] }
   0xd   : > { %4021 = vmatprep.subr.msk.bf16.mxu0 %vm535_vm0, %v3328_v0  ;;  %4022 = vmatprep.subr.msk.bf16.mxu1 %vm535_vm0, %v3328_v0  ;;  %v537_v1 = vsel %vm535_vm0, %v3328_v0, 0  ;;  %v327_v3 = vld [vmem:[%s5548_s1] sm:$0x3]  ;;  %vm331_vm1 = vsmask.f32 7424  ;;  %vm480_vm2 = vcmask 31744  }
   0xe   : > { %3678 = vmatpush3.bf16.msra.mxu0 %v537_v1  ;;  %4020 = vmatpush3.bf16.msra.mxu1 %v537_v1  ;;  %s5681_s15 = smov (!%p206_p4, %s4107_s15), 1  ;;  %v1046_v12 = vsel %vm535_vm0, %v3365_v2, 0  ;;  %v753_v16 = vsel %vm535_vm0, %v327_v3, 0  ;;  %v4241_v32 = vld [vmem:[%s5548_s1 + $0x8] sm:$0x3]  ;;  %vm953_vm3 = vcmask 1046528  }
   0xf   : > { %4024 = vmatprep.subr.msk.bf16.mxu0 %vm535_vm0, %v3365_v2  ;;  %4023 = vmatprep.subr.msk.bf16.mxu1 %vm535_vm0, %v327_v3  ;;  %s4031_s25 = smul.u32 164, %s5681_s15  ;;  %v4269_v43 = vld [vmem:[%s5548_s1 + $0x6] sm:$0x3]  ;;  %vm1495_vm4 = vsmask.f32 6400  ;;  %vm1853_vm5 = vcmask 1045504  }
  0x10   : > { %vm2395_vm6 = vsmask.f32 5376  ;;  %vm2753_vm7 = vcmask 1044480   ;;  %s4032_s21 = smul.u32 288, %s5681_s15 }
  0x11   : > { %s4180_s28 = scalar_lea.vmem %s5547_s0, %s4031_s25 }
  0x12   : > { %v4183_v4 = vld [vmem:[%s4180_s28] sm:$0xff]   ;;  %v4186_v5 = vld [vmem:[%s4180_s28 + $0x8] sm:$0xff]   ;;  %v4193_v10 = vld [vmem:[%s4180_s28 + $0x50] sm:$0xff]   ;;  %s5399_s25 = scalar_lea.vmem %s5551_s4, %s4032_s21 }
  0x13   : > { %v333_v6 = vshrl.u32 %v4183_v4, 16  ;;  %v335_v7 = vshll.u32 %v4183_v4, 16  ;;  %v5554_v8 = vshll.u32 %v4186_v5, 16  ;;  %v5553_v9 = vshrl.u32 %v4186_v5, 16  ;;  %5588 = vst [vmem:[#allocation2_spill] sm:$0xff] %v4193_v10  ;;  %v4196_v11 = vld [vmem:[%s4180_s28 + $0x58] sm:$0xff]  }
  0x14   : > { %5589 = vst [vmem:[#allocation3_spill] sm:$0xff] %v4196_v11  ;;  %v4202_v15 = vld [vmem:[%s4180_s28 + $0x10] sm:$0xff]   ;;  %v4206_v17 = vshll.u32 %v4193_v10, 16  ;;  %v4209_v18 = vshrl.u32 %v4193_v10, 16  ;;  %v4212_v19 = vshll.u32 %v4196_v11, 16  ;;  %v4215_v20 = vshrl.u32 %v4196_v11, 16 }
  0x15   : > { %v337_v13 = vrot.slane %v335_v7, 1  ;;  %v342_v14 = vrot.slane %v5554_v8, 1  ;;  %v4220_v23 = vshll.u32 %v4202_v15, 16  ;;  %v4223_v24 = vld [vmem:[%s4180_s28 + $0x60] sm:$0xff]   ;;  %v4228_v27 = vld [vmem:[%s4180_s28 + $0x18] sm:$0xff]   ;;  %v4231_v28 = vshrl.u32 %v4202_v15, 16 }
  0x16   : > { %5591 = vst [vmem:[#allocation5_spill] sm:$0xff] %v4223_v24  ;;  %v5552_v25 = vrot.slane %v4206_v17, 1  ;;  %v422_v26 = vrot.slane %v4212_v19, 1  ;;  %v4236_v31 = vshll.u32 %v4223_v24, 16  ;;  %v4249_v35 = vshll.u32 %v4228_v27, 16  ;;  %v4252_v36 = vld [vmem:[%s4180_s28 + $0x68] sm:$0xff]  }
  0x17   : > { %v338_v21 = vor.u32 %v337_v13, %v333_v6  ;;  %v346_v22 = vor.u32 %v5553_v9, %v342_v14  ;;  %5590 = vst [vmem:[#allocation4_spill] sm:$0xff] %v4220_v23  ;;  %5592 = vst [vmem:[#allocation6_spill] sm:$0xff] %v4231_v28  ;;  %v350_v30 = vrot.slane %v4220_v23, 1  ;;  %v4255_v37 = vshrl.u32 %v4223_v24, 16  ;;  %v4258_v38 = vld [vmem:[%s4180_s28 + $0x20] sm:$0xff]   ;;  %v4281_v48 = vld [vmem:[%s4180_s28 + $0x70] sm:$0xff]  }
  0x18   : > { %v418_v33 = vor.u32 %v4209_v18, %v5552_v25  ;;  %v426_v34 = vor.u32 %v4215_v20, %v422_v26  ;;  %5593 = vst [vmem:[#allocation7_spill] sm:$0xff] %v4252_v36  ;;  %v430_v40 = vrot.slane %v4236_v31, 1  ;;  %v4264_v42 = vshrl.u32 %v4228_v27, 16  ;;  %5595 = vst [vmem:[#allocation9_spill] sm:$0xff] %v4281_v48  ;;  %v4290_v52 = vld [vmem:[%s4180_s28 + $0x28] sm:$0xff]   ;;  %v4310_v60 = vld [vmem:[%s4180_s28 + $0x78] sm:$0xff]  }
  0x19   : > { %v343_v29 = vsel %vm331_vm1, %v338_v21, %v342_v14  ;;  %v351_v39 = vsel %vm331_vm1, %v346_v22, %v350_v30  ;;  %v354_v41 = vor.u32 %v4231_v28, %v350_v30  ;;  %v358_v45 = vrot.slane %v4249_v35, 1  ;;  %v4313_v61 = vld [vmem:[%s4180_s28 + $0x30] sm:$0xff]   ;;  %v4321_v1 = vld [vmem:[%s4180_s28 + $0x80] sm:$0xff]  }
  0x1a   : > { %3679 = vmatprep.mubr.msk.bf16.mxu0 %vm480_vm2, %v343_v29  ;;  %v423_v44 = vsel %vm331_vm1, %v418_v33, %v422_v26  ;;  %v4275_v46 = vshll.u32 %v4252_v36, 16  ;;  %v4278_v47 = vshll.u32 %v4258_v38, 16  ;;  %v431_v49 = vsel %vm331_vm1, %v426_v34, %v430_v40  ;;  %5597 = vst [vmem:[#allocation11_spill] sm:$0xff] %v4313_v61  ;;  %5599 = vst [vmem:[#allocation13_spill] sm:$0xff] %v4321_v1  ;;  %v4352_v33 = vld [vmem:[%s4180_s28 + $0x88] sm:$0xff]  }
  0x1b   : > { %3680 = vmatmul.mubr.msk.bf16.vlgmr.msra.gmra.mxu0 %vm480_vm2, %v351_v39  ;;  %3699 = vmatprep.mubr.msk.bf16.mxu1 %vm480_vm2, %v423_v44  ;;  %v434_v50 = vor.u32 %v4255_v37, %v430_v40  ;;  %v4287_v51 = vshrl.u32 %v4252_v36, 16  ;;  %v359_v53 = vsel %vm331_vm1, %v354_v41, %v358_v45  ;;  %v362_v55 = vor.u32 %v4264_v42, %v358_v45  ;;  %v4362_v44 = vld [vmem:[%s4180_s28 + $0x40] sm:$0xff]  }
  0x1c   : > { %5594 = vst [vmem:[#allocation8_spill] sm:$0xff] %v4275_v46  ;;  %3754 = vmatpush3.bf16.msra.mxu0 %v1046_v12  ;;  %3700 = vmatmul.mubr.msk.bf16.vlgmr.msra.gmra.mxu1 %vm480_vm2, %v431_v49  ;;  %v438_v54 = vrot.slane %v4275_v46, 1  ;;  %v366_v56 = vrot.slane %v4278_v47, 1  ;;  %v4301_v57 = vshll.u32 %v4281_v48, 16  ;;  %v4304_v58 = vshrl.u32 %v4258_v38, 16  ;;  %v4331_v12 = vld [vmem:[%s4180_s28 + $0x38] sm:$0xff]  }
  0x1d   : > { %4026 = vmatprep.subr.msk.bf16.mxu0 %vm535_vm0, %v4241_v32  ;;  %3716 = vmatpush3.bf16.msra.mxu1 %v753_v16  ;;  %v4307_v59 = vshll.u32 %v4290_v52, 16  ;;  %v4318_v0 = vshrl.u32 %v4281_v48, 16  ;;  %5600 = vst [vmem:[#allocation14_spill] sm:$0xff] %v4331_v12  ;;  %v4334_v13 = vshll.u32 %v4310_v60, 16  ;;  %v4337_v14 = vshrl.u32 %v4290_v52, 16  ;;  %5604 = vst [vmem:[#allocation18_spill] sm:$0xff] %v4362_v44 }
  0x1e   : > { %3683 = vmatprep.mubr.msk.bf16.mxu0 %vm480_vm2, %v359_v53  ;;  %5596 = vst [vmem:[#allocation10_spill] sm:$0xff] %v4301_v57  ;;  %v439_v62 = vsel %vm331_vm1, %v434_v50, %v438_v54  ;;  %v442_v63 = vor.u32 %v4287_v51, %v438_v54  ;;  %4025 = vmatprep.subr.msk.bf16.mxu1 %vm535_vm0, %v4269_v43  ;;  %v446_v3 = vrot.slane %v4301_v57, 1  ;;  %v4340_v16 = vshll.u32 %v4313_v61, 16 }
  0x1f   : > { %5598 = vst [vmem:[#allocation12_spill] sm:$0xff] %v4318_v0  ;;  %3703 = vmatprep.mubr.msk.bf16.mxu1 %vm480_vm2, %v439_v62  ;;  %v367_v2 = vsel %vm331_vm1, %v362_v55, %v366_v56  ;;  %v370_v6 = vor.u32 %v4304_v58, %v366_v56  ;;  %v374_v7 = vrot.slane %v4307_v59, 1  ;;  %5601 = vst [vmem:[#allocation15_spill] sm:$0xff] %v4334_v13  ;;  %v4343_v21 = vshrl.u32 %v4310_v60, 16  ;;  %v263_v56 = vld [vmem:[%s4180_s28 + $0x90] sm:$0xf] }
  0x20   : > { %v447_v22 = vsel %vm331_vm1, %v442_v63, %v446_v3  ;;  %v450_v29 = vor.u32 %v4318_v0, %v446_v3  ;;  %v4349_v30 = vshll.u32 %v4321_v1, 16  ;;  %v454_v34 = vrot.slane %v4334_v13, 1 }
  0x21   : > { %5602 = vst [vmem:[#allocation16_spill] sm:$0xff] %v4343_v21  ;;  %v375_v26 = vsel %vm331_vm1, %v370_v6, %v374_v7  ;;  %v378_v39 = vor.u32 %v4337_v14, %v374_v7  ;;  %v382_v40 = vrot.slane %v4340_v16, 1  ;;  %v4359_v41 = vshrl.u32 %v4313_v61, 16 }
  0x22   : > { %5603 = vst [vmem:[#allocation17_spill] sm:$0xff] %v4349_v30  ;;  %v462_v45 = vrot.slane %v4349_v30, 1  ;;  %v4367_v49 = vshll.u32 %v4331_v12, 16  ;;  %v4370_v50 = vshrl.u32 %v4321_v1, 16  ;;  %v4373_v53 = vshll.u32 %v4352_v33, 16 }
  0x23   : > { %3684 = vmatmul.mubr.msk.bf16.gmra.mxu0 %vm480_vm2, %v367_v2  ;;  %v455_v54 = vsel %vm331_vm1, %v450_v29, %v454_v34  ;;  %v386_v55 = vor.u32 %v4359_v41, %v382_v40  ;;  %v458_v62 = vor.u32 %v4343_v21, %v454_v34  ;;  %v4383_v2 = vld [vmem:[%s4180_s28 + $0x48] sm:$0xff]   ;;  %v4388_v7 = vshll.u32 %v4362_v44, 16 }
  0x24   : > { %3687 = vmatprep.mubr.msk.bf16.mxu0 %vm480_vm2, %v375_v26  ;;  %5605 = vst [vmem:[#allocation19_spill] sm:$0xff] %v4370_v50  ;;  %5606 = vst [vmem:[#allocation20_spill] sm:$0xff] %v4373_v53  ;;  %3704 = vmatmul.mubr.msk.bf16.gmra.mxu1 %vm480_vm2, %v447_v22  ;;  %v390_v63 = vrot.slane %v4367_v49, 1  ;;  %v466_v3 = vor.u32 %v4370_v50, %v462_v45  ;;  %v470_v6 = vrot.slane %v4373_v53, 1  ;;  %v4392_v29 = vshrl.u32 %v4331_v12, 16 }
  0x25   : > { %3707 = vmatprep.mubr.msk.bf16.mxu1 %vm480_vm2, %v455_v54  ;;  %5607 = vst [vmem:[#allocation21_spill] sm:$0xff] %v4383_v2  ;;  %v3327_v22 = vcombine.low %v263_v56, %v263_v56  ;;  %v383_v26 = vsel %vm331_vm1, %v378_v39, %v382_v40  ;;  %v4396_v34 = vshrl.u32 %v4362_v44, 16  ;;  %v463_v25 = vsel %vm331_vm1, %v458_v62, %v462_v45 }
  0x26   : > { %v391_v54 = vsel %vm331_vm1, %v386_v55, %v390_v63  ;;  %v4400_v9 = vshrl.u32 %v4352_v33, 16  ;;  %v4403_v53 = vshll.u32 %v4383_v2, 16  ;;  %v471_v39 = vsel %vm331_vm1, %v466_v3, %v470_v6 }
  0x27   : > { %v476_v8 = vshll.u32 %v3327_v22, 16  ;;  %v398_v40 = vrot.slane %v4388_v7, 1  ;;  %v394_v55 = vor.u32 %v4392_v29, %v390_v63  ;;  %v4417_v3 = vshrl.u32 %v4383_v2, 16 }
  0x28   : > { %5608 = vst [vmem:[#allocation22_spill] sm:$0xff] %v4400_v9  ;;  %v406_v62 = vrot.slane %v4403_v53, 1  ;;  %v474_v30 = vor.u32 %v4400_v9, %v470_v6  ;;  %v5609_v63 = vshll.u32 %v4186_v5, 16  ;;  %v989_v6 = vrot.slane %v3327_v22, 1  ;;  %v4463_v9 = vld [vmem:[%s5548_s1 + $0xa] sm:$0x3] }
  0x29   : > { %v402_v45 = vor.u32 %v4396_v34, %v398_v40  ;;  %v478_v50 = vrot.slane %v476_v8, 1  ;;  %v957_v22 = vrot.slane %v4202_v15, 1 }
  0x2a   : > { %v4422_v13 = vrot.slane %v5609_v63, 2  ;;  %v410_v8 = vor.u32 %v4417_v3, %v406_v62 }
  0x2b   : > { %3688 = vmatmul.mubr.msk.bf16.gmra.mxu0 %vm480_vm2, %v383_v26  ;;  %v399_v26 = vsel %vm331_vm1, %v394_v55, %v398_v40  ;;  %v5610_v40 = vshrl.u32 %v4186_v5, 16 }
  0x2c   : > { %3691 = vmatprep.mubr.msk.bf16.mxu0 %vm480_vm2, %v391_v54  ;;  %3708 = vmatmul.mubr.msk.bf16.gmra.mxu1 %vm480_vm2, %v463_v25  ;;  %v407_v54 = vsel %vm331_vm1, %v402_v45, %v406_v62  ;;  %v479_v25 = vsel %vm331_vm1, %v474_v30, %v478_v50  ;;  %v954_v30 = vrot.slane %v4183_v4, 1  ;;  %v955_v50 = vrot.slane %v4186_v5, 1 }
  0x2d   : > { %3711 = vmatprep.mubr.msk.bf16.mxu1 %vm480_vm2, %v471_v39  ;;  %v4427_v39 = vrot.slane %v4352_v33, 1  ;;  %v4433_v55 = vrot.slane %v5610_v40, 1  ;;  %v1507_v62 = vrot.slane %v4304_v58, 1 }
  0x2e   : > { %v956_v40 = vsel %vm953_vm3, %v954_v30, %v955_v50 }
  0x2f   : > { %v4440_v45 = vsel %vm953_vm3, %v4427_v39, %v989_v6  ;;  %v264_v6 = vld [vmem:[%s4180_s28 + $0x94] sm:$0xf] }
  0x30   : > { %v4468_v30 = vcombine.low %v263_v56, %v264_v6  ;;  %v4485_v56 = vld [vmem:[%s5548_s1 + $0xc] sm:$0x3]  ;;  %v965_v6 = vrot.slane %v4313_v61, 1 }
  0x32   : > { %5612 = vst [vmem:[#allocation23_spill] sm:$0xff] %v4468_v30 }
  0x33   : > { %3692 = vmatmul.mubr.msk.bf16.gmra.mxu0 %vm480_vm2, %v399_v26  ;;  %v1508_v26 = vrot.slane %v4278_v47, 2 }
  0x34   : > { %3695 = vmatprep.mubr.msk.bf16.mxu0 %vm480_vm2, %v407_v54  ;;  %3712 = vmatmul.mubr.msk.bf16.gmra.mxu1 %vm480_vm2, %v479_v25  ;;  %v5611_v54 = vrot.slane %v4206_v17, 1 }
  0x35   : > { %3717 = vmatprep.mubr.msk.bf16.mxu1 %vm480_vm2, %v4183_v4  ;;  %v4451_v25 = vor.u32 %v1508_v26, %v1507_v62  ;;  %v1278_v4 = vsel %vm535_vm0, %v4269_v43, 0  ;;  %v4475_v43 = vsel %vm953_vm3, %v955_v50, %v957_v22  ;;  %v1636_v62 = vsel %vm535_vm0, %v4241_v32, 0 }
  0x36   : > { %v415_v63 = vsel %vm331_vm1, %v410_v8, %v5611_v54  ;;  %v959_v8 = vrot.slane %v4228_v27, 1  ;;  %v5565_v54 = vrot.slane %v4468_v30, 1  ;;  %v961_v50 = vrot.slane %v4258_v38, 1 }
  0x38   : > { %v4480_v26 = vsel %vm953_vm3, %v957_v22, %v959_v8  ;;  %v4497_v32 = vsel %vm953_vm3, %v4427_v39, %v5565_v54  ;;  %v963_v22 = vrot.slane %v4290_v52, 1  ;;  %v971_v54 = vrot.slane %v4383_v2, 1 }
  0x3b   : > { %3696 = vmatmul.mubr.msk.bf16.gmra.mxu0 %vm480_vm2, %v415_v63  ;;  %v4507_v63 = vsel %vm953_vm3, %v959_v8, %v961_v50  ;;  %v4523_v8 = vsel %vm953_vm3, %v963_v22, %v965_v6 }
  0x3c   : > { %3755 = vmatprep.mubr.msk.bf16.mxu0 %vm480_vm2, %v956_v40  ;;  %3718 = vmatmul.mubr.msk.bf16.vlgmr.msra.gmra.mxu1 %vm480_vm2, %v4186_v5  ;;  %v4510_v40 = vsel %vm953_vm3, %v961_v50, %v963_v22  ;;  %v969_v50 = vrot.slane %v4362_v44, 1 }
  0x3d   : > { %3792 = vmatpush3.bf16.msra.mxu1 %v1278_v4  ;;  %3721 = vmatprep.mubr.msk.bf16.mxu1 %vm480_vm2, %v4202_v15  ;;  %v967_v4 = vrot.slane %v4331_v12, 1 }
  0x3e   : > { %4027 = vmatprep.subr.msk.bf16.mxu1 %vm535_vm0, %v4463_v9 }
  0x3f   : > { %v4539_v22 = vsel %vm953_vm3, %v967_v4, %v969_v50 }
  0x43   : > { %3756 = vmatmul.mubr.msk.bf16.vlgmr.msra.gmra.mxu0 %vm480_vm2, %v4475_v43 }
  0x44   : > { %3830 = vmatpush3.bf16.msra.mxu0 %v1636_v62  ;;  %3759 = vmatprep.mubr.msk.bf16.mxu0 %vm480_vm2, %v4480_v26  ;;  %v4526_v62 = vsel %vm953_vm3, %v965_v6, %v967_v4  ;;  %v4542_v6 = vsel %vm953_vm3, %v969_v50, %v971_v54 }
  0x45   : > { %3722 = vmatmul.mubr.msk.bf16.gmra.mxu1 %vm480_vm2, %v4228_v27  ;;  %4028 = vmatprep.subr.msk.bf16.mxu0 %vm535_vm0, %v4485_v56 }
  0x46   : > { %3725 = vmatprep.mubr.msk.bf16.mxu1 %vm480_vm2, %v4258_v38 }
  0x4b   : > { %3760 = vmatmul.mubr.msk.bf16.gmra.mxu0 %vm480_vm2, %v4507_v63 }
  0x4c   : > { %3763 = vmatprep.mubr.msk.bf16.mxu0 %vm480_vm2, %v4510_v40 }
  0x4d   : > { %3726 = vmatmul.mubr.msk.bf16.gmra.mxu1 %vm480_vm2, %v4290_v52 }
  0x4e   : > { %3729 = vmatprep.mubr.msk.bf16.mxu1 %vm480_vm2, %v4313_v61  ;;  %v973_v61 = vrot.slane %v4193_v10, 1 }
  0x50   : > { %v4555_v4 = vsel %vm953_vm3, %v971_v54, %v973_v61 }
  0x53   : > { %3764 = vmatmul.mubr.msk.bf16.gmra.mxu0 %vm480_vm2, %v4523_v8 }
  0x54   : > { %3767 = vmatprep.mubr.msk.bf16.mxu0 %vm480_vm2, %v4526_v62 }
  0x55   : > { %3730 = vmatmul.mubr.msk.bf16.gmra.mxu1 %vm480_vm2, %v4331_v12  ;;  %v975_v12 = vrot.slane %v4196_v11, 1 }
  0x56   : > { %3733 = vmatprep.mubr.msk.bf16.mxu1 %vm480_vm2, %v4362_v44  ;;  %v977_v44 = vrot.slane %v4223_v24, 1 }
  0x57   : > { %v4558_v50 = vsel %vm953_vm3, %v973_v61, %v975_v12 }
  0x58   : > { %v4571_v54 = vsel %vm953_vm3, %v975_v12, %v977_v44 }
  0x5b   : > { %3768 = vmatmul.mubr.msk.bf16.gmra.mxu0 %vm480_vm2, %v4539_v22 }
  0x5c   : > { %3771 = vmatprep.mubr.msk.bf16.mxu0 %vm480_vm2, %v4542_v6 }
  0x5d   : > { %3734 = vmatmul.mubr.msk.bf16.gmra.mxu1 %vm480_vm2, %v4383_v2  ;;  %v979_v2 = vrot.slane %v4252_v36, 1 }
  0x5e   : > { %3737 = vmatprep.mubr.msk.bf16.mxu1 %vm480_vm2, %v4193_v10  ;;  %v981_v10 = vrot.slane %v4281_v48, 1 }
  0x5f   : > { %v4574_v61 = vsel %vm953_vm3, %v977_v44, %v979_v2 }
  0x60   : > { %v4587_v12 = vsel %vm953_vm3, %v979_v2, %v981_v10 }
  0x63   : > { %3772 = vmatmul.mubr.msk.bf16.gmra.mxu0 %vm480_vm2, %v4555_v4 }
  0x64   : > { %3775 = vmatprep.mubr.msk.bf16.mxu0 %vm480_vm2, %v4558_v50 }
  0x65   : > { %3738 = vmatmul.mubr.msk.bf16.gmra.mxu1 %vm480_vm2, %v4196_v11  ;;  %v983_v11 = vrot.slane %v4310_v60, 1 }
  0x66   : > { %3741 = vmatprep.mubr.msk.bf16.mxu1 %vm480_vm2, %v4223_v24  ;;  %v985_v24 = vrot.slane %v4321_v1, 1 }
  0x67   : > { %v4590_v44 = vsel %vm953_vm3, %v981_v10, %v983_v11 }
  0x68   : > { %v4602_v2 = vsel %vm953_vm3, %v983_v11, %v985_v24  ;;  %v4606_v10 = vsel %vm953_vm3, %v985_v24, %v4427_v39  ;;  %v1503_v11 = vrot.slane %v4264_v42, 1  ;;  %v1504_v24 = vrot.slane %v4249_v35, 2 }
  0x69   : > { %v5613_v39 = vor.u32 %v4422_v13, %v4433_v55  ;;  %v1512_v13 = vrot.slane %v4307_v59, 2  ;;  %v2178_v55 = vsel %vm535_vm0, %v4485_v56, 0 }
  0x6b   : > { %3776 = vmatmul.mubr.msk.bf16.gmra.mxu0 %vm480_vm2, %v4571_v54 }
  0x6c   : > { %3779 = vmatprep.mubr.msk.bf16.mxu0 %vm480_vm2, %v4574_v61 }
  0x6d   : > { %3742 = vmatmul.mubr.msk.bf16.gmra.mxu1 %vm480_vm2, %v4252_v36  ;;  %v1500_v36 = vrot.slane %v4220_v23, 2 }
  0x6e   : > { %3745 = vmatprep.mubr.msk.bf16.mxu1 %vm480_vm2, %v4281_v48  ;;  %v1499_v48 = vrot.slane %v4231_v28, 1  ;;  %v1946_v28 = vsel %vm535_vm0, %v4463_v9, 0 }
  0x73   : > { %3780 = vmatmul.mubr.msk.bf16.gmra.mxu0 %vm480_vm2, %v4587_v12 }
  0x74   : > { %3783 = vmatprep.mubr.msk.bf16.mxu0 %vm480_vm2, %v4590_v44 }
  0x75   : > { %3746 = vmatmul.mubr.msk.bf16.gmra.mxu1 %vm480_vm2, %v4310_v60 }
  0x76   : > { %3749 = vmatprep.mubr.msk.bf16.mxu1 %vm480_vm2, %v4321_v1  ;;  %v1501_v1 = vor.u32 %v1500_v36, %v1499_v48  ;;  %v1505_v36 = vor.u32 %v1504_v24, %v1503_v11  ;;  %v4632_v48 = vld [vmem:[%s5548_s1 + $0xe] sm:$0x3]  ;;  %v2403_v11 = vrot.slane %v4304_v58, 2 }
  0x78   : > { %v1502_v23 = vsel %vm1495_vm4, %v5613_v39, %v1501_v1  ;;  %v1506_v9 = vsel %vm1495_vm4, %v1501_v1, %v1505_v36  ;;  %v1519_v39 = vrot.slane %v4392_v29, 1 }
  0x7b   : > { %3784 = vmatmul.mubr.msk.bf16.gmra.mxu0 %vm480_vm2, %v4602_v2 }
  0x7c   : > { %3787 = vmatprep.mubr.msk.bf16.mxu0 %vm480_vm2, %v4606_v10 }
  0x7d   : > { %3750 = vmatmul.mubr.msk.bf16.gmra.mxu1 %vm480_vm2, %v4352_v33 }
  0x7e   : > { %3793 = vmatprep.mubr.msk.bf16.mxu1 %vm480_vm2, %v4475_v43  ;;  %v1516_v43 = vrot.slane %v4340_v16, 2 }
  0x83   : > { %3788 = vmatmul.mubr.msk.bf16.gmra.mxu0 %vm480_vm2, %v4440_v45  ;;  %v1510_v45 = vsel %vm1495_vm4, %v1505_v36, %v4451_v25  ;;  %v1520_v36 = vrot.slane %v4367_v49, 2 }
  0x84   : > { %3831 = vmatprep.mubr.msk.bf16.mxu0 %vm480_vm2, %v1502_v23  ;;  %v1511_v23 = vrot.slane %v4337_v14, 1 }
  0x85   : > { %3794 = vmatmul.mubr.msk.bf16.vlgmr.msra.gmra.mxu1 %vm480_vm2, %v4480_v26  ;;  %v4652_v26 = vld [vmem:[%s5548_s1 + $0x10] sm:$0x3] }
  0x86   : > { %3868 = vmatpush3.bf16.msra.mxu1 %v1946_v28  ;;  %3797 = vmatprep.mubr.msk.bf16.mxu1 %vm480_vm2, %v4507_v63  ;;  %v1515_v28 = vrot.slane %v4359_v41, 1  ;;  %v1513_v1 = vor.u32 %v1512_v13, %v1511_v23  ;;  %v2404_v63 = vrot.slane %v4278_v47, 3  ;;  %v1524_v23 = vrot.slane %v4388_v7, 2 }
  0x87   : > { %4029 = vmatprep.subr.msk.bf16.mxu1 %vm535_vm0, %v4632_v48  ;;  %v1521_v47 = vor.u32 %v1520_v36, %v1519_v39  ;;  %v1540_v39 = vrot.slane %v4236_v31, 2 }
  0x88   : > { %v1517_v56 = vor.u32 %v1516_v43, %v1515_v28  ;;  %v1514_v24 = vsel %vm1495_vm4, %v4451_v25, %v1513_v1  ;;  %v4671_v13 = vor.u32 %v2404_v63, %v2403_v11  ;;  %v1531_v28 = vrot.slane %v4209_v18, 1 }
  0x89   : > { %v1532_v43 = vrot.slane %v4206_v17, 2  ;;  %v1536_v63 = vrot.slane %v4212_v19, 2 }
  0x8a   : > { %v1522_v25 = vsel %vm1495_vm4, %v1517_v56, %v1521_v47 }
  0x8b   : > { %3832 = vmatmul.mubr.msk.bf16.vlgmr.msra.gmra.mxu0 %vm480_vm2, %v1506_v9  ;;  %v1523_v9 = vrot.slane %v4396_v34, 1 }
  0x8c   : > { %3906 = vmatpush3.bf16.msra.mxu0 %v2178_v55  ;;  %3835 = vmatprep.mubr.msk.bf16.mxu0 %vm480_vm2, %v1510_v45  ;;  %v1528_v55 = vrot.slane %v4403_v53, 2 }
  0x8d   : > { %3798 = vmatmul.mubr.msk.bf16.gmra.mxu1 %vm480_vm2, %v4510_v40  ;;  %4030 = vmatprep.subr.msk.bf16.mxu0 %vm535_vm0, %v4652_v26  ;;  %v1518_v40 = vsel %vm1495_vm4, %v1513_v1, %v1517_v56  ;;  %v1525_v58 = vor.u32 %v1524_v23, %v1523_v9  ;;  %v1535_v56 = vrot.slane %v4215_v20, 1  ;;  %v1544_v9 = vrot.slane %v4275_v46, 2 }
  0x8e   : > { %3801 = vmatprep.mubr.msk.bf16.mxu1 %vm480_vm2, %v4523_v8  ;;  %v1527_v8 = vrot.slane %v4417_v3, 1  ;;  %v2400_v46 = vrot.slane %v4249_v35, 3 }
  0x8f   : > { %v1526_v45 = vsel %vm1495_vm4, %v1521_v47, %v1525_v58  ;;  %v1547_v47 = vrot.slane %v4318_v0, 1 }
  0x93   : > { %3836 = vmatmul.mubr.msk.bf16.gmra.mxu0 %vm480_vm2, %v1514_v24  ;;  %v1539_v24 = vrot.slane %v4255_v37, 1 }
  0x94   : > { %3839 = vmatprep.mubr.msk.bf16.mxu0 %vm480_vm2, %v1518_v40  ;;  %v1543_v40 = vrot.slane %v4287_v51, 1 }
  0x95   : > { %3802 = vmatmul.mubr.msk.bf16.gmra.mxu1 %vm480_vm2, %v4526_v62  ;;  %v1529_v62 = vor.u32 %v1528_v55, %v1527_v8  ;;  %v1551_v8 = vrot.slane %v4343_v21, 1  ;;  %v5614_v55 = vld [vmem:[#allocation15_spill] sm:$0xff] }
  0x96   : > { %3805 = vmatprep.mubr.msk.bf16.mxu1 %vm480_vm2, %v4539_v22  ;;  %v1533_v22 = vor.u32 %v1532_v43, %v1531_v28  ;;  %v5615_v43 = vld [vmem:[#allocation19_spill] sm:$0xff] }
  0x97   : > { %v1530_v1 = vsel %vm1495_vm4, %v1525_v58, %v1529_v62  ;;  %v1548_v58 = vrot.slane %v4301_v57, 2 }
  0x98   : > { %v1534_v11 = vsel %vm1495_vm4, %v1529_v62, %v1533_v22  ;;  %v1555_v62 = vrot.slane %v5615_v43, 1 }
  0x9b   : > { %3840 = vmatmul.mubr.msk.bf16.gmra.mxu0 %vm480_vm2, %v1522_v25 }
  0x9c   : > { %3843 = vmatprep.mubr.msk.bf16.mxu0 %vm480_vm2, %v1526_v45  ;;  %v1552_v45 = vrot.slane %v5614_v55, 2  ;;  %v266_v55 = vld [vmem:[%s4180_s28 + $0x9c] sm:$0xf] }
  0x9d   : > { %3806 = vmatmul.mubr.msk.bf16.gmra.mxu1 %vm480_vm2, %v4542_v6  ;;  %v1537_v6 = vor.u32 %v1536_v63, %v1535_v56  ;;  %v5581_v56 = vshrl.u32 %v4468_v30, 16  ;;  %v5580_v63 = vshll.u32 %v4468_v30, 16 }
  0x9e   : > { %3809 = vmatprep.mubr.msk.bf16.mxu1 %vm480_vm2, %v4555_v4  ;;  %v1541_v4 = vor.u32 %v1540_v39, %v1539_v24  ;;  %v5617_v39 = vld [vmem:[#allocation22_spill] sm:$0xff] }
  0x9f   : > { %v1538_v36 = vsel %vm1495_vm4, %v1533_v22, %v1537_v6  ;;  %v5616_v22 = vld [vmem:[#allocation17_spill] sm:$0xff] }
  0xa0   : > { %v1542_v23 = vsel %vm1495_vm4, %v1537_v6, %v1541_v4  ;;  %v1559_v6 = vrot.slane %v5617_v39, 1  ;;  %v5637_v39 = vld [vmem:[#allocation9_spill] sm:$0xff] }
  0xa3   : > { %3844 = vmatmul.mubr.msk.bf16.gmra.mxu0 %vm480_vm2, %v1530_v1  ;;  %v1556_v1 = vrot.slane %v5616_v22, 2 }
  0xa4   : > { %3847 = vmatprep.mubr.msk.bf16.mxu0 %vm480_vm2, %v1534_v11  ;;  %v4730_v11 = vld [vmem:[%s4180_s28 + $0x98] sm:$0xf] }
  0xa5   : > { %3810 = vmatmul.mubr.msk.bf16.gmra.mxu1 %vm480_vm2, %v4558_v50  ;;  %v1545_v50 = vor.u32 %v1544_v9, %v1543_v40  ;;  %v1569_v9 = vrot.slane %v5580_v63, 2  ;;  %v5635_v63 = vld [vmem:[#allocation7_spill] sm:$0xff] }
  0xa6   : > { %3813 = vmatprep.mubr.msk.bf16.mxu1 %vm480_vm2, %v4571_v54  ;;  %v1549_v54 = vor.u32 %v1548_v58, %v1547_v47 }
  0xa7   : > { %v1546_v25 = vsel %vm1495_vm4, %v1541_v4, %v1545_v50  ;;  %v5618_v4 = vld [vmem:[#allocation20_spill] sm:$0xff] }
  0xa8   : > { %v1550_v28 = vsel %vm1495_vm4, %v1545_v50, %v1549_v54 }
  0xab   : > { %3848 = vmatmul.mubr.msk.bf16.gmra.mxu0 %vm480_vm2, %v1538_v36  ;;  %v1560_v36 = vrot.slane %v5618_v4, 2 }
  0xac   : > { %3851 = vmatprep.mubr.msk.bf16.mxu0 %vm480_vm2, %v1542_v23  ;;  %v4742_v23 = vcombine.low %v4730_v11, %v4730_v11 }
  0xad   : > { %3814 = vmatmul.mubr.msk.bf16.gmra.mxu1 %vm480_vm2, %v4574_v61  ;;  %v1553_v61 = vor.u32 %v1552_v45, %v1551_v8  ;;  %v1855_v8 = vrot.slane %v4202_v15, 2  ;;  %v1857_v15 = vrot.slane %v4228_v27, 2  ;;  %v1861_v27 = vrot.slane %v4290_v52, 2 }
  0xae   : > { %3817 = vmatprep.mubr.msk.bf16.mxu1 %vm480_vm2, %v4587_v12  ;;  %v1557_v12 = vor.u32 %v1556_v1, %v1555_v62  ;;  %v1573_v47 = vshrl.u32 %v4742_v23, 16  ;;  %v1576_v58 = vshll.u32 %v4742_v23, 16  ;;  %v1889_v35 = vrot.slane %v4742_v23, 2 }
  0xaf   : > { %v1554_v24 = vsel %vm1495_vm4, %v1549_v54, %v1553_v61  ;;  %v1269_v54 = vrot.slane %v4742_v23, 1 }
  0xb0   : > { %v1558_v40 = vsel %vm1495_vm4, %v1553_v61, %v1557_v12  ;;  %v1578_v62 = vrot.slane %v1576_v58, 2  ;;  %v5619_v61 = vrot.slane %v4468_v30, 1 }
  0xb3   : > { %3852 = vmatmul.mubr.msk.bf16.gmra.mxu0 %vm480_vm2, %v1546_v25  ;;  %v1854_v25 = vrot.slane %v4186_v5, 2 }
  0xb4   : > { %3855 = vmatprep.mubr.msk.bf16.mxu0 %vm480_vm2, %v1550_v28  ;;  %v1575_v28 = vrot.slane %v1573_v47, 1  ;;  %v5621_v47 = vld [vmem:[#allocation14_spill] sm:$0xff] }
  0xb5   : > { %3818 = vmatmul.mubr.msk.bf16.gmra.mxu1 %vm480_vm2, %v4590_v44  ;;  %v1566_v44 = vrot.slane %v5581_v56, 1  ;;  %v1865_v58 = vrot.slane %v5621_v47, 2 }
  0xb6   : > { %3821 = vmatprep.mubr.msk.bf16.mxu1 %vm480_vm2, %v4602_v2  ;;  %v1561_v2 = vor.u32 %v1560_v36, %v1559_v6  ;;  %v1579_v5 = vor.u32 %v1578_v62, %v1575_v28  ;;  %v1858_v6 = vsel %vm1853_vm5, %v1855_v8, %v1857_v15  ;;  %v2536_v36 = vsel %vm535_vm0, %v4632_v48, 0  ;;  %v5623_v62 = vld [vmem:[#allocation21_spill] sm:$0xff] }
  0xb7   : > { %v1570_v50 = vor.u32 %v1569_v9, %v1566_v44  ;;  %v2846_v9 = vsel %vm535_vm0, %v4652_v26, 0 }
  0xb8   : > { %v1562_v45 = vsel %vm1495_vm4, %v1557_v12, %v1561_v2  ;;  %v1859_v12 = vrot.slane %v4258_v38, 2  ;;  %v5620_v38 = vld [vmem:[#allocation11_spill] sm:$0xff] }
  0xb9   : > { %v1571_v1 = vsel %vm1495_vm4, %v1561_v2, %v1570_v50  ;;  %v1863_v44 = vrot.slane %v5620_v38, 2 }
  0xba   : > { %v1862_v2 = vsel %vm1853_vm5, %v1859_v12, %v1861_v27 }
  0xbb   : > { %3856 = vmatmul.mubr.msk.bf16.gmra.mxu0 %vm480_vm2, %v1554_v24  ;;  %v1580_v24 = vsel %vm1495_vm4, %v1570_v50, %v1579_v5  ;;  %v1864_v48 = vsel %vm1853_vm5, %v1861_v27, %v1863_v44  ;;  %v5622_v50 = vld [vmem:[#allocation18_spill] sm:$0xff] }
  0xbc   : > { %3859 = vmatprep.mubr.msk.bf16.mxu0 %vm480_vm2, %v1558_v40  ;;  %v1860_v40 = vsel %vm1853_vm5, %v1857_v15, %v1859_v12 }
  0xbd   : > { %3822 = vmatmul.mubr.msk.bf16.gmra.mxu1 %vm480_vm2, %v4606_v10  ;;  %v1270_v10 = vsel %vm953_vm3, %v5619_v61, %v1269_v54  ;;  %v1867_v54 = vrot.slane %v5622_v50, 2 }
  0xbe   : > { %3825 = vmatprep.mubr.msk.bf16.mxu1 %vm480_vm2, %v4497_v32  ;;  %v1856_v32 = vsel %vm1853_vm5, %v1854_v25, %v1855_v8  ;;  %v1866_v25 = vsel %vm1853_vm5, %v1863_v44, %v1865_v58  ;;  %v5629_v44 = vld [vmem:[#allocation3_spill] sm:$0xff] }
  0xbf   : > { %v1868_v8 = vsel %vm1853_vm5, %v1865_v58, %v1867_v54  ;;  %v5631_v58 = vld [vmem:[#allocation5_spill] sm:$0xff] }
  0xc0   : > { %v1875_v50 = vrot.slane %v5631_v58, 2 }
  0xc3   : > { %3860 = vmatmul.mubr.msk.bf16.gmra.mxu0 %vm480_vm2, %v1562_v45 }
  0xc4   : > { %3863 = vmatprep.mubr.msk.bf16.mxu0 %vm480_vm2, %v1571_v1  ;;  %v1869_v1 = vrot.slane %v5623_v62, 2 }
  0xc5   : > { %3826 = vmatmul.mubr.msk.bf16.gmra.mxu1 %vm480_vm2, %v1270_v10 }
  0xc6   : > { %3869 = vmatprep.mubr.msk.bf16.mxu1 %vm480_vm2, %v1856_v32  ;;  %v5625_v32 = vld [vmem:[#allocation2_spill] sm:$0xff] }
  0xc7   : > { %v1871_v5 = vrot.slane %v5625_v32, 2 }
  0xcb   : > { %3864 = vmatmul.mubr.msk.bf16.gmra.mxu0 %vm480_vm2, %v1580_v24  ;;  %v1870_v24 = vsel %vm1853_vm5, %v1867_v54, %v1869_v1 }
  0xcc   : > { %3907 = vmatprep.mubr.msk.bf16.mxu0 %vm480_vm2, %v1858_v6 }
  0xcd   : > { %3870 = vmatmul.mubr.msk.bf16.vlgmr.msra.gmra.mxu1 %vm480_vm2, %v1858_v6 }
  0xce   : > { %3944 = vmatpush3.bf16.msra.mxu1 %v2536_v36  ;;  %3873 = vmatprep.mubr.msk.bf16.mxu1 %vm480_vm2, %v1860_v40 }
  0xd3   : > { %3908 = vmatmul.mubr.msk.bf16.vlgmr.msra.gmra.mxu0 %vm480_vm2, %v1860_v40  ;;  %v1872_v40 = vsel %vm1853_vm5, %v1869_v1, %v1871_v5 }
  0xd4   : > { %3982 = vmatpush3.bf16.msra.mxu0 %v2846_v9  ;;  %3911 = vmatprep.mubr.msk.bf16.mxu0 %vm480_vm2, %v1862_v2  ;;  %v1873_v9 = vrot.slane %v5629_v44, 2 }
  0xd5   : > { %3874 = vmatmul.mubr.msk.bf16.gmra.mxu1 %vm480_vm2, %v1862_v2 }
  0xd6   : > { %3877 = vmatprep.mubr.msk.bf16.mxu1 %vm480_vm2, %v1864_v48 }
  0xdb   : > { %v4789_v26 = vpop.f32.mrf.mxu0  ;;  %3912 = vmatmul.mubr.msk.bf16.gmra.mxu0 %vm480_vm2, %v1864_v48 }
  0xdc   : > { %3915 = vmatprep.mubr.msk.bf16.mxu0 %vm480_vm2, %v1866_v25  ;;  %v4794_v45 = vpop.f32.mrf.mxu1 }
  0xdd   : > { %3878 = vmatmul.mubr.msk.bf16.gmra.mxu1 %vm480_vm2, %v1866_v25  ;;  %v4797_v28 = vpop.f32.mrf.mxu0 }
  0xde   : > { %3881 = vmatprep.mubr.msk.bf16.mxu1 %vm480_vm2, %v1868_v8  ;;  %v4801_v61 = vpop.f32.mrf.mxu1 }
  0xdf   : > { %5624 = vst [vmem:[#allocation11_spill] sm:$0xff] %v4801_v61  ;;  %v4803_v10 = vpop.f32.mrf.mxu0  ;;  %v5646_v61 = vld [vmem:[#allocation4_spill] sm:$0xff] }
  0xe0   : > { %v4806_v15 = vpop.f32.mrf.mxu1 }
  0xe1   : > { %5626 = vst [vmem:[#allocation14_spill] sm:$0xff] %v4806_v15  ;;  %v4808_v12 = vpop.f32.mrf.mxu0 }
  0xe2   : > { %v4811_v6 = vpop.f32.mrf.mxu1 }
  0xe3   : > { %5627 = vst [vmem:[#allocation18_spill] sm:$0xff] %v4811_v6  ;;  %v4813_v36 = vpop.f32.mrf.mxu0  ;;  %3916 = vmatmul.mubr.msk.bf16.gmra.mxu0 %vm480_vm2, %v1868_v8  ;;  %v1874_v8 = vsel %vm1853_vm5, %v1871_v5, %v1873_v9  ;;  %v1877_v5 = vrot.slane %v5635_v63, 2  ;;  %v5645_v6 = vld [vmem:[#allocation6_spill] sm:$0xff] }
  0xe4   : > { %3919 = vmatprep.mubr.msk.bf16.mxu0 %vm480_vm2, %v1870_v24  ;;  %v4818_v27 = vpop.f32.mrf.mxu1  ;;  %v2396_v15 = vrot.slane %v5645_v6, 2 }
  0xe5   : > { %5628 = vst [vmem:[#allocation21_spill] sm:$0xff] %v4818_v27  ;;  %3882 = vmatmul.mubr.msk.bf16.gmra.mxu1 %vm480_vm2, %v1870_v24  ;;  %v4821_v38 = vpop.f32.mrf.mxu0  ;;  %v1876_v24 = vsel %vm1853_vm5, %v1873_v9, %v1875_v50  ;;  %v1878_v43 = vsel %vm1853_vm5, %v1875_v50, %v1877_v5  ;;  %v1881_v50 = vrot.slane %v4310_v60, 2 }
  0xe6   : > { %3885 = vmatprep.mubr.msk.bf16.mxu1 %vm480_vm2, %v1872_v40  ;;  %v4825_v2 = vpop.f32.mrf.mxu1 }
  0xe7   : > { %5630 = vst [vmem:[#allocation2_spill] sm:$0xff] %v4825_v2  ;;  %v4827_v48 = vpop.f32.mrf.mxu0 }
  0xe8   : > { %v4830_v54 = vpop.f32.mrf.mxu1 }
  0xe9   : > { %5632 = vst [vmem:[#allocation3_spill] sm:$0xff] %v4830_v54  ;;  %v4832_v25 = vpop.f32.mrf.mxu0 }
  0xea   : > { %v4835_v1 = vpop.f32.mrf.mxu1 }
  0xeb   : > { %5633 = vst [vmem:[#allocation5_spill] sm:$0xff] %v4835_v1  ;;  %v4837_v32 = vpop.f32.mrf.mxu0  ;;  %3920 = vmatmul.mubr.msk.bf16.gmra.mxu0 %vm480_vm2, %v1872_v40  ;;  %v1879_v40 = vrot.slane %v5637_v39, 2  ;;  %v5642_v1 = vld [vmem:[#allocation13_spill] sm:$0xff] }
  0xec   : > { %3923 = vmatprep.mubr.msk.bf16.mxu0 %vm480_vm2, %v1874_v8  ;;  %v4842_v44 = vpop.f32.mrf.mxu1 }
  0xed   : > { %5634 = vst [vmem:[#allocation24_spill] sm:$0xff] %v4842_v44  ;;  %3886 = vmatmul.mubr.msk.bf16.gmra.mxu1 %vm480_vm2, %v1874_v8  ;;  %v4845_v58 = vpop.f32.mrf.mxu0  ;;  %v1880_v63 = vsel %vm1853_vm5, %v1877_v5, %v1879_v40 }
  0xee   : > { %3889 = vmatprep.mubr.msk.bf16.mxu1 %vm480_vm2, %v1876_v24  ;;  %v4849_v56 = vpop.f32.mrf.mxu1 }
  0xef   : > { %5636 = vst [vmem:[#allocation7_spill] sm:$0xff] %v4849_v56  ;;  %v4851_v4 = vpop.f32.mrf.mxu0 }
  0xf0   : > { %v4854_v22 = vpop.f32.mrf.mxu1 }
  0xf1   : > { %5638 = vst [vmem:[#allocation9_spill] sm:$0xff] %v4854_v22  ;;  %v4856_v9 = vpop.f32.mrf.mxu0 }
  0xf2   : > { %v4859_v44 = vpop.f32.mrf.mxu1 }
  0xf3   : > { %5639 = vst [vmem:[#allocation25_spill] sm:$0xff] %v4859_v44  ;;  %v4861_v8 = vpop.f32.mrf.mxu0  ;;  %3924 = vmatmul.mubr.msk.bf16.gmra.mxu0 %vm480_vm2, %v1876_v24  ;;  %v1883_v24 = vrot.slane %v5642_v1, 2 }
  0xf4   : > { %3927 = vmatprep.mubr.msk.bf16.mxu0 %vm480_vm2, %v1878_v43  ;;  %v4866_v56 = vpop.f32.mrf.mxu1 }
  0xf5   : > { %5640 = vst [vmem:[#allocation26_spill] sm:$0xff] %v4866_v56  ;;  %3890 = vmatmul.mubr.msk.bf16.gmra.mxu1 %vm480_vm2, %v1878_v43  ;;  %v4869_v39 = vpop.f32.mrf.mxu0  ;;  %v1882_v56 = vsel %vm1853_vm5, %v1879_v40, %v1881_v50  ;;  %v1884_v60 = vsel %vm1853_vm5, %v1881_v50, %v1883_v24  ;;  %v1885_v40 = vrot.slane %v4352_v33, 2 }
  0xf6   : > { %3893 = vmatprep.mubr.msk.bf16.mxu1 %vm480_vm2, %v1880_v63  ;;  %v4873_v22 = vpop.f32.mrf.mxu1 }
  0xf7   : > { %5641 = vst [vmem:[#allocation27_spill] sm:$0xff] %v4873_v22  ;;  %v4875_v44 = vpop.f32.mrf.mxu0 }
  0xf8   : > { %v4878_v5 = vpop.f32.mrf.mxu1 }
  0xf9   : > { %5643 = vst [vmem:[#allocation13_spill] sm:$0xff] %v4878_v5  ;;  %v4880_v54 = vpop.f32.mrf.mxu0 }
  0xfa   : > { %v4883_v43 = vpop.f32.mrf.mxu1 }
  0xfb   : > { %5644 = vst [vmem:[#allocation28_spill] sm:$0xff] %v4883_v43  ;;  %v4885_v2 = vpop.f32.mrf.mxu0  ;;  %3928 = vmatmul.mubr.msk.bf16.gmra.mxu0 %vm480_vm2, %v1880_v63  ;;  %v1887_v43 = vrot.slane %v4468_v30, 2 }
  0xfc   : > { %3931 = vmatprep.mubr.msk.bf16.mxu0 %vm480_vm2, %v1882_v56  ;;  %v3719_v22 = vpop.f32.mrf.mxu1 }
  0xfd   : > { %3894 = vmatmul.mubr.msk.bf16.gmra.mxu1 %vm480_vm2, %v1882_v56  ;;  %v4891_v1 = vpop.f32.mrf.mxu0  ;;  %v798_v5 = vadd.f32 %v3719_v22, %v4789_v26  ;;  %v4904_v56 = vcombine.low %v4730_v11, %v266_v55  ;;  %v1886_v26 = vsel %vm1853_vm5, %v1883_v24, %v1885_v40  ;;  %v1888_v33 = vsel %vm1853_vm5, %v1885_v40, %v1887_v43  ;;  %v4929_v40 = vld [vmem:[%s4180_s28 + $0xa0] ss:$0 sps:$4 sm:$0xff]  }
  0xfe   : > { %3897 = vmatprep.mubr.msk.bf16.mxu1 %vm480_vm2, %v1884_v60  ;;  %v789_v21 = vpop.f32.mrf.mxu1  ;;  %v1890_v23 = vsel %vm1853_vm5, %v1887_v43, %v1889_v35  ;;  %v4081_v35 = vld [vmem:[%s4180_s28 + $0x18] sm:$0xff]  }
  0xff   : > { %v4898_v63 = vpop.f32.mrf.mxu0  ;;  %v790_v50 = vadd.f32 %v789_v21, %v4797_v28  ;;  %v2397_v21 = vrot.slane %v5646_v61, 3  ;;  %v2399_v28 = vrot.slane %v4264_v42, 2  ;;  %v2167_v24 = vrot.slane %v4904_v56, 2 }
 0x100   : > { %v3720_v27 = vpop.f32.mrf.mxu1 }
 0x101   : > { %v4901_v57 = vpop.f32.mrf.mxu0  ;;  %v801_v22 = vadd.f32 %v3720_v27, %v4803_v10 }
 0x102   : > { %v792_v0 = vpop.f32.mrf.mxu1 }
 0x103   : > { %v3757_v30 = vpop.f32.mrf.mxu0  ;;  %3932 = vmatmul.mubr.msk.bf16.gmra.mxu0 %vm480_vm2, %v1884_v60  ;;  %v793_v55 = vadd.f32 %v792_v0, %v4808_v12  ;;  %v2401_v12 = vor.u32 %v2400_v46, %v2399_v28 }
 0x104   : > { %v4915_v11 = vadd.f32 %v3757_v30, %v798_v5  ;;  %3935 = vmatprep.mubr.msk.bf16.mxu0 %vm480_vm2, %v1886_v26  ;;  %v2398_v30 = vor.u32 %v2397_v21, %v2396_v15  ;;  %v2408_v21 = vrot.slane %v4307_v59, 3 }
 0x105   : > { %v3723_v10 = vpop.f32.mrf.mxu1  ;;  %3898 = vmatmul.mubr.msk.bf16.gmra.mxu1 %vm480_vm2, %v1886_v26  ;;  %v1082_v27 = vpop.f32.mrf.mxu0 }
 0x106   : > { %5647 = vst [vmem:[#allocation6_spill] sm:$0xff] %v4915_v11  ;;  %v814_v6 = vadd.f32 %v3723_v10, %v4813_v36  ;;  %v4921_v61 = vadd.f32 %v1082_v27, %v790_v50  ;;  %3901 = vmatprep.mubr.msk.bf16.mxu1 %vm480_vm2, %v1888_v33  ;;  %v2168_v36 = vsel %vm1853_vm5, %v1887_v43, %v2167_v24 }
 0x107   : > { %v805_v42 = vpop.f32.mrf.mxu1  ;;  %v3758_v0 = vpop.f32.mrf.mxu0 }
 0x108   : > { %v806_v5 = vadd.f32 %v805_v42, %v4821_v38  ;;  %v4926_v60 = vadd.f32 %v3758_v0, %v801_v22  ;;  %v2402_v38 = vsel %vm2395_vm6, %v2398_v30, %v2401_v12  ;;  %v2407_v22 = vrot.slane %v4337_v14, 2 }
 0x109   : > { %v3724_v26 = vpop.f32.mrf.mxu1  ;;  %v1085_v11 = vpop.f32.mrf.mxu0  ;;  %v2755_v42 = vrot.slane %v4081_v35, 3 }
 0x10a   : > { %v817_v50 = vadd.f32 %v3724_v26, %v4827_v48  ;;  %v4933_v10 = vadd.f32 %v1085_v11, %v793_v55  ;;  %v2169_v48 = vrot.slane %v4929_v40, 2  ;;  %v4080_v11 = vld [vmem:[%s4180_s28 + $0x10] sm:$0xff]  }
 0x10b   : > { %v808_v46 = vpop.f32.mrf.mxu1  ;;  %v3761_v15 = vpop.f32.mrf.mxu0  ;;  %3936 = vmatmul.mubr.msk.bf16.gmra.mxu0 %vm480_vm2, %v1888_v33  ;;  %v2754_v33 = vrot.slane %v4080_v11, 3 }
 0x10c   : > { %v809_v28 = vadd.f32 %v808_v46, %v4832_v25  ;;  %v4941_v27 = vadd.f32 %v3761_v15, %v814_v6  ;;  %3939 = vmatprep.mubr.msk.bf16.mxu0 %vm480_vm2, %v2168_v36  ;;  %v2409_v6 = vor.u32 %v2408_v21, %v2407_v22  ;;  %v2170_v36 = vsel %vm1853_vm5, %v2167_v24, %v2169_v48 }
 0x10d   : > { %v3727_v43 = vpop.f32.mrf.mxu1  ;;  %3902 = vmatmul.mubr.msk.bf16.gmra.mxu1 %vm480_vm2, %v1890_v23  ;;  %v1098_v55 = vpop.f32.mrf.mxu0  ;;  %v2756_v15 = vsel %vm2753_vm7, %v2754_v33, %v2755_v42  ;;  %v2415_v21 = vrot.slane %v4392_v29, 2  ;;  %v2759_v33 = vrot.slane %v4290_v52, 3 }
 0x10e   : > { %v830_v14 = vadd.f32 %v3727_v43, %v4837_v32  ;;  %v4949_v0 = vadd.f32 %v1098_v55, %v806_v5  ;;  %3945 = vmatprep.mubr.msk.bf16.mxu1 %vm480_vm2, %v2402_v38  ;;  %v2411_v32 = vrot.slane %v4359_v41, 2  ;;  %v2412_v5 = vrot.slane %v4340_v16, 3 }
 0x10f   : > { %v821_v59 = vpop.f32.mrf.mxu1  ;;  %v3762_v25 = vpop.f32.mrf.mxu0  ;;  %v2410_v24 = vsel %vm2395_vm6, %v4671_v13, %v2409_v6  ;;  %v2416_v41 = vrot.slane %v4367_v49, 3 }
 0x110   : > { %v822_v30 = vadd.f32 %v821_v59, %v4845_v58  ;;  %v4953_v26 = vadd.f32 %v3762_v25, %v817_v50  ;;  %v2406_v58 = vsel %vm2395_vm6, %v2401_v12, %v4671_v13  ;;  %v2413_v11 = vor.u32 %v2412_v5, %v2411_v32 }
 0x111   : > { %v3728_v23 = vpop.f32.mrf.mxu1  ;;  %v1101_v46 = vpop.f32.mrf.mxu0  ;;  %v2417_v35 = vor.u32 %v2416_v41, %v2415_v21  ;;  %v2420_v32 = vrot.slane %v4388_v7, 3 }
 0x112   : > { %v833_v38 = vadd.f32 %v3728_v23, %v4851_v4  ;;  %v4960_v43 = vadd.f32 %v1101_v46, %v809_v28  ;;  %v4082_v4 = vld [vmem:[%s4180_s28 + $0x20] sm:$0xff]   ;;  %v2414_v52 = vsel %vm2395_vm6, %v2409_v6, %v2413_v11  ;;  %v2424_v6 = vrot.slane %v4403_v53, 3 }
 0x113   : > { %v824_v50 = vpop.f32.mrf.mxu1  ;;  %v3765_v22 = vpop.f32.mrf.mxu0  ;;  %3940 = vmatmul.mubr.msk.bf16.gmra.mxu0 %vm480_vm2, %v2170_v36  ;;  %v2757_v28 = vrot.slane %v4082_v4, 3 }
 0x114   : > { %v825_v16 = vadd.f32 %v824_v50, %v4856_v9  ;;  %v4970_v48 = vadd.f32 %v3765_v22, %v830_v14  ;;  %3983 = vmatprep.mubr.msk.bf16.mxu0 %vm480_vm2, %v2756_v15  ;;  %v2419_v15 = vrot.slane %v4396_v34, 2 }
 0x115   : > { %v3731_v12 = vpop.f32.mrf.mxu1  ;;  %3946 = vmatmul.mubr.msk.bf16.vlgmr.msra.gmra.mxu1 %vm480_vm2, %v2406_v58  ;;  %v1114_v55 = vpop.f32.mrf.mxu0  ;;  %v2758_v25 = vsel %vm2753_vm7, %v2755_v42, %v2757_v28  ;;  %v2418_v42 = vsel %vm2395_vm6, %v2413_v11, %v2417_v35 }
 0x116   : > { %v846_v13 = vadd.f32 %v3731_v12, %v4861_v8  ;;  %v4977_v29 = vadd.f32 %v1114_v55, %v822_v30  ;;  %3949 = vmatprep.mubr.msk.bf16.mxu1 %vm480_vm2, %v2410_v24  ;;  %v2760_v8 = vsel %vm2753_vm7, %v2757_v28, %v2759_v33  ;;  %v2763_v24 = vrot.slane %v5621_v47, 3 }
 0x117   : > { %v837_v49 = vpop.f32.mrf.mxu1  ;;  %v3766_v9 = vpop.f32.mrf.mxu0  ;;  %v2421_v53 = vor.u32 %v2420_v32, %v2419_v15  ;;  %v2767_v15 = vrot.slane %v5623_v62, 3 }
 0x118   : > { %v838_v14 = vadd.f32 %v837_v49, %v4869_v39  ;;  %v4981_v59 = vadd.f32 %v3766_v9, %v833_v38  ;;  %v2423_v38 = vrot.slane %v4417_v3, 2 }
 0x119   : > { %v3732_v36 = vpop.f32.mrf.mxu1  ;;  %v1117_v23 = vpop.f32.mrf.mxu0 }
 0x11a   : > { %v849_v30 = vadd.f32 %v3732_v36, %v4875_v44  ;;  %v4987_v46 = vadd.f32 %v1117_v23, %v825_v16  ;;  %v4083_v44 = vld [vmem:[%s4180_s28 + $0x30] sm:$0xff]   ;;  %v2425_v16 = vor.u32 %v2424_v6, %v2423_v38  ;;  %v2431_v36 = vrot.slane %v4215_v20, 2 }
 0x11b   : > { %v840_v39 = vpop.f32.mrf.mxu1  ;;  %v3769_v5 = vpop.f32.mrf.mxu0  ;;  %3984 = vmatmul.mubr.msk.bf16.vlgmr.msra.gmra.mxu0 %vm480_vm2, %v2758_v25  ;;  %v2761_v34 = vrot.slane %v4083_v44, 3  ;;  %v2432_v23 = vrot.slane %v4212_v19, 3 }
 0x11c   : > { %v841_v58 = vadd.f32 %v840_v39, %v4880_v54  ;;  %v4996_v50 = vadd.f32 %v3769_v5, %v846_v13  ;;  %3987 = vmatprep.mubr.msk.bf16.mxu0 %vm480_vm2, %v2760_v8  ;;  %v2428_v13 = vrot.slane %v4206_v17, 3  ;;  %v4084_v17 = vld [vmem:[%s4180_s28 + $0x40] sm:$0xff]  }
 0x11d   : > { %v3735_v22 = vpop.f32.mrf.mxu1  ;;  %3950 = vmatmul.mubr.msk.bf16.gmra.mxu1 %vm480_vm2, %v2414_v52  ;;  %v1130_v7 = vpop.f32.mrf.mxu0  ;;  %v2762_v12 = vsel %vm2753_vm7, %v2759_v33, %v2761_v34  ;;  %v2764_v47 = vsel %vm2753_vm7, %v2761_v34, %v2763_v24  ;;  %v2426_v33 = vsel %vm2395_vm6, %v2421_v53, %v2425_v16  ;;  %v2435_v34 = vrot.slane %v4255_v37, 2  ;;  %v4085_v37 = vld [vmem:[%s4180_s28 + $0x50] sm:$0xff]  }
 0x11e   : > { %v862_v21 = vadd.f32 %v3735_v22, %v4885_v2  ;;  %v5003_v41 = vadd.f32 %v1130_v7, %v838_v14  ;;  %3953 = vmatprep.mubr.msk.bf16.mxu1 %vm480_vm2, %v2418_v42  ;;  %v2427_v2 = vrot.slane %v4209_v18, 2  ;;  %v2422_v14 = vsel %vm2395_vm6, %v2417_v35, %v2421_v53 }
 0x11f   : > { %v853_v3 = vpop.f32.mrf.mxu1  ;;  %v3770_v54 = vpop.f32.mrf.mxu0  ;;  %v2436_v22 = vrot.slane %v4236_v31, 3  ;;  %v2439_v53 = vrot.slane %v4287_v51, 2 }
 0x120   : > { %v854_v4 = vadd.f32 %v853_v3, %v4891_v1  ;;  %v5007_v28 = vadd.f32 %v3770_v54, %v849_v30  ;;  %v2429_v30 = vor.u32 %v2428_v13, %v2427_v2  ;;  %v5648_v3 = vld [vmem:[#allocation8_spill] sm:$0xff]  ;;  %v5650_v2 = vld [vmem:[#allocation14_spill] sm:$0xff] }
 0x121   : > { %v3736_v55 = vpop.f32.mrf.mxu1  ;;  %v1133_v11 = vpop.f32.mrf.mxu0  ;;  %v2440_v54 = vrot.slane %v5648_v3, 3  ;;  %v2437_v51 = vor.u32 %v2436_v22, %v2435_v34  ;;  %v5655_v34 = vld [vmem:[#allocation16_spill] sm:$0xff] }
 0x122   : > { %v865_v49 = vadd.f32 %v3736_v55, %v4898_v63  ;;  %v5014_v9 = vadd.f32 %v1133_v11, %v841_v58  ;;  %v2765_v63 = vrot.slane %v4084_v17, 3  ;;  %v2430_v6 = vsel %vm2395_vm6, %v2425_v16, %v2429_v30  ;;  %v5649_v16 = vld [vmem:[#allocation11_spill] sm:$0xff]  ;;  %v4086_v11 = vld [vmem:[%s4180_s28 + $0x58] sm:$0xff]  }
 0x123   : > { %v856_v1 = vpop.f32.mrf.mxu1  ;;  %v3773_v25 = vpop.f32.mrf.mxu0  ;;  %3988 = vmatmul.mubr.msk.bf16.gmra.mxu0 %vm480_vm2, %v2762_v12  ;;  %v2769_v12 = vrot.slane %v4085_v37, 3  ;;  %v2447_v22 = vrot.slane %v5655_v34, 2  ;;  %v5663_v34 = vld [vmem:[#allocation22_spill] sm:$0xff] }
 0x124   : > { %v857_v18 = vadd.f32 %v856_v1, %v4901_v57  ;;  %v5022_v52 = vadd.f32 %v3773_v25, %v862_v21  ;;  %3991 = vmatprep.mubr.msk.bf16.mxu0 %vm480_vm2, %v2764_v47  ;;  %v2433_v57 = vor.u32 %v2432_v23, %v2431_v36  ;;  %v2766_v5 = vsel %vm2753_vm7, %v2763_v24, %v2765_v63 }
 0x125   : > { %v3739_v8 = vpop.f32.mrf.mxu1  ;;  %3954 = vmatmul.mubr.msk.bf16.gmra.mxu1 %vm480_vm2, %v2422_v14  ;;  %v1146_v35 = vpop.f32.mrf.mxu0  ;;  %v2768_v58 = vsel %vm2753_vm7, %v2765_v63, %v2767_v15  ;;  %v2771_v47 = vrot.slane %v4086_v11, 3  ;;  %v2441_v25 = vor.u32 %v2440_v54, %v2439_v53  ;;  %v4087_v54 = vld [vmem:[%s4180_s28 + $0x60] sm:$0xff]  }
 0x126   : > { %v5028_v32 = vadd.f32 %v1146_v35, %v854_v4  ;;  %3957 = vmatprep.mubr.msk.bf16.mxu1 %vm480_vm2, %v2426_v33  ;;  %v878_v62 = vadd.f32 %v3739_v8, %v4794_v45  ;;  %v2434_v24 = vsel %vm2395_vm6, %v2429_v30, %v2433_v57  ;;  %v5651_v33 = vld [vmem:[#allocation18_spill] sm:$0xff]  ;;  %v5652_v35 = vld [vmem:[#allocation12_spill] sm:$0xff] }
 0x127   : > { %v869_v19 = vpop.f32.mrf.mxu1  ;;  %v3774_v20 = vpop.f32.mrf.mxu0  ;;  %v2772_v8 = vsel %vm2753_vm7, %v2769_v12, %v2771_v47  ;;  %v2443_v30 = vrot.slane %v5652_v35, 2 }
 0x128   : > { %v5031_v39 = vadd.f32 %v3774_v20, %v865_v49  ;;  %v870_v4 = vadd.f32 %v869_v19, %v5649_v16  ;;  %v5653_v19 = vld [vmem:[#allocation10_spill] sm:$0xff]  ;;  %v2773_v16 = vrot.slane %v4087_v54, 3  ;;  %v4089_v54 = vld [vmem:[%s4180_s28 + $0x70] sm:$0xff]  }
 0x129   : > { %v3740_v42 = vpop.f32.mrf.mxu1  ;;  %v1149_v38 = vpop.f32.mrf.mxu0  ;;  %v2444_v20 = vrot.slane %v5653_v19, 3 }
 0x12a   : > { %v5037_v44 = vadd.f32 %v1149_v38, %v857_v18  ;;  %v881_v13 = vadd.f32 %v3740_v42, %v5650_v2  ;;  %v2770_v18 = vsel %vm2753_vm7, %v2767_v15, %v2769_v12  ;;  %v2442_v15 = vsel %vm2395_vm6, %v2437_v51, %v2441_v25  ;;  %v4088_v12 = vld [vmem:[%s4180_s28 + $0x68] sm:$0xff]  }
 0x12b   : > { %v872_v7 = vpop.f32.mrf.mxu1  ;;  %v3777_v21 = vpop.f32.mrf.mxu0  ;;  %3992 = vmatmul.mubr.msk.bf16.gmra.mxu0 %vm480_vm2, %v2766_v5  ;;  %v5654_v5 = vld [vmem:[#allocation21_spill] sm:$0xff]  ;;  %v2445_v37 = vor.u32 %v2444_v20, %v2443_v30  ;;  %v5660_v30 = vld [vmem:[#allocation24_spill] sm:$0xff] }
 0x12c   : > { %v5046_v45 = vadd.f32 %v3777_v21, %v878_v62  ;;  %3995 = vmatprep.mubr.msk.bf16.mxu0 %vm480_vm2, %v2768_v58  ;;  %v873_v36 = vadd.f32 %v872_v7, %v5651_v33  ;;  %v5656_v7 = vld [vmem:[#allocation15_spill] sm:$0xff] }
 0x12d   : > { %v3743_v55 = vpop.f32.mrf.mxu1  ;;  %3958 = vmatmul.mubr.msk.bf16.gmra.mxu1 %vm480_vm2, %v2430_v6  ;;  %v1162_v31 = vpop.f32.mrf.mxu0  ;;  %v2438_v6 = vsel %vm2395_vm6, %v2433_v57, %v2437_v51  ;;  %v2448_v21 = vrot.slane %v5656_v7, 3  ;;  %v2446_v35 = vsel %vm2395_vm6, %v2441_v25, %v2445_v37  ;;  %v5664_v25 = vld [vmem:[#allocation20_spill] sm:$0xff] }
 0x12e   : > { %v5053_v49 = vadd.f32 %v1162_v31, %v870_v4  ;;  %3961 = vmatprep.mubr.msk.bf16.mxu1 %vm480_vm2, %v2434_v24  ;;  %v894_v42 = vadd.f32 %v3743_v55, %v5654_v5  ;;  %v5657_v24 = vld [vmem:[#allocation2_spill] sm:$0xff]  ;;  %v2775_v55 = vrot.slane %v4088_v12, 3  ;;  %v5658_v31 = vld [vmem:[#allocation3_spill] sm:$0xff]  ;;  %v2456_v7 = vrot.slane %v5664_v25, 3  ;;  %v4090_v12 = vld [vmem:[%s4180_s28 + $0x78] sm:$0xff]  }
 0x12f   : > { %v885_v14 = vpop.f32.mrf.mxu1  ;;  %v3778_v1 = vpop.f32.mrf.mxu0  ;;  %v5661_v5 = vld [vmem:[#allocation19_spill] sm:$0xff]  ;;  %v5671_v25 = vld [vmem:[#allocation26_spill] sm:$0xff] }
 0x130   : > { %v5057_v23 = vadd.f32 %v3778_v1, %v881_v13  ;;  %v886_v53 = vadd.f32 %v885_v14, %v5657_v24  ;;  %v2449_v14 = vor.u32 %v2448_v21, %v2447_v22  ;;  %v5659_v1 = vld [vmem:[#allocation5_spill] sm:$0xff]  ;;  %v2455_v22 = vrot.slane %v5663_v34, 2  ;;  %v5665_v21 = vld [vmem:[#allocation7_spill] sm:$0xff] }
 0x131   : > { %v3744_v17 = vpop.f32.mrf.mxu1  ;;  %v1165_v63 = vpop.f32.mrf.mxu0 }
 0x132   : > { %v5064_v38 = vadd.f32 %v1165_v63, %v873_v36  ;;  %v897_v11 = vadd.f32 %v3744_v17, %v5658_v31  ;;  %v2776_v17 = vsel %vm2753_vm7, %v2773_v16, %v2775_v55  ;;  %v2779_v31 = vrot.slane %v4090_v12, 3  ;;  %v5672_v12 = vld [vmem:[#allocation27_spill] sm:$0xff] }
 0x133   : > { %v888_v58 = vpop.f32.mrf.mxu1  ;;  %v3781_v62 = vpop.f32.mrf.mxu0  ;;  %3996 = vmatmul.mubr.msk.bf16.gmra.mxu0 %vm480_vm2, %v2770_v18  ;;  %v2774_v18 = vsel %vm2753_vm7, %v2771_v47, %v2773_v16  ;;  %v2450_v47 = vsel %vm2395_vm6, %v2445_v37, %v2449_v14  ;;  %v2777_v16 = vrot.slane %v4089_v54, 3 }
 0x134   : > { %v5072_v3 = vadd.f32 %v3781_v62, %v894_v42  ;;  %3999 = vmatprep.mubr.msk.bf16.mxu0 %vm480_vm2, %v2772_v8  ;;  %v889_v33 = vadd.f32 %v888_v58, %v5659_v1  ;;  %v2451_v42 = vrot.slane %v5661_v5, 2 }
 0x135   : > { %v3747_v57 = vpop.f32.mrf.mxu1  ;;  %3962 = vmatmul.mubr.msk.bf16.gmra.mxu1 %vm480_vm2, %v2438_v6  ;;  %v1178_v4 = vpop.f32.mrf.mxu0  ;;  %v5662_v6 = vld [vmem:[#allocation17_spill] sm:$0xff]  ;;  %v2778_v5 = vsel %vm2753_vm7, %v2775_v55, %v2777_v16 }
 0x136   : > { %v5079_v2 = vadd.f32 %v1178_v4, %v886_v53  ;;  %3965 = vmatprep.mubr.msk.bf16.mxu1 %vm480_vm2, %v2442_v15  ;;  %v910_v19 = vadd.f32 %v3747_v57, %v5660_v30  ;;  %v2452_v58 = vrot.slane %v5662_v6, 3  ;;  %v5667_v30 = vld [vmem:[#allocation25_spill] sm:$0xff] }
 0x137   : > { %v901_v13 = vpop.f32.mrf.mxu1  ;;  %v3782_v51 = vpop.f32.mrf.mxu0 }
 0x138   : > { %v5083_v36 = vadd.f32 %v3782_v51, %v897_v11  ;;  %v902_v24 = vadd.f32 %v901_v13, %v5665_v21  ;;  %v5666_v11 = vld [vmem:[#allocation9_spill] sm:$0xff]  ;;  %v2453_v1 = vor.u32 %v2452_v58, %v2451_v42 }
 0x139   : > { %v3748_v63 = vpop.f32.mrf.mxu1  ;;  %v1181_v8 = vpop.f32.mrf.mxu0 }
 0x13a   : > { %v5089_v20 = vadd.f32 %v1181_v8, %v889_v33  ;;  %v913_v37 = vadd.f32 %v3748_v63, %v5666_v11  ;;  %v2464_v8 = vshrl.u32 %v4904_v56, 16 }
 0x13b   : > { %v904_v62 = vpop.f32.mrf.mxu1  ;;  %v3785_v15 = vpop.f32.mrf.mxu0  ;;  %4000 = vmatmul.mubr.msk.bf16.gmra.mxu0 %vm480_vm2, %v2774_v18  ;;  %v2457_v18 = vor.u32 %v2456_v7, %v2455_v22 }
 0x13c   : > { %v5098_v53 = vadd.f32 %v3785_v15, %v910_v19  ;;  %4003 = vmatprep.mubr.msk.bf16.mxu0 %vm480_vm2, %v2776_v17  ;;  %v2467_v17 = vshll.u32 %v4904_v56, 16  ;;  %v905_v19 = vadd.f32 %v904_v62, %v5667_v30  ;;  %v2780_v15 = vsel %vm2753_vm7, %v2777_v16, %v2779_v31 }
 0x13d   : > { %v3751_v57 = vpop.f32.mrf.mxu1  ;;  %3966 = vmatmul.mubr.msk.bf16.gmra.mxu1 %vm480_vm2, %v2446_v35  ;;  %v1194_v4 = vpop.f32.mrf.mxu0  ;;  %v2454_v62 = vsel %vm2395_vm6, %v2449_v14, %v2453_v1  ;;  %v2458_v54 = vsel %vm2395_vm6, %v2453_v1, %v2457_v18  ;;  %v2466_v16 = vrot.slane %v2464_v8, 2  ;;  %v5673_v1 = vld [vmem:[#allocation13_spill] sm:$0xff] }
 0x13e   : > { %v5105_v51 = vadd.f32 %v1194_v4, %v902_v24  ;;  %3969 = vmatprep.mubr.msk.bf16.mxu1 %vm480_vm2, %v2450_v47  ;;  %v5668_v47 = vld [vmem:[#allocation23_spill] sm:$0xff]  ;;  %v926_v7 = vadd.f32 %v3751_v57, %v5671_v25  ;;  %v2469_v4 = vrot.slane %v2467_v17, 3  ;;  %v4091_v57 = vld [vmem:[%s4180_s28 + $0x80] sm:$0xff]  }
 0x13f   : > { %v917_v13 = vpop.f32.mrf.mxu1  ;;  %v3786_v33 = vpop.f32.mrf.mxu0  ;;  %v5669_v42 = vshrl.u32 %v5668_v47, 16  ;;  %v5670_v34 = vshll.u32 %v5668_v47, 16  ;;  %v5674_v17 = vld [vmem:[#allocation6_spill] sm:$0xff] }
 0x140   : > { %v5111_v35 = vadd.f32 %v3786_v33, %v913_v37  ;;  %v918_v11 = vadd.f32 %v917_v13, %v5672_v12  ;;  %v2781_v33 = vrot.slane %v4091_v57, 3 }
 0x141   : > { %v3752_v6 = vpop.f32.mrf.mxu1  ;;  %v1197_v63 = vpop.f32.mrf.mxu0  ;;  %v2459_v58 = vrot.slane %v5669_v42, 2  ;;  %v2460_v22 = vrot.slane %v5670_v34, 3 }
 0x142   : > { %v5120_v21 = vadd.f32 %v1197_v63, %v905_v19  ;;  %v4092_v63 = vld [vmem:[%s4180_s28 + $0x88] sm:$0xff]   ;;  %v929_v8 = vadd.f32 %v3752_v6, %v5673_v1  ;;  %v2782_v57 = vsel %vm2753_vm7, %v2779_v31, %v2781_v33 }
 0x143   : > { %v920_v24 = vpop.f32.mrf.mxu1  ;;  %v3789_v55 = vpop.f32.mrf.mxu0  ;;  %4004 = vmatmul.mubr.msk.bf16.gmra.mxu0 %vm480_vm2, %v2778_v5  ;;  %v2461_v19 = vor.u32 %v2460_v22, %v2459_v58  ;;  %v2783_v42 = vrot.slane %v4092_v63, 3  ;;  %v2473_v5 = vshrl.u32 %v4929_v40, 16 }
 0x144   : > { %v5126_v37 = vadd.f32 %v3789_v55, %v926_v7  ;;  %4007 = vmatprep.mubr.msk.bf16.mxu0 %vm480_vm2, %v2780_v15  ;;  %v2476_v15 = vshll.u32 %v4929_v40, 16  ;;  %v2470_v55 = vor.u32 %v2469_v4, %v2466_v16 }
 0x145   : > { %v3795_v30 = vpop.f32.mrf.mxu1  ;;  %3970 = vmatmul.mubr.msk.bf16.gmra.mxu1 %vm480_vm2, %v2454_v62  ;;  %v1210_v14 = vpop.f32.mrf.mxu0  ;;  %v5675_v62 = vld [vmem:[#allocation28_spill] sm:$0xff]  ;;  %v2475_v1 = vrot.slane %v2473_v5, 2  ;;  %v2787_v5 = vrot.slane %v4904_v56, 3 }
 0x146   : > { %v1459_v34 = vadd.f32 %v3795_v30, %v5674_v17  ;;  %v5135_v13 = vadd.f32 %v1210_v14, %v918_v11  ;;  %3973 = vmatprep.mubr.msk.bf16.mxu1 %vm480_vm2, %v2458_v54  ;;  %v921_v12 = vadd.f32 %v920_v24, %v5675_v62  ;;  %v2462_v11 = vsel %vm2395_vm6, %v2457_v18, %v2461_v19 }
 0x147   : > { %v1314_v25 = vpop.f32.mrf.mxu1  ;;  %v3790_v7 = vpop.f32.mrf.mxu0  ;;  %v2784_v30 = vsel %vm2753_vm7, %v2781_v33, %v2783_v42  ;;  %v2478_v16 = vrot.slane %v2476_v15, 3  ;;  %v2785_v18 = vrot.slane %v5668_v47, 3 }
 0x148   : > { %v1457_v58 = vadd.f32 %v1314_v25, %v4921_v61  ;;  %v5141_v22 = vadd.f32 %v3790_v7, %v929_v8  ;;  %v2471_v61 = vsel %vm2395_vm6, %v2461_v19, %v2470_v55 }
 0x149   : > { %v3796_v6 = vpop.f32.mrf.mxu1  ;;  %v1213_v63 = vpop.f32.mrf.mxu0  ;;  %v2479_v19 = vor.u32 %v2478_v16, %v2475_v1  ;;  %v2786_v47 = vsel %vm2753_vm7, %v2783_v42, %v2785_v18  ;;  %v2789_v42 = vrot.slane %v4929_v40, 3 }
 0x14a   : > { %v1460_v54 = vadd.f32 %v3796_v6, %v4926_v60  ;;  %v5147_v14 = vadd.f32 %v1213_v63, %v921_v12 }
 0x14b   : > { %v1317_v4 = vpop.f32.mrf.mxu1  ;;  %v3833_v24 = vpop.f32.mrf.mxu0  ;;  %4008 = vmatmul.mubr.msk.bf16.gmra.mxu0 %vm480_vm2, %v2782_v57  ;;  %v2788_v57 = vsel %vm2753_vm7, %v2785_v18, %v2787_v5 }
 0x14c   : > { %v1458_v31 = vadd.f32 %v1317_v4, %v4933_v10  ;;  %v5152_v8 = vadd.f32 %v3833_v24, %v1459_v34  ;;  %4011 = vmatprep.mubr.msk.bf16.mxu0 %vm480_vm2, %v2784_v30 }
 0x14d   : > { %v3799_v33 = vpop.f32.mrf.mxu1  ;;  %3974 = vmatmul.mubr.msk.bf16.gmra.mxu1 %vm480_vm2, %v2462_v11  ;;  %v1672_v60 = vpop.f32.mrf.mxu0 }
 0x14e   : > { %v1463_v17 = vadd.f32 %v3799_v33, %v4941_v27  ;;  %v5159_v15 = vadd.f32 %v1672_v60, %v1457_v58  ;;  %3977 = vmatprep.mubr.msk.bf16.mxu1 %vm480_vm2, %v2471_v61  ;;  %v2480_v58 = vsel %vm2395_vm6, %v2470_v55, %v2479_v19 }
 0x14f   : > { %v1330_v10 = vpop.f32.mrf.mxu1  ;;  %v3834_v34 = vpop.f32.mrf.mxu0 }
 0x150   : > { %v1461_v25 = vadd.f32 %v1330_v10, %v4949_v0  ;;  %v5163_v7 = vadd.f32 %v3834_v34, %v1460_v54 }
 0x151   : > { %v3800_v62 = vpop.f32.mrf.mxu1  ;;  %v1675_v12 = vpop.f32.mrf.mxu0 }
 0x152   : > { %v1464_v56 = vadd.f32 %v3800_v62, %v4953_v26  ;;  %v5168_v27 = vadd.f32 %v1675_v12, %v1458_v31 }
 0x153   : > { %v1333_v6 = vpop.f32.mrf.mxu1  ;;  %v3837_v63 = vpop.f32.mrf.mxu0  ;;  %4012 = vmatmul.mubr.msk.bf16.gmra.mxu0 %vm480_vm2, %v2786_v47 }
 0x154   : > { %v1462_v0 = vadd.f32 %v1333_v6, %v4960_v43  ;;  %v5173_v11 = vadd.f32 %v3837_v63, %v1463_v17  ;;  %4015 = vmatprep.mubr.msk.bf16.mxu0 %vm480_vm2, %v2788_v57  ;;  %v2790_v43 = vsel %vm2753_vm7, %v2787_v5, %v2789_v42 }
 0x155   : > { %v3803_v30 = vpop.f32.mrf.mxu1  ;;  %3978 = vmatmul.mubr.msk.bf16.gmra.mxu1 %vm480_vm2, %v2480_v58  ;;  %v1688_v26 = vpop.f32.mrf.mxu0 }
 0x156   : > { %v1467_v54 = vadd.f32 %v3803_v30, %v4970_v48  ;;  %v5179_v1 = vadd.f32 %v1688_v26, %v1461_v25 }
 0x157   : > { %v1346_v55 = vpop.f32.mrf.mxu1  ;;  %v3838_v16 = vpop.f32.mrf.mxu0 }
 0x158   : > { %v1465_v4 = vadd.f32 %v1346_v55, %v4977_v29  ;;  %v5182_v24 = vadd.f32 %v3838_v16, %v1464_v56 }
 0x159   : > { %v3804_v61 = vpop.f32.mrf.mxu1  ;;  %v1691_v31 = vpop.f32.mrf.mxu0 }
 0x15a   : > { %v1468_v40 = vadd.f32 %v3804_v61, %v4981_v59  ;;  %v5186_v18 = vadd.f32 %v1691_v31, %v1462_v0 }
 0x15b   : > { %v1349_v33 = vpop.f32.mrf.mxu1  ;;  %v3841_v60 = vpop.f32.mrf.mxu0  ;;  %4016 = vmatmul.mubr.msk.bf16.gmra.mxu0 %vm480_vm2, %v2790_v43 }
 0x15c   : > { %v1466_v48 = vadd.f32 %v1349_v33, %v4987_v46  ;;  %v5190_v17 = vadd.f32 %v3841_v60, %v1467_v54 }
 0x15d   : > { %v3807_v19 = vpop.f32.mrf.mxu1  ;;  %v1704_v29 = vpop.f32.mrf.mxu0 }
 0x15e   : > { %v1471_v10 = vadd.f32 %v3807_v19, %v4996_v50  ;;  %v5193_v34 = vadd.f32 %v1704_v29, %v1465_v4 }
 0x15f   : > { %v1362_v5 = vpop.f32.mrf.mxu1  ;;  %v3842_v25 = vpop.f32.mrf.mxu0 }
 0x160   : > { %v1469_v59 = vadd.f32 %v1362_v5, %v5003_v41  ;;  %v5196_v47 = vadd.f32 %v3842_v25, %v1468_v40 }
 0x161   : > { %v3808_v62 = vpop.f32.mrf.mxu1  ;;  %v1707_v12 = vpop.f32.mrf.mxu0 }
 0x162   : > { %v1472_v57 = vadd.f32 %v3808_v62, %v5007_v28  ;;  %v5199_v56 = vadd.f32 %v1707_v12, %v1466_v48 }
 0x163   : > { %v1365_v46 = vpop.f32.mrf.mxu1  ;;  %v3845_v58 = vpop.f32.mrf.mxu0 }
 0x164   : > { %v1470_v6 = vadd.f32 %v1365_v46, %v5014_v9  ;;  %v5202_v63 = vadd.f32 %v3845_v58, %v1471_v10 }
 0x165   : > { %v3811_v50 = vpop.f32.mrf.mxu1  ;;  %v1720_v0 = vpop.f32.mrf.mxu0 }
 0x166   : > { %v1475_v42 = vadd.f32 %v3811_v50, %v5022_v52  ;;  %v5205_v30 = vadd.f32 %v1720_v0, %v1469_v59 }
 0x167   : > { %v1378_v41 = vpop.f32.mrf.mxu1  ;;  %v3846_v26 = vpop.f32.mrf.mxu0 }
 0x168   : > { %v1473_v54 = vadd.f32 %v1378_v41, %v5028_v32  ;;  %v5208_v55 = vadd.f32 %v3846_v26, %v1472_v57 }
 0x169   : > { %v3812_v28 = vpop.f32.mrf.mxu1  ;;  %v1723_v16 = vpop.f32.mrf.mxu0 }
 0x16a   : > { %v1476_v4 = vadd.f32 %v3812_v28, %v5031_v39  ;;  %v5211_v43 = vadd.f32 %v1723_v16, %v1470_v6 }
 0x16b   : > { %v1381_v9 = vpop.f32.mrf.mxu1  ;;  %v3849_v61 = vpop.f32.mrf.mxu0 }
 0x16c   : > { %v1474_v31 = vadd.f32 %v1381_v9, %v5037_v44  ;;  %v5214_v40 = vadd.f32 %v3849_v61, %v1475_v42 }
 0x16d   : > { %v3815_v52 = vpop.f32.mrf.mxu1  ;;  %v1736_v33 = vpop.f32.mrf.mxu0 }
 0x16e   : > { %v1479_v60 = vadd.f32 %v3815_v52, %v5046_v45  ;;  %v5217_v48 = vadd.f32 %v1736_v33, %v1473_v54 }
 0x16f   : > { %v1394_v32 = vpop.f32.mrf.mxu1  ;;  %v3850_v19 = vpop.f32.mrf.mxu0 }
 0x170   : > { %v1477_v29 = vadd.f32 %v1394_v32, %v5053_v49  ;;  %v5220_v10 = vadd.f32 %v3850_v19, %v1476_v4 }
 0x171   : > { %v3816_v39 = vpop.f32.mrf.mxu1  ;;  %v1739_v5 = vpop.f32.mrf.mxu0 }
 0x172   : > { %v1480_v25 = vadd.f32 %v3816_v39, %v5057_v23  ;;  %v5223_v59 = vadd.f32 %v1739_v5, %v1474_v31 }
 0x173   : > { %v1397_v44 = vpop.f32.mrf.mxu1  ;;  %v3853_v62 = vpop.f32.mrf.mxu0 }
 0x174   : > { %v1478_v12 = vadd.f32 %v1397_v44, %v5064_v38  ;;  %v5226_v57 = vadd.f32 %v3853_v62, %v1479_v60 }
 0x175   : > { %v3819_v45 = vpop.f32.mrf.mxu1  ;;  %v1752_v46 = vpop.f32.mrf.mxu0 }
 0x176   : > { %v1483_v58 = vadd.f32 %v3819_v45, %v5072_v3  ;;  %v5229_v6 = vadd.f32 %v1752_v46, %v1477_v29 }
 0x177   : > { %v1410_v49 = vpop.f32.mrf.mxu1  ;;  %v3854_v50 = vpop.f32.mrf.mxu0 }
 0x178   : > { %v1481_v0 = vadd.f32 %v1410_v49, %v5079_v2  ;;  %v5232_v42 = vadd.f32 %v3854_v50, %v1480_v25 }
 0x179   : > { %v3820_v23 = vpop.f32.mrf.mxu1  ;;  %v1755_v41 = vpop.f32.mrf.mxu0 }
 0x17a   : > { %v1484_v26 = vadd.f32 %v3820_v23, %v5083_v36  ;;  %v5235_v54 = vadd.f32 %v1755_v41, %v1478_v12 }
 0x17b   : > { %v1413_v38 = vpop.f32.mrf.mxu1  ;;  %v3857_v28 = vpop.f32.mrf.mxu0 }
 0x17c   : > { %v1482_v16 = vadd.f32 %v1413_v38, %v5089_v20  ;;  %v5238_v4 = vadd.f32 %v3857_v28, %v1483_v58 }
 0x17d   : > { %v3823_v3 = vpop.f32.mrf.mxu1  ;;  %v1768_v9 = vpop.f32.mrf.mxu0 }
 0x17e   : > { %v1487_v61 = vadd.f32 %v3823_v3, %v5098_v53  ;;  %v5241_v31 = vadd.f32 %v1768_v9, %v1481_v0 }
 0x17f   : > { %v1426_v2 = vpop.f32.mrf.mxu1  ;;  %v3858_v52 = vpop.f32.mrf.mxu0 }
 0x180   : > { %v1485_v33 = vadd.f32 %v1426_v2, %v5105_v51  ;;  %v5244_v60 = vadd.f32 %v3858_v52, %v1484_v26 }
 0x181   : > { %v3824_v36 = vpop.f32.mrf.mxu1  ;;  %v1771_v32 = vpop.f32.mrf.mxu0 }
 0x182   : > { %v1488_v19 = vadd.f32 %v3824_v36, %v5111_v35  ;;  %v5247_v29 = vadd.f32 %v1771_v32, %v1482_v16 }
 0x183   : > { %v1429_v20 = vpop.f32.mrf.mxu1  ;;  %v3861_v39 = vpop.f32.mrf.mxu0 }
 0x184   : > { %v1486_v5 = vadd.f32 %v1429_v20, %v5120_v21  ;;  %v5250_v25 = vadd.f32 %v3861_v39, %v1487_v61 }
 0x185   : > { %v3827_v53 = vpop.f32.mrf.mxu1  ;;  %v1784_v44 = vpop.f32.mrf.mxu0 }
 0x186   : > { %v1491_v62 = vadd.f32 %v3827_v53, %v5126_v37  ;;  %v5253_v12 = vadd.f32 %v1784_v44, %v1485_v33 }
 0x187   : > { %v1442_v51 = vpop.f32.mrf.mxu1  ;;  %v3862_v45 = vpop.f32.mrf.mxu0 }
 0x188   : > { %v1489_v46 = vadd.f32 %v1442_v51, %v5135_v13  ;;  %v5256_v58 = vadd.f32 %v3862_v45, %v1488_v19 }
 0x189   : > { %v3828_v35 = vpop.f32.mrf.mxu1  ;;  %v1787_v49 = vpop.f32.mrf.mxu0 }
 0x18a   : > { %v1492_v50 = vadd.f32 %v3828_v35, %v5141_v22  ;;  %v5259_v0 = vadd.f32 %v1787_v49, %v1486_v5 }
 0x18b   : > { %v1445_v21 = vpop.f32.mrf.mxu1  ;;  %v3865_v23 = vpop.f32.mrf.mxu0 }
 0x18c   : > { %v1490_v41 = vadd.f32 %v1445_v21, %v5147_v14  ;;  %v5262_v26 = vadd.f32 %v3865_v23, %v1491_v62 }
 0x18d   : > { %v3871_v37 = vpop.f32.mrf.mxu1  ;;  %v1800_v38 = vpop.f32.mrf.mxu0 }
 0x18e   : > { %v2127_v28 = vadd.f32 %v3871_v37, %v5152_v8  ;;  %v5265_v16 = vadd.f32 %v1800_v38, %v1489_v46 }
 0x18f   : > { %v1982_v13 = vpop.f32.mrf.mxu1  ;;  %v3866_v3 = vpop.f32.mrf.mxu0 }
 0x190   : > { %v2125_v9 = vadd.f32 %v1982_v13, %v5159_v15  ;;  %v5268_v61 = vadd.f32 %v3866_v3, %v1492_v50 }
 0x191   : > { %v3872_v22 = vpop.f32.mrf.mxu1  ;;  %v1803_v2 = vpop.f32.mrf.mxu0 }
 0x192   : > { %v2128_v52 = vadd.f32 %v3872_v22, %v5163_v7  ;;  %v5271_v33 = vadd.f32 %v1803_v2, %v1490_v41 }
 0x193   : > { %v1985_v14 = vpop.f32.mrf.mxu1  ;;  %v3909_v36 = vpop.f32.mrf.mxu0 }
 0x194   : > { %v2126_v32 = vadd.f32 %v1985_v14, %v5168_v27  ;;  %v5274_v19 = vadd.f32 %v3909_v36, %v2127_v28 }
 0x195   : > { %v3875_v8 = vpop.f32.mrf.mxu1  ;;  %v2214_v20 = vpop.f32.mrf.mxu0 }
 0x196   : > { %v2131_v39 = vadd.f32 %v3875_v8, %v5173_v11  ;;  %v5277_v5 = vadd.f32 %v2214_v20, %v2125_v9 }
 0x197   : > { %v1998_v15 = vpop.f32.mrf.mxu1  ;;  %v3910_v53 = vpop.f32.mrf.mxu0 }
 0x198   : > { %v2129_v44 = vadd.f32 %v1998_v15, %v5179_v1  ;;  %v5280_v62 = vadd.f32 %v3910_v53, %v2128_v52 }
 0x199   : > { %v3876_v7 = vpop.f32.mrf.mxu1  ;;  %v2217_v51 = vpop.f32.mrf.mxu0 }
 0x19a   : > { %v2132_v45 = vadd.f32 %v3876_v7, %v5182_v24  ;;  %v5283_v46 = vadd.f32 %v2217_v51, %v2126_v32 }
 0x19b   : > { %v2001_v27 = vpop.f32.mrf.mxu1  ;;  %v3913_v35 = vpop.f32.mrf.mxu0 }
 0x19c   : > { %v2130_v49 = vadd.f32 %v2001_v27, %v5186_v18  ;;  %v5286_v50 = vadd.f32 %v3913_v35, %v2131_v39 }
 0x19d   : > { %v3879_v11 = vpop.f32.mrf.mxu1  ;;  %v2230_v21 = vpop.f32.mrf.mxu0 }
 0x19e   : > { %v2135_v23 = vadd.f32 %v3879_v11, %v5190_v17  ;;  %v5289_v41 = vadd.f32 %v2230_v21, %v2129_v44 }
 0x19f   : > { %v2014_v1 = vpop.f32.mrf.mxu1  ;;  %v3914_v37 = vpop.f32.mrf.mxu0 }
 0x1a0   : > { %v2133_v38 = vadd.f32 %v2014_v1, %v5193_v34  ;;  %v5292_v28 = vadd.f32 %v3914_v37, %v2132_v45 }
 0x1a1   : > { %v3880_v24 = vpop.f32.mrf.mxu1  ;;  %v2233_v13 = vpop.f32.mrf.mxu0 }
 0x1a2   : > { %v2136_v3 = vadd.f32 %v3880_v24, %v5196_v47  ;;  %v5295_v9 = vadd.f32 %v2233_v13, %v2130_v49 }
 0x1a3   : > { %v2017_v18 = vpop.f32.mrf.mxu1  ;;  %v3917_v22 = vpop.f32.mrf.mxu0 }
 0x1a4   : > { %v2134_v2 = vadd.f32 %v2017_v18, %v5199_v56  ;;  %v5298_v52 = vadd.f32 %v3917_v22, %v2135_v23 }
 0x1a5   : > { %v3883_v17 = vpop.f32.mrf.mxu1  ;;  %v2246_v14 = vpop.f32.mrf.mxu0 }
 0x1a6   : > { %v2139_v36 = vadd.f32 %v3883_v17, %v5202_v63  ;;  %v5301_v32 = vadd.f32 %v2246_v14, %v2133_v38 }
 0x1a7   : > { %v2030_v34 = vpop.f32.mrf.mxu1  ;;  %v3918_v8 = vpop.f32.mrf.mxu0 }
 0x1a8   : > { %v2137_v20 = vadd.f32 %v2030_v34, %v5205_v30  ;;  %v5304_v39 = vadd.f32 %v3918_v8, %v2136_v3 }
 0x1a9   : > { %v3884_v47 = vpop.f32.mrf.mxu1  ;;  %v2249_v15 = vpop.f32.mrf.mxu0 }
 0x1aa   : > { %v2140_v53 = vadd.f32 %v3884_v47, %v5208_v55  ;;  %v5307_v44 = vadd.f32 %v2249_v15, %v2134_v2 }
 0x1ab   : > { %v2033_v56 = vpop.f32.mrf.mxu1  ;;  %v3921_v7 = vpop.f32.mrf.mxu0 }
 0x1ac   : > { %v2138_v51 = vadd.f32 %v2033_v56, %v5211_v43  ;;  %v5310_v45 = vadd.f32 %v3921_v7, %v2139_v36 }
 0x1ad   : > { %v3887_v63 = vpop.f32.mrf.mxu1  ;;  %v2262_v27 = vpop.f32.mrf.mxu0 }
 0x1ae   : > { %v2143_v35 = vadd.f32 %v3887_v63, %v5214_v40  ;;  %v5313_v49 = vadd.f32 %v2262_v27, %v2137_v20 }
 0x1af   : > { %v2046_v30 = vpop.f32.mrf.mxu1  ;;  %v3922_v11 = vpop.f32.mrf.mxu0 }
 0x1b0   : > { %v2141_v21 = vadd.f32 %v2046_v30, %v5217_v48  ;;  %v5316_v23 = vadd.f32 %v3922_v11, %v2140_v53 }
 0x1b1   : > { %v3888_v55 = vpop.f32.mrf.mxu1  ;;  %v2265_v1 = vpop.f32.mrf.mxu0 }
 0x1b2   : > { %v2144_v37 = vadd.f32 %v3888_v55, %v5220_v10  ;;  %v5319_v38 = vadd.f32 %v2265_v1, %v2138_v51 }
 0x1b3   : > { %v2049_v43 = vpop.f32.mrf.mxu1  ;;  %v3925_v24 = vpop.f32.mrf.mxu0 }
 0x1b4   : > { %v2142_v13 = vadd.f32 %v2049_v43, %v5223_v59  ;;  %v5322_v3 = vadd.f32 %v3925_v24, %v2143_v35 }
 0x1b5   : > { %v3891_v40 = vpop.f32.mrf.mxu1  ;;  %v2278_v18 = vpop.f32.mrf.mxu0 }
 0x1b6   : > { %v2147_v22 = vadd.f32 %v3891_v40, %v5226_v57  ;;  %v5325_v2 = vadd.f32 %v2278_v18, %v2141_v21 }
 0x1b7   : > { %v2062_v48 = vpop.f32.mrf.mxu1  ;;  %v3926_v17 = vpop.f32.mrf.mxu0 }
 0x1b8   : > { %v2145_v14 = vadd.f32 %v2062_v48, %v5229_v6  ;;  %v5328_v36 = vadd.f32 %v3926_v17, %v2144_v37 }
 0x1b9   : > { %v3892_v10 = vpop.f32.mrf.mxu1  ;;  %v2281_v34 = vpop.f32.mrf.mxu0 }
 0x1ba   : > { %v2148_v8 = vadd.f32 %v3892_v10, %v5232_v42  ;;  %v5331_v20 = vadd.f32 %v2281_v34, %v2142_v13 }
 0x1bb   : > { %v2065_v59 = vpop.f32.mrf.mxu1  ;;  %v3929_v47 = vpop.f32.mrf.mxu0 }
 0x1bc   : > { %v2146_v15 = vadd.f32 %v2065_v59, %v5235_v54  ;;  %v5334_v53 = vadd.f32 %v3929_v47, %v2147_v22 }
 0x1bd   : > { %v3895_v57 = vpop.f32.mrf.mxu1  ;;  %v2294_v56 = vpop.f32.mrf.mxu0 }
 0x1be   : > { %v2151_v7 = vadd.f32 %v3895_v57, %v5238_v4  ;;  %v5337_v51 = vadd.f32 %v2294_v56, %v2145_v14 }
 0x1bf   : > { %v2078_v6 = vpop.f32.mrf.mxu1  ;;  %v3930_v63 = vpop.f32.mrf.mxu0 }
 0x1c0   : > { %v2149_v27 = vadd.f32 %v2078_v6, %v5241_v31  ;;  %v5340_v35 = vadd.f32 %v3930_v63, %v2148_v8 }
 0x1c1   : > { %v3896_v42 = vpop.f32.mrf.mxu1  ;;  %v2297_v30 = vpop.f32.mrf.mxu0 }
 0x1c2   : > { %v2152_v11 = vadd.f32 %v3896_v42, %v5244_v60  ;;  %v5343_v21 = vadd.f32 %v2297_v30, %v2146_v15 }
 0x1c3   : > { %v2081_v54 = vpop.f32.mrf.mxu1  ;;  %v3933_v55 = vpop.f32.mrf.mxu0 }
 0x1c4   : > { %v2150_v1 = vadd.f32 %v2081_v54, %v5247_v29  ;;  %v5346_v37 = vadd.f32 %v3933_v55, %v2151_v7 }
 0x1c5   : > { %v3899_v4 = vpop.f32.mrf.mxu1  ;;  %v2310_v43 = vpop.f32.mrf.mxu0 }
 0x1c6   : > { %v2155_v24 = vadd.f32 %v3899_v4, %v5250_v25  ;;  %v5349_v13 = vadd.f32 %v2310_v43, %v2149_v27 }
 0x1c7   : > { %v2094_v31 = vpop.f32.mrf.mxu1  ;;  %v3934_v40 = vpop.f32.mrf.mxu0 }
 0x1c8   : > { %v2153_v18 = vadd.f32 %v2094_v31, %v5253_v12  ;;  %v5352_v22 = vadd.f32 %v3934_v40, %v2152_v11 }
 0x1c9   : > { %v3900_v60 = vpop.f32.mrf.mxu1  ;;  %v2313_v48 = vpop.f32.mrf.mxu0 }
 0x1ca   : > { %v2156_v17 = vadd.f32 %v3900_v60, %v5256_v58  ;;  %v5355_v14 = vadd.f32 %v2313_v48, %v2150_v1 }
 0x1cb   : > { %v2097_v29 = vpop.f32.mrf.mxu1  ;;  %v3937_v10 = vpop.f32.mrf.mxu0 }
 0x1cc   : > { %v2154_v34 = vadd.f32 %v2097_v29, %v5259_v0  ;;  %v5358_v8 = vadd.f32 %v3937_v10, %v2155_v24  ;;  %v5389_v29 = vld [vmem:[%s5550_s3] ss:$0 sm:$0xff] }
 0x1cd   : > { %v3903_v25 = vpop.f32.mrf.mxu1  ;;  %v2326_v59 = vpop.f32.mrf.mxu0 }
 0x1ce   : > { %v2159_v47 = vadd.f32 %v3903_v25, %v5262_v26  ;;  %v5361_v15 = vadd.f32 %v2326_v59, %v2153_v18 }
 0x1cf   : > { %v2110_v12 = vpop.f32.mrf.mxu1  ;;  %v3938_v57 = vpop.f32.mrf.mxu0 }
 0x1d0   : > { %v2157_v56 = vadd.f32 %v2110_v12, %v5265_v16  ;;  %v5364_v7 = vadd.f32 %v3938_v57, %v2156_v17 }
 0x1d1   : > { %v3904_v58 = vpop.f32.mrf.mxu1  ;;  %v2329_v6 = vpop.f32.mrf.mxu0 }
 0x1d2   : > { %v2160_v63 = vadd.f32 %v3904_v58, %v5268_v61  ;;  %v5367_v27 = vadd.f32 %v2329_v6, %v2154_v34 }
 0x1d3   : > { %v2113_v0 = vpop.f32.mrf.mxu1  ;;  %v3941_v42 = vpop.f32.mrf.mxu0 }
 0x1d4   : > { %v2158_v30 = vadd.f32 %v2113_v0, %v5271_v33  ;;  %v5370_v11 = vadd.f32 %v3941_v42, %v2159_v47  ;;  %v5382_v33 = vld [vmem:[%s5549_s2] ss:$0 sm:$0xff] }
 0x1d5   : > { %v3947_v26 = vpop.f32.mrf.mxu1  ;;  %v2342_v54 = vpop.f32.mrf.mxu0 }
 0x1d6   : > { %v5372_v55 = vadd.f32 %v2342_v54, %v2157_v56  ;;  %v2717_v61 = vadd.f32 %v3947_v26, %v5274_v19 }
 0x1d7   : > { %v2572_v16 = vpop.f32.mrf.mxu1  ;;  %v3942_v1 = vpop.f32.mrf.mxu0 }
 0x1d8   : > { %v5374_v4 = vadd.f32 %v3942_v1, %v2160_v63  ;;  %v2715_v60 = vadd.f32 %v2572_v16, %v5277_v5 }
 0x1d9   : > { %v3948_v43 = vpop.f32.mrf.mxu1  ;;  %v2345_v24 = vpop.f32.mrf.mxu0 }
 0x1da   : > { %v5377_v31 = vadd.f32 %v2345_v24, %v2158_v30  ;;  %v2718_v10 = vadd.f32 %v3948_v43, %v5280_v62 }
 0x1db   : > { %v2575_v40 = vpop.f32.mrf.mxu1  ;;  %v3985_v18 = vpop.f32.mrf.mxu0 }
 0x1dc   : > { %v3027_v48 = vadd.f32 %v3985_v18, %v2717_v61  ;;  %v2716_v56 = vadd.f32 %v2575_v40, %v5283_v46 }
 0x1dd   : > { %v3951_v17 = vpop.f32.mrf.mxu1  ;;  %v2882_v19 = vpop.f32.mrf.mxu0 }
 0x1de   : > { %v3070_v34 = vmul.f32 %v5382_v33, %v3027_v48  ;;  %v3025_v25 = vadd.f32 %v2882_v19, %v2715_v60  ;;  %v2721_v6 = vadd.f32 %v3951_v17, %v5286_v50 }
 0x1df   : > { %v2588_v59 = vpop.f32.mrf.mxu1  ;;  %v3986_v47 = vpop.f32.mrf.mxu0 }
 0x1e0   : > { %v3113_v12 = vadd.f32 %v5389_v29, %v3070_v34  ;;  %v3068_v5 = vmul.f32 %v5382_v33, %v3025_v25  ;;  %v3028_v57 = vadd.f32 %v3986_v47, %v2718_v10  ;;  %v2719_v46 = vadd.f32 %v2588_v59, %v5289_v41 }
 0x1e1   : > { %v3952_v58 = vpop.f32.mrf.mxu1  ;;  %v2885_v62 = vpop.f32.mrf.mxu0 }
 0x1e2   : > { %v3149_v63 = vmax.f32 %v3113_v12, 0.0  ;;  %v3111_v0 = vadd.f32 %v5389_v29, %v3068_v5  ;;  %v3071_v42 = vmul.f32 %v5382_v33, %v3028_v57  ;;  %v3026_v26 = vadd.f32 %v2885_v62, %v2716_v56 }
 0x1e3   : > { %v2591_v30 = vpop.f32.mrf.mxu1  ;;  %v3989_v54 = vpop.f32.mrf.mxu0  ;;  %v2722_v40 = vadd.f32 %v3952_v58, %v5292_v28 }
 0x1e4   : > { %3185 = vst [vmem:[%s5399_s25 + $0x10] sm:$0xff] %v3149_v63  ;;  %v3147_v16 = vmax.f32 %v3111_v0, 0.0  ;;  %v3114_v1 = vadd.f32 %v5389_v29, %v3071_v42  ;;  %v3031_v43 = vadd.f32 %v3989_v54, %v2721_v6  ;;  %v3069_v24 = vmul.f32 %v5382_v33, %v3026_v26 }
 0x1e5   : > { %v3955_v61 = vpop.f32.mrf.mxu1  ;;  %v2898_v50 = vpop.f32.mrf.mxu0  ;;  %v2720_v59 = vadd.f32 %v2591_v30, %v5295_v9 }
 0x1e6   : > { %3183 = vst [vmem:[%s5399_s25] sm:$0xff] %v3147_v16  ;;  %v3150_v18 = vmax.f32 %v3114_v1, 0.0  ;;  %v3074_v60 = vmul.f32 %v5382_v33, %v3031_v43  ;;  %v3029_v48 = vadd.f32 %v2898_v50, %v2719_v46  ;;  %v3112_v17 = vadd.f32 %v5389_v29, %v3069_v24 }
 0x1e7   : > { %v2604_v19 = vpop.f32.mrf.mxu1  ;;  %v3990_v41 = vpop.f32.mrf.mxu0  ;;  %v2725_v5 = vadd.f32 %v3955_v61, %v5298_v52 }
 0x1e8   : > { %3186 = vst [vmem:[%s5399_s25 + $0x18] sm:$0xff] %v3150_v18  ;;  %v3117_v10 = vadd.f32 %v5389_v29, %v3074_v60  ;;  %v3072_v34 = vmul.f32 %v5382_v33, %v3029_v48  ;;  %v3032_v25 = vadd.f32 %v3990_v41, %v2722_v40  ;;  %v3148_v47 = vmax.f32 %v3112_v17, 0.0 }
 0x1e9   : > { %v3956_v28 = vpop.f32.mrf.mxu1  ;;  %v2901_v12 = vpop.f32.mrf.mxu0  ;;  %v2723_v0 = vadd.f32 %v2604_v19, %v5301_v32 }
 0x1ea   : > { %v3153_v57 = vmax.f32 %v3117_v10, 0.0  ;;  %v3115_v56 = vadd.f32 %v5389_v29, %v3072_v34  ;;  %v3075_v58 = vmul.f32 %v5382_v33, %v3032_v25  ;;  %3184 = vst [vmem:[%s5399_s25 + $0x8] sm:$0xff] %v3148_v47  ;;  %v3030_v6 = vadd.f32 %v2901_v12, %v2720_v59 }
 0x1eb   : > { %v2607_v62 = vpop.f32.mrf.mxu1  ;;  %v3993_v63 = vpop.f32.mrf.mxu0  ;;  %v2726_v46 = vadd.f32 %v3956_v28, %v5304_v39 }
 0x1ec   : > { %3189 = vst [vmem:[%s5399_s25 + $0x30] sm:$0xff] %v3153_v57  ;;  %v3151_v9 = vmax.f32 %v3115_v56, 0.0  ;;  %v3118_v42 = vadd.f32 %v5389_v29, %v3075_v58  ;;  %v3035_v30 = vadd.f32 %v3993_v63, %v2725_v5  ;;  %v3073_v52 = vmul.f32 %v5382_v33, %v3030_v6 }
 0x1ed   : > { %v3959_v26 = vpop.f32.mrf.mxu1  ;;  %v2914_v54 = vpop.f32.mrf.mxu0  ;;  %v2724_v60 = vadd.f32 %v2607_v62, %v5307_v44 }
 0x1ee   : > { %3187 = vst [vmem:[%s5399_s25 + $0x20] sm:$0xff] %v3151_v9  ;;  %v3154_v16 = vmax.f32 %v3118_v42, 0.0  ;;  %v3078_v1 = vmul.f32 %v5382_v33, %v3035_v30  ;;  %v3033_v43 = vadd.f32 %v2914_v54, %v2723_v0  ;;  %v3116_v24 = vadd.f32 %v5389_v29, %v3073_v52 }
 0x1ef   : > { %v2620_v61 = vpop.f32.mrf.mxu1  ;;  %v3994_v32 = vpop.f32.mrf.mxu0  ;;  %v2729_v19 = vadd.f32 %v3959_v26, %v5310_v45 }
 0x1f0   : > { %3190 = vst [vmem:[%s5399_s25 + $0x38] sm:$0xff] %v3154_v16  ;;  %v3121_v50 = vadd.f32 %v5389_v29, %v3078_v1  ;;  %v3076_v40 = vmul.f32 %v5382_v33, %v3033_v43  ;;  %v3036_v18 = vadd.f32 %v3994_v32, %v2726_v46  ;;  %v3152_v48 = vmax.f32 %v3116_v24, 0.0 }
 0x1f1   : > { %v3960_v39 = vpop.f32.mrf.mxu1  ;;  %v2917_v17 = vpop.f32.mrf.mxu0  ;;  %v2727_v28 = vadd.f32 %v2620_v61, %v5313_v49 }
 0x1f2   : > { %v3157_v41 = vmax.f32 %v3121_v50, 0.0  ;;  %v3119_v10 = vadd.f32 %v5389_v29, %v3076_v40  ;;  %v3079_v34 = vmul.f32 %v5382_v33, %v3036_v18  ;;  %3188 = vst [vmem:[%s5399_s25 + $0x28] sm:$0xff] %v3152_v48  ;;  %v3034_v59 = vadd.f32 %v2917_v17, %v2724_v60 }
 0x1f3   : > { %v2623_v25 = vpop.f32.mrf.mxu1  ;;  %v3997_v47 = vpop.f32.mrf.mxu0  ;;  %v2730_v58 = vadd.f32 %v3960_v39, %v5316_v23 }
 0x1f4   : > { %3193 = vst [vmem:[%s5399_s25 + $0x50] sm:$0xff] %v3157_v41  ;;  %v3155_v44 = vmax.f32 %v3119_v10, 0.0  ;;  %v3122_v12 = vadd.f32 %v5389_v29, %v3079_v34  ;;  %v3039_v5 = vadd.f32 %v3997_v47, %v2729_v19  ;;  %v3077_v45 = vmul.f32 %v5382_v33, %v3034_v59 }
 0x1f5   : > { %v3963_v57 = vpop.f32.mrf.mxu1  ;;  %v2930_v56 = vpop.f32.mrf.mxu0  ;;  %v2728_v26 = vadd.f32 %v2623_v25, %v5319_v38 }
 0x1f6   : > { %3191 = vst [vmem:[%s5399_s25 + $0x40] sm:$0xff] %v3155_v44  ;;  %v3158_v62 = vmax.f32 %v3122_v12, 0.0  ;;  %v3082_v6 = vmul.f32 %v5382_v33, %v3039_v5  ;;  %v3037_v63 = vadd.f32 %v2930_v56, %v2727_v28  ;;  %v3120_v0 = vadd.f32 %v5389_v29, %v3077_v45 }
 0x1f7   : > { %v2636_v9 = vpop.f32.mrf.mxu1  ;;  %v3998_v49 = vpop.f32.mrf.mxu0  ;;  %v2733_v16 = vadd.f32 %v3963_v57, %v5322_v3 }
 0x1f8   : > { %3194 = vst [vmem:[%s5399_s25 + $0x58] sm:$0xff] %v3158_v62  ;;  %v3125_v42 = vadd.f32 %v5389_v29, %v3082_v6  ;;  %v3080_v30 = vmul.f32 %v5382_v33, %v3037_v63  ;;  %v3040_v52 = vadd.f32 %v3998_v49, %v2730_v58  ;;  %v3156_v54 = vmax.f32 %v3120_v0, 0.0 }
 0x1f9   : > { %v3964_v23 = vpop.f32.mrf.mxu1  ;;  %v2933_v46 = vpop.f32.mrf.mxu0  ;;  %v2731_v40 = vadd.f32 %v2636_v9, %v5325_v2 }
 0x1fa   : > { %v3161_v1 = vmax.f32 %v3125_v42, 0.0  ;;  %v3123_v43 = vadd.f32 %v5389_v29, %v3080_v30  ;;  %v3083_v24 = vmul.f32 %v5382_v33, %v3040_v52  ;;  %3192 = vst [vmem:[%s5399_s25 + $0x48] sm:$0xff] %v3156_v54  ;;  %v3038_v32 = vadd.f32 %v2933_v46, %v2728_v26 }
 0x1fb   : > { %v2639_v61 = vpop.f32.mrf.mxu1  ;;  %v4001_v50 = vpop.f32.mrf.mxu0  ;;  %v2734_v17 = vadd.f32 %v3964_v23, %v5328_v36 }
 0x1fc   : > { %3197 = vst [vmem:[%s5399_s25 + $0x70] sm:$0xff] %v3161_v1  ;;  %v3159_v38 = vmax.f32 %v3123_v43, 0.0  ;;  %v3126_v18 = vadd.f32 %v5389_v29, %v3083_v24  ;;  %v3043_v60 = vadd.f32 %v4001_v50, %v2733_v16  ;;  %v3081_v3 = vmul.f32 %v5382_v33, %v3038_v32 }
 0x1fd   : > { %v3967_v48 = vpop.f32.mrf.mxu1  ;;  %v2946_v39 = vpop.f32.mrf.mxu0  ;;  %v2732_v44 = vadd.f32 %v2639_v61, %v5331_v20 }
 0x1fe   : > { %3195 = vst [vmem:[%s5399_s25 + $0x60] sm:$0xff] %v3159_v38  ;;  %v3162_v19 = vmax.f32 %v3126_v18, 0.0  ;;  %v3086_v41 = vmul.f32 %v5382_v33, %v3043_v60  ;;  %v3041_v10 = vadd.f32 %v2946_v39, %v2731_v40  ;;  %v3124_v34 = vadd.f32 %v5389_v29, %v3081_v3 }
 0x1ff   : > { %v2652_v25 = vpop.f32.mrf.mxu1  ;;  %v4002_v2 = vpop.f32.mrf.mxu0  ;;  %v2737_v45 = vadd.f32 %v3967_v48, %v5334_v53 }
 0x200   : > { %3198 = vst [vmem:[%s5399_s25 + $0x78] sm:$0xff] %v3162_v19  ;;  %v3129_v59 = vadd.f32 %v5389_v29, %v3086_v41  ;;  %v3084_v47 = vmul.f32 %v5382_v33, %v3041_v10  ;;  %v3044_v28 = vadd.f32 %v4002_v2, %v2734_v17  ;;  %v3160_v12 = vmax.f32 %v3124_v34, 0.0 }
 0x201   : > { %v3968_v36 = vpop.f32.mrf.mxu1  ;;  %v2949_v5 = vpop.f32.mrf.mxu0  ;;  %v2735_v0 = vadd.f32 %v2652_v25, %v5337_v51 }
 0x202   : > { %v3165_v57 = vmax.f32 %v3129_v59, 0.0  ;;  %v3127_v56 = vadd.f32 %v5389_v29, %v3084_v47  ;;  %v3087_v58 = vmul.f32 %v5382_v33, %v3044_v28  ;;  %3196 = vst [vmem:[%s5399_s25 + $0x68] sm:$0xff] %v3160_v12  ;;  %v3042_v6 = vadd.f32 %v2949_v5, %v2732_v44 }
 0x203   : > { %v2655_v62 = vpop.f32.mrf.mxu1  ;;  %v4005_v63 = vpop.f32.mrf.mxu0  ;;  %v2738_v52 = vadd.f32 %v3968_v36, %v5340_v35 }
 0x204   : > { %3201 = vst [vmem:[%s5399_s25 + $0x90] sm:$0xff] %v3165_v57  ;;  %v3163_v20 = vmax.f32 %v3127_v56, 0.0  ;;  %v3130_v9 = vadd.f32 %v5389_v29, %v3087_v58  ;;  %v3047_v49 = vadd.f32 %v4005_v63, %v2737_v45  ;;  %v3085_v53 = vmul.f32 %v5382_v33, %v3042_v6 }
 0x205   : > { %v3971_v42 = vpop.f32.mrf.mxu1  ;;  %v2962_v30 = vpop.f32.mrf.mxu0  ;;  %v2736_v61 = vadd.f32 %v2655_v62, %v5343_v21 }
 0x206   : > { %3199 = vst [vmem:[%s5399_s25 + $0x80] sm:$0xff] %v3163_v20  ;;  %v3166_v26 = vmax.f32 %v3130_v9, 0.0  ;;  %v3090_v54 = vmul.f32 %v5382_v33, %v3047_v49  ;;  %v3045_v23 = vadd.f32 %v2962_v30, %v2735_v0  ;;  %v3128_v46 = vadd.f32 %v5389_v29, %v3085_v53 }
 0x207   : > { %v2668_v16 = vpop.f32.mrf.mxu1  ;;  %v4006_v51 = vpop.f32.mrf.mxu0  ;;  %v2741_v40 = vadd.f32 %v3971_v42, %v5346_v37 }
 0x208   : > { %3202 = vst [vmem:[%s5399_s25 + $0x98] sm:$0xff] %v3166_v26  ;;  %v3133_v1 = vadd.f32 %v5389_v29, %v3090_v54  ;;  %v3088_v43 = vmul.f32 %v5382_v33, %v3045_v23  ;;  %v3048_v24 = vadd.f32 %v4006_v51, %v2738_v52  ;;  %v3164_v32 = vmax.f32 %v3128_v46, 0.0 }
 0x209   : > { %v3972_v35 = vpop.f32.mrf.mxu1  ;;  %v2965_v50 = vpop.f32.mrf.mxu0  ;;  %v2739_v17 = vadd.f32 %v2668_v16, %v5349_v13 }
 0x20a   : > { %v3169_v38 = vmax.f32 %v3133_v1, 0.0  ;;  %v3131_v18 = vadd.f32 %v5389_v29, %v3088_v43  ;;  %v3091_v60 = vmul.f32 %v5382_v33, %v3048_v24  ;;  %3200 = vst [vmem:[%s5399_s25 + $0x88] sm:$0xff] %v3164_v32  ;;  %v3046_v48 = vadd.f32 %v2965_v50, %v2736_v61 }
 0x20b   : > { %v2671_v3 = vpop.f32.mrf.mxu1  ;;  %v4009_v39 = vpop.f32.mrf.mxu0  ;;  %v2742_v25 = vadd.f32 %v3972_v35, %v5352_v22 }
 0x20c   : > { %3205 = vst [vmem:[%s5399_s25 + $0xb0] sm:$0xff] %v3169_v38  ;;  %v3167_v21 = vmax.f32 %v3131_v18, 0.0  ;;  %v3134_v19 = vadd.f32 %v5389_v29, %v3091_v60  ;;  %v3051_v41 = vadd.f32 %v4009_v39, %v2741_v40  ;;  %v3089_v37 = vmul.f32 %v5382_v33, %v3046_v48 }
 0x20d   : > { %v3975_v10 = vpop.f32.mrf.mxu1  ;;  %v2978_v34 = vpop.f32.mrf.mxu0  ;;  %v2740_v45 = vadd.f32 %v2671_v3, %v5355_v14 }
 0x20e   : > { %3203 = vst [vmem:[%s5399_s25 + $0xa0] sm:$0xff] %v3167_v21  ;;  %v3170_v2 = vmax.f32 %v3134_v19, 0.0  ;;  %v3094_v59 = vmul.f32 %v5382_v33, %v3051_v41  ;;  %v3049_v47 = vadd.f32 %v2978_v34, %v2739_v17  ;;  %v3132_v28 = vadd.f32 %v5389_v29, %v3089_v37 }
 0x20f   : > { %v2684_v44 = vpop.f32.mrf.mxu1  ;;  %v4010_v13 = vpop.f32.mrf.mxu0  ;;  %v2745_v58 = vadd.f32 %v3975_v10, %v5358_v8 }
 0x210   : > { %3206 = vst [vmem:[%s5399_s25 + $0xb8] sm:$0xff] %v3170_v2  ;;  %v3137_v12 = vadd.f32 %v5389_v29, %v3094_v59  ;;  %v3092_v36 = vmul.f32 %v5382_v33, %v3049_v47  ;;  %v3052_v5 = vadd.f32 %v4010_v13, %v2742_v25  ;;  %v3168_v57 = vmax.f32 %v3132_v28, 0.0 }
 0x211   : > { %v3976_v22 = vpop.f32.mrf.mxu1  ;;  %v2981_v56 = vpop.f32.mrf.mxu0  ;;  %v2743_v49 = vadd.f32 %v2684_v44, %v5361_v15 }
 0x212   : > { %v3173_v62 = vmax.f32 %v3137_v12, 0.0  ;;  %v3135_v6 = vadd.f32 %v5389_v29, %v3092_v36  ;;  %v3095_v63 = vmul.f32 %v5382_v33, %v3052_v5  ;;  %3204 = vst [vmem:[%s5399_s25 + $0xa8] sm:$0xff] %v3168_v57  ;;  %v3050_v20 = vadd.f32 %v2981_v56, %v2740_v45 }
 0x213   : > { %v2687_v0 = vpop.f32.mrf.mxu1  ;;  %v4013_v9 = vpop.f32.mrf.mxu0  ;;  %v2746_v26 = vadd.f32 %v3976_v22, %v5364_v7 }
 0x214   : > { %3209 = vst [vmem:[%s5399_s25 + $0xd0] sm:$0xff] %v3173_v62  ;;  %v3171_v14 = vmax.f32 %v3135_v6, 0.0  ;;  %v3138_v53 = vadd.f32 %v5389_v29, %v3095_v63  ;;  %v3055_v42 = vadd.f32 %v4013_v9, %v2745_v58  ;;  %v3093_v8 = vmul.f32 %v5382_v33, %v3050_v20 }
 0x215   : > { %v3979_v30 = vpop.f32.mrf.mxu1  ;;  %v2994_v52 = vpop.f32.mrf.mxu0  ;;  %v2744_v61 = vadd.f32 %v2687_v0, %v5367_v27 }
 0x216   : > { %3207 = vst [vmem:[%s5399_s25 + $0xc0] sm:$0xff] %v3171_v14  ;;  %v3174_v54 = vmax.f32 %v3138_v53, 0.0  ;;  %v3098_v23 = vmul.f32 %v5382_v33, %v3055_v42  ;;  %v3053_v46 = vadd.f32 %v2994_v52, %v2743_v49  ;;  %v3136_v16 = vadd.f32 %v5389_v29, %v3093_v8 }
 0x217   : > { %v2700_v51 = vpop.f32.mrf.mxu1  ;;  %v4014_v15 = vpop.f32.mrf.mxu0  ;;  %v2749_v50 = vadd.f32 %v3979_v30, %v5370_v11 }
 0x218   : > { %3210 = vst [vmem:[%s5399_s25 + $0xd8] sm:$0xff] %v3174_v54  ;;  %v3141_v1 = vadd.f32 %v5389_v29, %v3098_v23  ;;  %v3096_v43 = vmul.f32 %v5382_v33, %v3053_v46  ;;  %v3056_v24 = vadd.f32 %v4014_v15, %v2746_v26  ;;  %v3172_v32 = vmax.f32 %v3136_v16, 0.0 }
 0x219   : > { %v3980_v7 = vpop.f32.mrf.mxu1  ;;  %v2997_v35 = vpop.f32.mrf.mxu0  ;;  %v2747_v48 = vadd.f32 %v2700_v51, %v5372_v55 }
 0x21a   : > { %v3177_v40 = vmax.f32 %v3141_v1, 0.0  ;;  %v3139_v38 = vadd.f32 %v5389_v29, %v3096_v43  ;;  %v3099_v18 = vmul.f32 %v5382_v33, %v3056_v24  ;;  %3208 = vst [vmem:[%s5399_s25 + $0xc8] sm:$0xff] %v3172_v32  ;;  %v3054_v60 = vadd.f32 %v2997_v35, %v2744_v61 }
 0x21b   : > { %v4017_v3 = vpop.f32.mrf.mxu0  ;;  %v2703_v21 = vpop.f32.mrf.mxu1  ;;  %v2750_v41 = vadd.f32 %v3980_v7, %v5374_v4 }
 0x21c   : > { %3213 = vst [vmem:[%s5399_s25 + $0xf0] sm:$0xff] %v3177_v40  ;;  %v3175_v39 = vmax.f32 %v3139_v38, 0.0  ;;  %v3142_v27 = vadd.f32 %v5389_v29, %v3099_v18  ;;  %v3059_v17 = vadd.f32 %v4017_v3, %v2749_v50  ;;  %v3097_v19 = vmul.f32 %v5382_v33, %v3054_v60 }
 0x21d   : > { %v3010_v11 = vpop.f32.mrf.mxu0  ;;  %v2748_v2 = vadd.f32 %v2703_v21, %v5377_v31 }
 0x21e   : > { %3211 = vst [vmem:[%s5399_s25 + $0xe0] sm:$0xff] %v3175_v39  ;;  %v3178_v37 = vmax.f32 %v3142_v27, 0.0  ;;  %v3102_v10 = vmul.f32 %v5382_v33, %v3059_v17  ;;  %v3057_v34 = vadd.f32 %v3010_v11, %v2747_v48  ;;  %v3140_v25 = vadd.f32 %v5389_v29, %v3097_v19 }
 0x21f   : > { %v4018_v55 = vpop.f32.mrf.mxu0 }
 0x220   : > { %3214 = vst [vmem:[%s5399_s25 + $0xf8] sm:$0xff] %v3178_v37  ;;  %v3145_v59 = vadd.f32 %v5389_v29, %v3102_v10  ;;  %v3100_v47 = vmul.f32 %v5382_v33, %v3057_v34  ;;  %v3060_v28 = vadd.f32 %v4018_v55, %v2750_v41  ;;  %v3176_v4 = vmax.f32 %v3140_v25, 0.0 }
 0x221   : > { %v3013_v44 = vpop.f32.mrf.mxu0 }
 0x222   : > { %v3181_v13 = vmax.f32 %v3145_v59, 0.0  ;;  %v3143_v12 = vadd.f32 %v5389_v29, %v3100_v47  ;;  %v3103_v36 = vmul.f32 %v5382_v33, %v3060_v28  ;;  %v3058_v5 = vadd.f32 %v3013_v44, %v2748_v2  ;;  %3212 = vst [vmem:[%s5399_s25 + $0xe8] sm:$0xff] %v3176_v4 }
 0x224   : > { %3217 = vst [vmem:[%s5399_s25 + $0x110] sm:$0xff] %v3181_v13  ;;  %v3179_v45 = vmax.f32 %v3143_v12, 0.0  ;;  %v3146_v31 = vadd.f32 %v5389_v29, %v3103_v36  ;;  %v3101_v57 = vmul.f32 %v5382_v33, %v3058_v5 }
 0x226   : > { %3215 = vst [vmem:[%s5399_s25 + $0x100] sm:$0xff] %v3179_v45  ;;  %v3182_v22 = vmax.f32 %v3146_v31, 0.0  ;;  %v3144_v56 = vadd.f32 %v5389_v29, %v3101_v57 }
 0x228   : > { %3218 = vst [vmem:[%s5399_s25 + $0x118] sm:$0xff] %v3182_v22  ;;  %v3180_v58 = vmax.f32 %v3144_v56, 0.0 }
 0x22a   : > { %3216 = vst [vmem:[%s5399_s25 + $0x108] sm:$0xff] %v3180_v58 }
 0x22b PF: > { %s14_s17 = sadd.s32 1, %s4115_s17   ;;  %s5676_s15 = smov %s4111_s16 }
 0x22c   : > { %p11_p5 = scmp.ge.s32.totalorder %s14_s17, 4   ;;  %s5677_s16 = smov %s5679_s18 }
 0x22e   :  { %13 = sbr.rel (!%p11_p5) target bundleno = 2 (0x2), region = 75 }

</bundles_post_ra>
